<compile_context>
chip_gen: v7x
topology: tpu7x:2x2x1
jax: 0.10.0
libtpu: 0.0.40
codegen_flags: <defaults>
</compile_context>

<pallas_src>
import functools

import jax
import jax.numpy as jnp
from jax.experimental import pallas as pl
from jax.experimental.pallas import tpu as pltpu


# ----------------------------------------------------------------------------
# VMEM sizing: derive from the chip (v7x = 64 MiB per TC, v5e/v6e = 128 MiB)
# ----------------------------------------------------------------------------
def _vmem_limit_bytes():
    try:
        cap = int(pltpu.get_tpu_info().vmem_capacity_bytes)
    except Exception:
        cap = 64 * 1024 * 1024
    return int(min(cap // 2, 64 * 1024 * 1024))


# ----------------------------------------------------------------------------
# Kernel 1: full conv stack for one image per grid step.
#   conv0 : 3x3 / stride-2, expressed as a 2x2 / stride-1 conv over the
#           space-to-depth repacked input (4 taps, contiguous slices only).
#   conv1+: 3x3 / stride-1, in-kernel 9-tap accumulation (no im2col).
# All intermediate activations stay in VMEM scratch.
# ----------------------------------------------------------------------------
def _conv_stack_kernel(s_ref, x_ref, w0_ref, b0_ref, w1_ref, b1_ref, o_ref,
                       *act_refs):
    _, Hs, Ws, _ = x_ref.shape            # space-to-depth input extents
    nf = b0_ref.shape[-1]                 # real filter count (no padding)
    n_s1 = w1_ref.shape[0]                # number of stride-1 layers
    H1, W1 = Hs - 1, Ws - 1               # conv0 output spatial size

    scale = s_ref[0, 0]                   # "/255 if max>1" scalar (SMEM)
    b0 = b0_ref[...]                      # (1, nf) f32

    # ---- conv0 (stride 2 via space-to-depth, 4 taps) -----------------------
    a0 = act_refs[0]                      # (H1, W1, nf) f32 scratch
    for y in range(H1):
        acc = jnp.zeros((W1, nf), jnp.float32)
        for ti in range(2):
            row = x_ref[0, y + ti, :, :].astype(jnp.float32)   # (Ws, 4*Cin)
            for tj in range(2):
                acc += jnp.dot(row[tj:tj + W1, :], w0_ref[ti, tj],
                               preferred_element_type=jnp.float32)
        acc = acc * scale + b0            # fold the /255 branch (conv is linear)
        a0[y, :, :] = jnp.maximum(acc, 0.0)

    # ---- stride-1 3x3 layers (9 taps each, activations stay in VMEM) -------
    hi, wi = H1, W1
    src = a0
    for li in range(n_s1):
        ho, wo = hi - 2, wi - 2
        last = li == n_s1 - 1
        dst = None if last else act_refs[(li + 1) % 2]
        bl = b1_ref[li]                   # (1, nf) f32
        for y in range(ho):
            acc = jnp.zeros((wo, nf), jnp.float32)
            for ky in range(3):
                row = src[y + ky, :, :]                         # (W1, nf) f32
                for kx in range(3):
                    acc += jnp.dot(row[kx:kx + wo, :], w1_ref[li, ky, kx],
                                   preferred_element_type=jnp.float32)
            val = jnp.maximum(acc + bl, 0.0)
            if last:
                o_ref[0, y, :, :] = val.astype(o_ref.dtype)
            else:
                dst[y, 0:wo, :] = val
        src = dst
        hi, wi = ho, wo


def conv_stack(scale, x_s2d, w0, b0, w1, b1, *, out_hw, vmem_limit):
    """Fused conv stack, gridded over the batch (>=2 steps -> v7x megacore)."""
    B, Hs, Ws, C4 = x_s2d.shape
    nf = b0.shape[-1]
    n_s1 = w1.shape[0]
    H1, W1 = Hs - 1, Ws - 1
    HL, WL = out_hw

    # Real (unpadded) flop / byte counts for the scheduler hint.
    cin = C4 // 4
    flops = 2 * B * H1 * W1 * (9 * cin) * nf
    hi, wi = H1, W1
    for _ in range(n_s1):
        hi, wi = hi - 2, wi - 2
        flops += 2 * B * hi * wi * 9 * nf * nf
    bytes_accessed = (x_s2d.size * 2 + w0.size * 4 + b0.size * 4
                      + w1.size * 4 + b1.size * 4
                      + B * HL * WL * nf * 2 + 8)

    n_scratch = 1 if n_s1 <= 1 else 2
    return pl.pallas_call(
        _conv_stack_kernel,
        grid=(B,),
        in_specs=[
            pl.BlockSpec(memory_space=pltpu.MemorySpace.SMEM),          # scale
            pl.BlockSpec((1, Hs, Ws, C4), lambda b: (b, 0, 0, 0)),      # s2d obs
            pl.BlockSpec((2, 2, C4, nf), lambda b: (0, 0, 0, 0)),       # conv0 w
            pl.BlockSpec((1, nf), lambda b: (0, 0)),                    # conv0 b
            pl.BlockSpec((n_s1, 3, 3, nf, nf), lambda b: (0, 0, 0, 0, 0)),
            pl.BlockSpec((n_s1, 1, nf), lambda b: (0, 0, 0)),
        ],
        out_specs=pl.BlockSpec((1, HL, WL, nf), lambda b: (b, 0, 0, 0)),
        out_shape=jax.ShapeDtypeStruct((B, HL, WL, nf), jnp.bfloat16),
        scratch_shapes=[pltpu.VMEM((H1, W1, nf), jnp.float32)
                        for _ in range(n_scratch)],
        compiler_params=pltpu.CompilerParams(
            dimension_semantics=("parallel",),
            vmem_limit_bytes=vmem_limit,
        ),
        cost_estimate=pl.CostEstimate(flops=flops, transcendentals=0,
                                      bytes_accessed=bytes_accessed),
    )(scale, x_s2d, w0, b0, w1, b1)


# ----------------------------------------------------------------------------
# Kernel 2: fused Linear + LayerNorm (+ tanh), tiled over the batch.
# ----------------------------------------------------------------------------
def _fc_ln_kernel(h_ref, w_ref, b_ref, g_ref, beta_ref, o_ref, *, apply_tanh):
    y = jnp.dot(h_ref[...], w_ref[...], preferred_element_type=jnp.float32)
    y = y + b_ref[...]
    # LayerNorm over the feature axis (eps = 1e-5, torch default), f32 math.
    mean = jnp.mean(y, axis=-1, keepdims=True)
    var = jnp.mean(jnp.square(y - mean), axis=-1, keepdims=True)
    y = (y - mean) * jax.lax.rsqrt(var + 1e-5)
    y = y * g_ref[...] + beta_ref[...]
    if apply_tanh:
        y = jnp.tanh(y)
    o_ref[...] = y.astype(o_ref.dtype)


def fc_ln(h, w, b, gamma, beta, *, apply_tanh, vmem_limit):
    B, D = h.shape
    F = w.shape[1]
    if B <= 8:
        tb = B                                   # full extent (sublane rule)
    else:
        # >= 2 grid steps (v7x second core), 8-sublane aligned, capped.
        tb = max(8, min(256, ((pl.cdiv(B, 2) + 7) // 8) * 8))
    kernel = functools.partial(_fc_ln_kernel, apply_tanh=apply_tanh)
    cost = pl.CostEstimate(
        flops=2 * B * D * F + 10 * B * F,
        transcendentals=B * F,
        bytes_accessed=B * D * 2 + D * F * 2 + B * F * 4 + 3 * F * 4,
    )
    return pl.pallas_call(
        kernel,
        grid=(pl.cdiv(B, tb),),
        in_specs=[
            pl.BlockSpec((tb, D), lambda i: (i, 0)),
            pl.BlockSpec((D, F), lambda i: (0, 0)),
            pl.BlockSpec((1, F), lambda i: (0, 0)),
            pl.BlockSpec((1, F), lambda i: (0, 0)),
            pl.BlockSpec((1, F), lambda i: (0, 0)),
        ],
        out_specs=pl.BlockSpec((tb, F), lambda i: (i, 0)),
        out_shape=jax.ShapeDtypeStruct((B, F), jnp.float32),
        compiler_params=pltpu.CompilerParams(
            dimension_semantics=("parallel",),
            vmem_limit_bytes=vmem_limit,
        ),
        cost_estimate=cost,
    )(h, w, b, gamma, beta)


# ----------------------------------------------------------------------------
# Encoder wrapper (parameters built deterministically in-script)
# ----------------------------------------------------------------------------
class PixelEncoderPallas:
    def __init__(self, obs_shape, feature_dim, channels=(16, 32, 32),
                 num_layers=2, num_filters=32, output_logits=False,
                 image_channel=3, seed=42):
        assert len(obs_shape) == 3
        assert num_layers >= 2
        self.obs_shape = obs_shape
        self.feature_dim = feature_dim
        self.num_layers = num_layers
        self.num_filters = num_filters
        self.output_logits = output_logits

        C, H, W = obs_shape
        assert H == W, "out_dim trick (like the torch module) assumes square obs"
        assert H % 2 == 0 and W % 2 == 0, "space-to-depth stride-2 path needs even H, W"
        h = (H - 3) // 2 + 1
        w = (W - 3) // 2 + 1
        for _ in range(num_layers - 1):
            h, w = h - 2, w - 2
        self.out_h, self.out_w = h, w
        self.out_dim = w                       # torch uses .shape[-1]

        nf = num_filters
        key = jax.random.PRNGKey(seed)
        keys = jax.random.split(key, 2 * num_layers + 2)

        # ---- conv0: (3,3,C,nf); space-to-depth remap -> (2,2,4*C,nf) --------
        bound0 = 1.0 / ((C * 9) ** 0.5)
        w0_full = jax.random.uniform(keys[0], (3, 3, C, nf),
                                     minval=-bound0, maxval=bound0,
                                     dtype=jnp.float32)
        b0_full = jax.random.uniform(keys[1], (nf,), minval=-bound0,
                                     maxval=bound0, dtype=jnp.float32)
        w0s = jnp.zeros((2, 2, 4 * C, nf), jnp.float32)
        for ti in range(2):
            for tj in range(2):
                for dy in range(2):
                    for dx in range(2):
                        ky, kx = 2 * ti + dy, 2 * tj + dx
                        if ky < 3 and kx < 3:
                            q = (dy * 2 + dx) * C
                            w0s = w0s.at[ti, tj, q:q + C, :].set(w0_full[ky, kx])
        self.w0 = w0s                                        # f32, resident
        self.b0 = b0_full.reshape(1, nf)

        # ---- stride-1 layers: stacked (L-1, 3, 3, nf, nf) -------------------
        bound = 1.0 / ((nf * 9) ** 0.5)
        ws, bs = [], []
        for i in range(1, num_layers):
            wi = jax.random.uniform(keys[2 * i], (3, 3, nf, nf),
                                    minval=-bound, maxval=bound,
                                    dtype=jnp.float32)
            bi = jax.random.uniform(keys[2 * i + 1], (nf,),
                                    minval=-bound, maxval=bound,
                                    dtype=jnp.float32)
            ws.append(wi)
            bs.append(bi)
        self.w1 = jnp.stack(ws)                              # (L-1,3,3,nf,nf) f32
        self.b1 = jnp.stack([b.reshape(1, nf) for b in bs])  # (L-1,1,nf) f32

        # ---- fc: torch (c,y,x)-flatten row order, permuted to NHWC flatten --
        fc_in = nf * self.out_h * self.out_w
        boundf = 1.0 / (fc_in ** 0.5)
        fc_w_cyx = jax.random.uniform(keys[-2], (fc_in, feature_dim),
                                      minval=-boundf, maxval=boundf,
                                      dtype=jnp.float32)
        fc_b = jax.random.uniform(keys[-1], (feature_dim,),
                                  minval=-boundf, maxval=boundf,
                                  dtype=jnp.float32)
        self.fc_w = (fc_w_cyx.reshape(nf, self.out_h, self.out_w, feature_dim)
                     .transpose(1, 2, 0, 3)
                     .reshape(self.out_h * self.out_w * nf, feature_dim)
                     .astype(jnp.bfloat16))
        self.fc_b = fc_b.reshape(1, feature_dim)
        self.ln_g = jnp.ones((1, feature_dim), jnp.float32)
        self.ln_b = jnp.zeros((1, feature_dim), jnp.float32)

        # f32 torch-layout copies for the pure-JAX reference check.
        self._ref = dict(W0=w0_full, b0=b0_full, Ws=ws, bs=bs,
                         fc_w=fc_w_cyx, fc_b=fc_b)

        self._vmem_limit = _vmem_limit_bytes()
        self._forward = jax.jit(self._forward_impl)

    # ------------------------------------------------------------------ fwd
    def _forward_impl(self, obs):
        # obs: (B, C, H, W) float — same convention as the PyTorch module.
        obs = obs.astype(jnp.float32)
        # "if obs.max() > 1.0: obs = obs / 255.0" -> one scalar, folded into
        # conv0's f32 accumulation inside the kernel (conv is linear).
        scale = jnp.where(jnp.max(obs) > 1.0, 1.0 / 255.0, 1.0)
        scale = scale.astype(jnp.float32).reshape(1, 1)

        B = obs.shape[0]
        C, H, W = self.obs_shape
        Hs, Ws = H // 2, W // 2

        # NCHW -> NHWC, then space-to-depth (2x2 -> channels) so the stride-2
        # conv becomes stride-1 inside the kernel (contiguous slices only).
        x = jnp.transpose(obs, (0, 2, 3, 1))
        x = x.reshape(B, Hs, 2, Ws, 2, C).transpose(0, 1, 3, 2, 4, 5)
        x = x.reshape(B, Hs, Ws, 4 * C).astype(jnp.bfloat16)

        conv = conv_stack(scale, x, self.w0, self.b0, self.w1, self.b1,
                          out_hw=(self.out_h, self.out_w),
                          vmem_limit=self._vmem_limit)

        # Torch's (C,H,W)-flatten order is folded into fc_w's row permutation,
        # so the NHWC flatten here is a plain row-major reshape.
        h = conv.reshape(B, self.out_h * self.out_w * self.num_filters)
        return fc_ln(h, self.fc_w, self.fc_b, self.ln_g, self.ln_b,
                     apply_tanh=not self.output_logits,
                     vmem_limit=self._vmem_limit)

    def __call__(self, obs):
        return self._forward(obs)

    # ------------------------------------------------ pure-JAX f32 reference
    def reference_forward(self, obs):
        p = self._ref
        obs = obs.astype(jnp.float32)
        obs = jnp.where(jnp.max(obs) > 1.0, obs / 255.0, obs)
        x = jnp.transpose(obs, (0, 2, 3, 1))
        dn = ('NHWC', 'HWIO', 'NHWC')
        x = jax.lax.conv_general_dilated(x, p['W0'], (2, 2), 'VALID',
                                         dimension_numbers=dn)
        x = jax.nn.relu(x + p['b0'])
        for wi, bi in zip(p['Ws'], p['bs']):
            x = jax.lax.conv_general_dilated(x, wi, (1, 1), 'VALID',
                                             dimension_numbers=dn)
            x = jax.nn.relu(x + bi)
        h = jnp.transpose(x, (0, 3, 1, 2)).reshape(x.shape[0], -1)   # (c,y,x)
        y = h @ p['fc_w'] + p['fc_b']
        mean = y.mean(-1, keepdims=True)
        var = ((y - mean) ** 2).mean(-1, keepdims=True)
        y = (y - mean) * jax.lax.rsqrt(var + 1e-5)
        if not self.output_logits:
            y = jnp.tanh(y)
        return y

    # TODO(synk): self.outputs bookkeeping / log() / detach / reparameterize /
    # copy_conv_weights_from are training-time utilities with no effect on the
    # forward math; omitted.


if __name__ == "__main__":
    obs_shape = (3, 16, 16)       # (C, H, W), small but consistent with the module
    feature_dim = 32
    batch = 2

    enc = PixelEncoderPallas(obs_shape, feature_dim,
                             num_layers=2, num_filters=32, output_logits=False)

    key = jax.random.PRNGKey(0)
    obs = jax.random.uniform(key, (batch,) + obs_shape,
                             minval=0.0, maxval=255.0, dtype=jnp.float32)

    out = jax.block_until_ready(enc(obs))

    assert out.shape == (batch, feature_dim)
    assert bool(jnp.all(jnp.isfinite(out)))
    assert bool(jnp.all(jnp.abs(out) <= 1.0))   # tanh output range

    # Pure-JAX f32 reference; bf16 HBM activations give a small, expected
    # divergence — this bound only catches structural bugs.
    ref = jax.block_until_ready(enc.reference_forward(obs))
    assert float(jnp.max(jnp.abs(out - ref))) < 0.15

    print("KERNEL_OK")
</pallas_src>

<mosaic_0001>
module attributes {stable_mosaic.version = 11 : i64} {
  func.func @_fc_ln_kernel(%arg0: i32, %arg1: memref<2x800xbf16, #tpu.memory_space<vmem>>, %arg2: memref<800x32xbf16, #tpu.memory_space<vmem>>, %arg3: memref<1x32xf32, #tpu.memory_space<vmem>>, %arg4: memref<1x32xf32, #tpu.memory_space<vmem>>, %arg5: memref<1x32xf32, #tpu.memory_space<vmem>>, %arg6: memref<2x32xf32, #tpu.memory_space<vmem>>) attributes {dimension_semantics = [#tpu.dimension_semantics<parallel>], iteration_bounds = array<i64: 1>, scalar_prefetch = 0 : i64, scratch_operands = 0 : i64, tpu.core_type = #tpu.core_type<tc>, window_params = [{transform_indices = @transform_0, window_bounds = array<i64: 2, 800>}, {pipeline_mode = #tpu.pipeline_mode<synchronous>, transform_indices = @transform_1, window_bounds = array<i64: 800, 32>}, {pipeline_mode = #tpu.pipeline_mode<synchronous>, transform_indices = @transform_2, window_bounds = array<i64: 1, 32>}, {pipeline_mode = #tpu.pipeline_mode<synchronous>, transform_indices = @transform_3, window_bounds = array<i64: 1, 32>}, {pipeline_mode = #tpu.pipeline_mode<synchronous>, transform_indices = @transform_4, window_bounds = array<i64: 1, 32>}, {transform_indices = @transform_5, window_bounds = array<i64: 2, 32>}]} {
    %c0 = arith.constant 0 : index
    %c0_0 = arith.constant 0 : index
    %0 = vector.load %arg1[%c0, %c0_0] : memref<2x800xbf16, #tpu.memory_space<vmem>>, vector<2x800xbf16>
    %c0_1 = arith.constant 0 : index
    %c0_2 = arith.constant 0 : index
    %1 = vector.load %arg2[%c0_1, %c0_2] : memref<800x32xbf16, #tpu.memory_space<vmem>>, vector<800x32xbf16>
    %cst = arith.constant dense<0.000000e+00> : vector<2x32xf32>
    %2 = tpu.matmul %0, %1, %cst {dimension_numbers = #tpu.dot_dimension_numbers<[1], [0], [0], [1], [0, 0, 1, 1], [], []>} : vector<2x800xbf16>, vector<800x32xbf16>, vector<2x32xf32> -> vector<2x32xf32>
    %c0_3 = arith.constant 0 : index
    %c0_4 = arith.constant 0 : index
    %3 = vector.load %arg3[%c0_3, %c0_4] : memref<1x32xf32, #tpu.memory_space<vmem>>, vector<1x32xf32>
    %4 = vector.broadcast %3 : vector<1x32xf32> to vector<2x32xf32>
    %5 = arith.addf %2, %4 : vector<2x32xf32>
    %cst_5 = arith.constant dense<0.000000e+00> : vector<2xf32>
    %6 = vector.multi_reduction <add>, %5, %cst_5 [1] : vector<2x32xf32> to vector<2xf32>
    %7 = vector.shape_cast %6 : vector<2xf32> to vector<2x1xf32>
    %cst_6 = arith.constant 3.200000e+01 : f32
    %8 = vector.broadcast %cst_6 : f32 to vector<2x1xf32>
    %9 = arith.divf %7, %8 : vector<2x1xf32>
    %10 = vector.broadcast %9 : vector<2x1xf32> to vector<2x32xf32>
    %11 = arith.subf %5, %10 : vector<2x32xf32>
    %12 = arith.mulf %11, %11 : vector<2x32xf32>
    %cst_7 = arith.constant dense<0.000000e+00> : vector<2xf32>
    %13 = vector.multi_reduction <add>, %12, %cst_7 [1] : vector<2x32xf32> to vector<2xf32>
    %14 = vector.shape_cast %13 : vector<2xf32> to vector<2x1xf32>
    %cst_8 = arith.constant 3.200000e+01 : f32
    %15 = vector.broadcast %cst_8 : f32 to vector<2x1xf32>
    %16 = arith.divf %14, %15 : vector<2x1xf32>
    %17 = vector.broadcast %9 : vector<2x1xf32> to vector<2x32xf32>
    %18 = arith.subf %5, %17 : vector<2x32xf32>
    %cst_9 = arith.constant 9.99999974E-6 : f32
    %19 = vector.broadcast %cst_9 : f32 to vector<2x1xf32>
    %20 = arith.addf %16, %19 : vector<2x1xf32>
    %21 = math.rsqrt %20 : vector<2x1xf32>
    %22 = vector.broadcast %21 : vector<2x1xf32> to vector<2x32xf32>
    %23 = arith.mulf %18, %22 : vector<2x32xf32>
    %c0_10 = arith.constant 0 : index
    %c0_11 = arith.constant 0 : index
    %24 = vector.load %arg4[%c0_10, %c0_11] : memref<1x32xf32, #tpu.memory_space<vmem>>, vector<1x32xf32>
    %25 = vector.broadcast %24 : vector<1x32xf32> to vector<2x32xf32>
    %26 = arith.mulf %23, %25 : vector<2x32xf32>
    %c0_12 = arith.constant 0 : index
    %c0_13 = arith.constant 0 : index
    %27 = vector.load %arg5[%c0_12, %c0_13] : memref<1x32xf32, #tpu.memory_space<vmem>>, vector<1x32xf32>
    %28 = vector.broadcast %27 : vector<1x32xf32> to vector<2x32xf32>
    %29 = arith.addf %26, %28 : vector<2x32xf32>
    %30 = math.tanh %29 : vector<2x32xf32>
    %c0_14 = arith.constant 0 : index
    %c0_15 = arith.constant 0 : index
    %31 = vector.load %arg6[%c0_14, %c0_15] : memref<2x32xf32, #tpu.memory_space<vmem>>, vector<2x32xf32>
    tpu.vector_store %arg6[%c0_14, %c0_15], %30 {strides = array<i32>} : memref<2x32xf32, #tpu.memory_space<vmem>>, vector<2x32xf32>,
    return
  }
  func.func @transform_0(%arg0: i32) -> (i32, i32) {
    %c0_i32 = arith.constant 0 : i32
    %c0_i32_0 = arith.constant 0 : i32
    return %arg0, %c0_i32 : i32, i32
  }
  func.func @transform_1(%arg0: i32) -> (i32, i32) {
    %c0_i32 = arith.constant 0 : i32
    %c0_i32_0 = arith.constant 0 : i32
    %c0_i32_1 = arith.constant 0 : i32
    return %c0_i32, %c0_i32_0 : i32, i32
  }
  func.func @transform_2(%arg0: i32) -> (i32, i32) {
    %c0_i32 = arith.constant 0 : i32
    %c0_i32_0 = arith.constant 0 : i32
    %c0_i32_1 = arith.constant 0 : i32
    return %c0_i32, %c0_i32_0 : i32, i32
  }
  func.func @transform_3(%arg0: i32) -> (i32, i32) {
    %c0_i32 = arith.constant 0 : i32
    %c0_i32_0 = arith.constant 0 : i32
    %c0_i32_1 = arith.constant 0 : i32
    return %c0_i32, %c0_i32_0 : i32, i32
  }
  func.func @transform_4(%arg0: i32) -> (i32, i32) {
    %c0_i32 = arith.constant 0 : i32
    %c0_i32_0 = arith.constant 0 : i32
    %c0_i32_1 = arith.constant 0 : i32
    return %c0_i32, %c0_i32_0 : i32, i32
  }
  func.func @transform_5(%arg0: i32) -> (i32, i32) {
    %c0_i32 = arith.constant 0 : i32
    %c0_i32_0 = arith.constant 0 : i32
    return %arg0, %c0_i32 : i32, i32
  }
}

module attributes {stable_mosaic.version = 11 : i64} {
  func.func @_conv_stack_kernel(%arg0: i32, %arg1: memref<1x1xf32, #tpu.memory_space<smem>>, %arg2: memref<1x8x8x12xbf16, #tpu.memory_space<vmem>>, %arg3: memref<2x2x12x32xf32, #tpu.memory_space<vmem>>, %arg4: memref<1x32xf32, #tpu.memory_space<vmem>>, %arg5: memref<1x3x3x32x32xf32, #tpu.memory_space<vmem>>, %arg6: memref<1x1x32xf32, #tpu.memory_space<vmem>>, %arg7: memref<1x5x5x32xbf16, #tpu.memory_space<vmem>>, %arg8: memref<7x7x32xf32, #tpu.memory_space<vmem>>) attributes {dimension_semantics = [#tpu.dimension_semantics<parallel>], iteration_bounds = array<i64: 2>, scalar_prefetch = 0 : i64, scratch_operands = 1 : i64, tpu.core_type = #tpu.core_type<tc>, window_params = [{transform_indices = @transform_0, window_bounds = array<i64: 1, 1>}, {transform_indices = @transform_1, window_bounds = array<i64: 1, 8, 8, 12>}, {pipeline_mode = #tpu.pipeline_mode<synchronous>, transform_indices = @transform_2, window_bounds = array<i64: 2, 2, 12, 32>}, {pipeline_mode = #tpu.pipeline_mode<synchronous>, transform_indices = @transform_3, window_bounds = array<i64: 1, 32>}, {pipeline_mode = #tpu.pipeline_mode<synchronous>, transform_indices = @transform_4, window_bounds = array<i64: 1, 3, 3, 32, 32>}, {pipeline_mode = #tpu.pipeline_mode<synchronous>, transform_indices = @transform_5, window_bounds = array<i64: 1, 1, 32>}, {transform_indices = @transform_6, window_bounds = array<i64: 1, 5, 5, 32>}]} {
    %c0 = arith.constant 0 : index
    %c0_0 = arith.constant 0 : index
    %0 = memref.load %arg1[%c0, %c0_0] : memref<1x1xf32, #tpu.memory_space<smem>>
    %c0_1 = arith.constant 0 : index
    %c0_2 = arith.constant 0 : index
    %1 = vector.load %arg4[%c0_1, %c0_2] : memref<1x32xf32, #tpu.memory_space<vmem>>, vector<1x32xf32>
    %cst = arith.constant 0.000000e+00 : f32
    %2 = vector.broadcast %cst : f32 to vector<7x32xf32>
    %c0_3 = arith.constant 0 : index
    %c0_4 = arith.constant 0 : index
    %c0_5 = arith.constant 0 : index
    %c0_6 = arith.constant 0 : index
    %3 = vector.load %arg2[%c0_3, %c0_4, %c0_5, %c0_6] : memref<1x8x8x12xbf16, #tpu.memory_space<vmem>>, vector<1x1x8x12xbf16>
    %4 = vector.shape_cast %3 : vector<1x1x8x12xbf16> to vector<8x12xbf16>
    %5 = arith.extf %4 : vector<8x12xbf16> to vector<8x12xf32>
    %6 = vector.extract_strided_slice %5 {offsets = [0, 0], sizes = [7, 12], strides = [1, 1]} : vector<8x12xf32> to vector<7x12xf32>
    %c0_7 = arith.constant 0 : index
    %c0_8 = arith.constant 0 : index
    %c0_9 = arith.constant 0 : index
    %c0_10 = arith.constant 0 : index
    %7 = vector.load %arg3[%c0_7, %c0_8, %c0_9, %c0_10] : memref<2x2x12x32xf32, #tpu.memory_space<vmem>>, vector<1x1x12x32xf32>
    %8 = vector.shape_cast %7 : vector<1x1x12x32xf32> to vector<12x32xf32>
    %cst_11 = arith.constant dense<0.000000e+00> : vector<7x32xf32>
    %9 = tpu.matmul %6, %8, %cst_11 {dimension_numbers = #tpu.dot_dimension_numbers<[1], [0], [0], [1], [0, 0, 1, 1], [], []>} : vector<7x12xf32>, vector<12x32xf32>, vector<7x32xf32> -> vector<7x32xf32>
    %10 = arith.addf %2, %9 : vector<7x32xf32>
    %11 = vector.extract_strided_slice %5 {offsets = [1, 0], sizes = [7, 12], strides = [1, 1]} : vector<8x12xf32> to vector<7x12xf32>
    %c0_12 = arith.constant 0 : index
    %c1 = arith.constant 1 : index
    %c0_13 = arith.constant 0 : index
    %c0_14 = arith.constant 0 : index
    %12 = vector.load %arg3[%c0_12, %c1, %c0_13, %c0_14] : memref<2x2x12x32xf32, #tpu.memory_space<vmem>>, vector<1x1x12x32xf32>
    %13 = vector.shape_cast %12 : vector<1x1x12x32xf32> to vector<12x32xf32>
    %cst_15 = arith.constant dense<0.000000e+00> : vector<7x32xf32>
    %14 = tpu.matmul %11, %13, %cst_15 {dimension_numbers = #tpu.dot_dimension_numbers<[1], [0], [0], [1], [0, 0, 1, 1], [], []>} : vector<7x12xf32>, vector<12x32xf32>, vector<7x32xf32> -> vector<7x32xf32>
    %15 = arith.addf %10, %14 : vector<7x32xf32>
    %c0_16 = arith.constant 0 : index
    %c1_17 = arith.constant 1 : index
    %c0_18 = arith.constant 0 : index
    %c0_19 = arith.constant 0 : index
    %16 = vector.load %arg2[%c0_16, %c1_17, %c0_18, %c0_19] : memref<1x8x8x12xbf16, #tpu.memory_space<vmem>>, vector<1x1x8x12xbf16>
    %17 = vector.shape_cast %16 : vector<1x1x8x12xbf16> to vector<8x12xbf16>
    %18 = arith.extf %17 : vector<8x12xbf16> to vector<8x12xf32>
    %19 = vector.extract_strided_slice %18 {offsets = [0, 0], sizes = [7, 12], strides = [1, 1]} : vector<8x12xf32> to vector<7x12xf32>
    %c1_20 = arith.constant 1 : index
    %c0_21 = arith.constant 0 : index
    %c0_22 = arith.constant 0 : index
    %c0_23 = arith.constant 0 : index
    %20 = vector.load %arg3[%c1_20, %c0_21, %c0_22, %c0_23] : memref<2x2x12x32xf32, #tpu.memory_space<vmem>>, vector<1x1x12x32xf32>
    %21 = vector.shape_cast %20 : vector<1x1x12x32xf32> to vector<12x32xf32>
    %cst_24 = arith.constant dense<0.000000e+00> : vector<7x32xf32>
    %22 = tpu.matmul %19, %21, %cst_24 {dimension_numbers = #tpu.dot_dimension_numbers<[1], [0], [0], [1], [0, 0, 1, 1], [], []>} : vector<7x12xf32>, vector<12x32xf32>, vector<7x32xf32> -> vector<7x32xf32>
    %23 = arith.addf %15, %22 : vector<7x32xf32>
    %24 = vector.extract_strided_slice %18 {offsets = [1, 0], sizes = [7, 12], strides = [1, 1]} : vector<8x12xf32> to vector<7x12xf32>
    %c1_25 = arith.constant 1 : index
    %c1_26 = arith.constant 1 : index
    %c0_27 = arith.constant 0 : index
    %c0_28 = arith.constant 0 : index
    %25 = vector.load %arg3[%c1_25, %c1_26, %c0_27, %c0_28] : memref<2x2x12x32xf32, #tpu.memory_space<vmem>>, vector<1x1x12x32xf32>
    %26 = vector.shape_cast %25 : vector<1x1x12x32xf32> to vector<12x32xf32>
    %cst_29 = arith.constant dense<0.000000e+00> : vector<7x32xf32>
    %27 = tpu.matmul %24, %26, %cst_29 {dimension_numbers = #tpu.dot_dimension_numbers<[1], [0], [0], [1], [0, 0, 1, 1], [], []>} : vector<7x12xf32>, vector<12x32xf32>, vector<7x32xf32> -> vector<7x32xf32>
    %28 = arith.addf %23, %27 : vector<7x32xf32>
    %29 = vector.broadcast %0 : f32 to vector<7x32xf32>
    %30 = arith.mulf %28, %29 : vector<7x32xf32>
    %31 = vector.broadcast %1 : vector<1x32xf32> to vector<7x32xf32>
    %32 = arith.addf %30, %31 : vector<7x32xf32>
    %cst_30 = arith.constant 0.000000e+00 : f32
    %33 = vector.broadcast %cst_30 : f32 to vector<7x32xf32>
    %34 = arith.maximumf %32, %33 : vector<7x32xf32>
    %c0_31 = arith.constant 0 : index
    %c0_32 = arith.constant 0 : index
    %c0_33 = arith.constant 0 : index
    %35 = vector.load %arg8[%c0_31, %c0_32, %c0_33] : memref<7x7x32xf32, #tpu.memory_space<vmem>>, vector<1x7x32xf32>
    %36 = vector.shape_cast %35 : vector<1x7x32xf32> to vector<7x32xf32>
    %37 = vector.shape_cast %34 : vector<7x32xf32> to vector<1x7x32xf32>
    tpu.vector_store %arg8[%c0_31, %c0_32, %c0_33], %37 {strides = array<i32>} : memref<7x7x32xf32, #tpu.memory_space<vmem>>, vector<1x7x32xf32>,
    %cst_34 = arith.constant 0.000000e+00 : f32
    %38 = vector.broadcast %cst_34 : f32 to vector<7x32xf32>
    %c0_35 = arith.constant 0 : index
    %c1_36 = arith.constant 1 : index
    %c0_37 = arith.constant 0 : index
    %c0_38 = arith.constant 0 : index
    %39 = vector.load %arg2[%c0_35, %c1_36, %c0_37, %c0_38] : memref<1x8x8x12xbf16, #tpu.memory_space<vmem>>, vector<1x1x8x12xbf16>
    %40 = vector.shape_cast %39 : vector<1x1x8x12xbf16> to vector<8x12xbf16>
    %41 = arith.extf %40 : vector<8x12xbf16> to vector<8x12xf32>
    %42 = vector.extract_strided_slice %41 {offsets = [0, 0], sizes = [7, 12], strides = [1, 1]} : vector<8x12xf32> to vector<7x12xf32>
    %c0_39 = arith.constant 0 : index
    %c0_40 = arith.constant 0 : index
    %c0_41 = arith.constant 0 : index
    %c0_42 = arith.constant 0 : index
    %43 = vector.load %arg3[%c0_39, %c0_40, %c0_41, %c0_42] : memref<2x2x12x32xf32, #tpu.memory_space<vmem>>, vector<1x1x12x32xf32>
    %44 = vector.shape_cast %43 : vector<1x1x12x32xf32> to vector<12x32xf32>
    %cst_43 = arith.constant dense<0.000000e+00> : vector<7x32xf32>
    %45 = tpu.matmul %42, %44, %cst_43 {dimension_numbers = #tpu.dot_dimension_numbers<[1], [0], [0], [1], [0, 0, 1, 1], [], []>} : vector<7x12xf32>, vector<12x32xf32>, vector<7x32xf32> -> vector<7x32xf32>
    %46 = arith.addf %38, %45 : vector<7x32xf32>
    %47 = vector.extract_strided_slice %41 {offsets = [1, 0], sizes = [7, 12], strides = [1, 1]} : vector<8x12xf32> to vector<7x12xf32>
    %c0_44 = arith.constant 0 : index
    %c1_45 = arith.constant 1 : index
    %c0_46 = arith.constant 0 : index
    %c0_47 = arith.constant 0 : index
    %48 = vector.load %arg3[%c0_44, %c1_45, %c0_46, %c0_47] : memref<2x2x12x32xf32, #tpu.memory_space<vmem>>, vector<1x1x12x32xf32>
    %49 = vector.shape_cast %48 : vector<1x1x12x32xf32> to vector<12x32xf32>
    %cst_48 = arith.constant dense<0.000000e+00> : vector<7x32xf32>
    %50 = tpu.matmul %47, %49, %cst_48 {dimension_numbers = #tpu.dot_dimension_numbers<[1], [0], [0], [1], [0, 0, 1, 1], [], []>} : vector<7x12xf32>, vector<12x32xf32>, vector<7x32xf32> -> vector<7x32xf32>
    %51 = arith.addf %46, %50 : vector<7x32xf32>
    %c0_49 = arith.constant 0 : index
    %c2 = arith.constant 2 : index
    %c0_50 = arith.constant 0 : index
    %c0_51 = arith.constant 0 : index
    %52 = vector.load %arg2[%c0_49, %c2, %c0_50, %c0_51] : memref<1x8x8x12xbf16, #tpu.memory_space<vmem>>, vector<1x1x8x12xbf16>
    %53 = vector.shape_cast %52 : vector<1x1x8x12xbf16> to vector<8x12xbf16>
    %54 = arith.extf %53 : vector<8x12xbf16> to vector<8x12xf32>
    %55 = vector.extract_strided_slice %54 {offsets = [0, 0], sizes = [7, 12], strides = [1, 1]} : vector<8x12xf32> to vector<7x12xf32>
    %c1_52 = arith.constant 1 : index
    %c0_53 = arith.constant 0 : index
    %c0_54 = arith.constant 0 : index
    %c0_55 = arith.constant 0 : index
    %56 = vector.load %arg3[%c1_52, %c0_53, %c0_54, %c0_55] : memref<2x2x12x32xf32, #tpu.memory_space<vmem>>, vector<1x1x12x32xf32>
    %57 = vector.shape_cast %56 : vector<1x1x12x32xf32> to vector<12x32xf32>
    %cst_56 = arith.constant dense<0.000000e+00> : vector<7x32xf32>
    %58 = tpu.matmul %55, %57, %cst_56 {dimension_numbers = #tpu.dot_dimension_numbers<[1], [0], [0], [1], [0, 0, 1, 1], [], []>} : vector<7x12xf32>, vector<12x32xf32>, vector<7x32xf32> -> vector<7x32xf32>
    %59 = arith.addf %51, %58 : vector<7x32xf32>
    %60 = vector.extract_strided_slice %54 {offsets = [1, 0], sizes = [7, 12], strides = [1, 1]} : vector<8x12xf32> to vector<7x12xf32>
    %c1_57 = arith.constant 1 : index
    %c1_58 = arith.constant 1 : index
    %c0_59 = arith.constant 0 : index
    %c0_60 = arith.constant 0 : index
    %61 = vector.load %arg3[%c1_57, %c1_58, %c0_59, %c0_60] : memref<2x2x12x32xf32, #tpu.memory_space<vmem>>, vector<1x1x12x32xf32>
    %62 = vector.shape_cast %61 : vector<1x1x12x32xf32> to vector<12x32xf32>
    %cst_61 = arith.constant dense<0.000000e+00> : vector<7x32xf32>
    %63 = tpu.matmul %60, %62, %cst_61 {dimension_numbers = #tpu.dot_dimension_numbers<[1], [0], [0], [1], [0, 0, 1, 1], [], []>} : vector<7x12xf32>, vector<12x32xf32>, vector<7x32xf32> -> vector<7x32xf32>
    %64 = arith.addf %59, %63 : vector<7x32xf32>
    %65 = vector.broadcast %0 : f32 to vector<7x32xf32>
    %66 = arith.mulf %64, %65 : vector<7x32xf32>
    %67 = vector.broadcast %1 : vector<1x32xf32> to vector<7x32xf32>
    %68 = arith.addf %66, %67 : vector<7x32xf32>
    %cst_62 = arith.constant 0.000000e+00 : f32
    %69 = vector.broadcast %cst_62 : f32 to vector<7x32xf32>
    %70 = arith.maximumf %68, %69 : vector<7x32xf32>
    %c1_63 = arith.constant 1 : index
    %c0_64 = arith.constant 0 : index
    %c0_65 = arith.constant 0 : index
    %71 = vector.load %arg8[%c1_63, %c0_64, %c0_65] : memref<7x7x32xf32, #tpu.memory_space<vmem>>, vector<1x7x32xf32>
    %72 = vector.shape_cast %71 : vector<1x7x32xf32> to vector<7x32xf32>
    %73 = vector.shape_cast %70 : vector<7x32xf32> to vector<1x7x32xf32>
    tpu.vector_store %arg8[%c1_63, %c0_64, %c0_65], %73 {strides = array<i32>} : memref<7x7x32xf32, #tpu.memory_space<vmem>>, vector<1x7x32xf32>,
    %cst_66 = arith.constant 0.000000e+00 : f32
    %74 = vector.broadcast %cst_66 : f32 to vector<7x32xf32>
    %c0_67 = arith.constant 0 : index
    %c2_68 = arith.constant 2 : index
    %c0_69 = arith.constant 0 : index
    %c0_70 = arith.constant 0 : index
    %75 = vector.load %arg2[%c0_67, %c2_68, %c0_69, %c0_70] : memref<1x8x8x12xbf16, #tpu.memory_space<vmem>>, vector<1x1x8x12xbf16>
    %76 = vector.shape_cast %75 : vector<1x1x8x12xbf16> to vector<8x12xbf16>
    %77 = arith.extf %76 : vector<8x12xbf16> to vector<8x12xf32>
    %78 = vector.extract_strided_slice %77 {offsets = [0, 0], sizes = [7, 12], strides = [1, 1]} : vector<8x12xf32> to vector<7x12xf32>
    %c0_71 = arith.constant 0 : index
    %c0_72 = arith.constant 0 : index
    %c0_73 = arith.constant 0 : index
    %c0_74 = arith.constant 0 : index
    %79 = vector.load %arg3[%c0_71, %c0_72, %c0_73, %c0_74] : memref<2x2x12x32xf32, #tpu.memory_space<vmem>>, vector<1x1x12x32xf32>
    %80 = vector.shape_cast %79 : vector<1x1x12x32xf32> to vector<12x32xf32>
    %cst_75 = arith.constant dense<0.000000e+00> : vector<7x32xf32>
    %81 = tpu.matmul %78, %80, %cst_75 {dimension_numbers = #tpu.dot_dimension_numbers<[1], [0], [0], [1], [0, 0, 1, 1], [], []>} : vector<7x12xf32>, vector<12x32xf32>, vector<7x32xf32> -> vector<7x32xf32>
    %82 = arith.addf %74, %81 : vector<7x32xf32>
    %83 = vector.extract_strided_slice %77 {offsets = [1, 0], sizes = [7, 12], strides = [1, 1]} : vector<8x12xf32> to vector<7x12xf32>
    %c0_76 = arith.constant 0 : index
    %c1_77 = arith.constant 1 : index
    %c0_78 = arith.constant 0 : index
    %c0_79 = arith.constant 0 : index
    %84 = vector.load %arg3[%c0_76, %c1_77, %c0_78, %c0_79] : memref<2x2x12x32xf32, #tpu.memory_space<vmem>>, vector<1x1x12x32xf32>
    %85 = vector.shape_cast %84 : vector<1x1x12x32xf32> to vector<12x32xf32>
    %cst_80 = arith.constant dense<0.000000e+00> : vector<7x32xf32>
    %86 = tpu.matmul %83, %85, %cst_80 {dimension_numbers = #tpu.dot_dimension_numbers<[1], [0], [0], [1], [0, 0, 1, 1], [], []>} : vector<7x12xf32>, vector<12x32xf32>, vector<7x32xf32> -> vector<7x32xf32>
    %87 = arith.addf %82, %86 : vector<7x32xf32>
    %c0_81 = arith.constant 0 : index
    %c3 = arith.constant 3 : index
    %c0_82 = arith.constant 0 : index
    %c0_83 = arith.constant 0 : index
    %88 = vector.load %arg2[%c0_81, %c3, %c0_82, %c0_83] : memref<1x8x8x12xbf16, #tpu.memory_space<vmem>>, vector<1x1x8x12xbf16>
    %89 = vector.shape_cast %88 : vector<1x1x8x12xbf16> to vector<8x12xbf16>
    %90 = arith.extf %89 : vector<8x12xbf16> to vector<8x12xf32>
    %91 = vector.extract_strided_slice %90 {offsets = [0, 0], sizes = [7, 12], strides = [1, 1]} : vector<8x12xf32> to vector<7x12xf32>
    %c1_84 = arith.constant 1 : index
    %c0_85 = arith.constant 0 : index
    %c0_86 = arith.constant 0 : index
    %c0_87 = arith.constant 0 : index
    %92 = vector.load %arg3[%c1_84, %c0_85, %c0_86, %c0_87] : memref<2x2x12x32xf32, #tpu.memory_space<vmem>>, vector<1x1x12x32xf32>
    %93 = vector.shape_cast %92 : vector<1x1x12x32xf32> to vector<12x32xf32>
    %cst_88 = arith.constant dense<0.000000e+00> : vector<7x32xf32>
    %94 = tpu.matmul %91, %93, %cst_88 {dimension_numbers = #tpu.dot_dimension_numbers<[1], [0], [0], [1], [0, 0, 1, 1], [], []>} : vector<7x12xf32>, vector<12x32xf32>, vector<7x32xf32> -> vector<7x32xf32>
    %95 = arith.addf %87, %94 : vector<7x32xf32>
    %96 = vector.extract_strided_slice %90 {offsets = [1, 0], sizes = [7, 12], strides = [1, 1]} : vector<8x12xf32> to vector<7x12xf32>
    %c1_89 = arith.constant 1 : index
    %c1_90 = arith.constant 1 : index
    %c0_91 = arith.constant 0 : index
    %c0_92 = arith.constant 0 : index
    %97 = vector.load %arg3[%c1_89, %c1_90, %c0_91, %c0_92] : memref<2x2x12x32xf32, #tpu.memory_space<vmem>>, vector<1x1x12x32xf32>
    %98 = vector.shape_cast %97 : vector<1x1x12x32xf32> to vector<12x32xf32>
    %cst_93 = arith.constant dense<0.000000e+00> : vector<7x32xf32>
    %99 = tpu.matmul %96, %98, %cst_93 {dimension_numbers = #tpu.dot_dimension_numbers<[1], [0], [0], [1], [0, 0, 1, 1], [], []>} : vector<7x12xf32>, vector<12x32xf32>, vector<7x32xf32> -> vector<7x32xf32>
    %100 = arith.addf %95, %99 : vector<7x32xf32>
    %101 = vector.broadcast %0 : f32 to vector<7x32xf32>
    %102 = arith.mulf %100, %101 : vector<7x32xf32>
    %103 = vector.broadcast %1 : vector<1x32xf32> to vector<7x32xf32>
    %104 = arith.addf %102, %103 : vector<7x32xf32>
    %cst_94 = arith.constant 0.000000e+00 : f32
    %105 = vector.broadcast %cst_94 : f32 to vector<7x32xf32>
    %106 = arith.maximumf %104, %105 : vector<7x32xf32>
    %c2_95 = arith.constant 2 : index
    %c0_96 = arith.constant 0 : index
    %c0_97 = arith.constant 0 : index
    %107 = vector.load %arg8[%c2_95, %c0_96, %c0_97] : memref<7x7x32xf32, #tpu.memory_space<vmem>>, vector<1x7x32xf32>
    %108 = vector.shape_cast %107 : vector<1x7x32xf32> to vector<7x32xf32>
    %109 = vector.shape_cast %106 : vector<7x32xf32> to vector<1x7x32xf32>
    tpu.vector_store %arg8[%c2_95, %c0_96, %c0_97], %109 {strides = array<i32>} : memref<7x7x32xf32, #tpu.memory_space<vmem>>, vector<1x7x32xf32>,
    %cst_98 = arith.constant 0.000000e+00 : f32
    %110 = vector.broadcast %cst_98 : f32 to vector<7x32xf32>
    %c0_99 = arith.constant 0 : index
    %c3_100 = arith.constant 3 : index
    %c0_101 = arith.constant 0 : index
    %c0_102 = arith.constant 0 : index
    %111 = vector.load %arg2[%c0_99, %c3_100, %c0_101, %c0_102] : memref<1x8x8x12xbf16, #tpu.memory_space<vmem>>, vector<1x1x8x12xbf16>
    %112 = vector.shape_cast %111 : vector<1x1x8x12xbf16> to vector<8x12xbf16>
    %113 = arith.extf %112 : vector<8x12xbf16> to vector<8x12xf32>
    %114 = vector.extract_strided_slice %113 {offsets = [0, 0], sizes = [7, 12], strides = [1, 1]} : vector<8x12xf32> to vector<7x12xf32>
    %c0_103 = arith.constant 0 : index
    %c0_104 = arith.constant 0 : index
    %c0_105 = arith.constant 0 : index
    %c0_106 = arith.constant 0 : index
    %115 = vector.load %arg3[%c0_103, %c0_104, %c0_105, %c0_106] : memref<2x2x12x32xf32, #tpu.memory_space<vmem>>, vector<1x1x12x32xf32>
    %116 = vector.shape_cast %115 : vector<1x1x12x32xf32> to vector<12x32xf32>
    %cst_107 = arith.constant dense<0.000000e+00> : vector<7x32xf32>
    %117 = tpu.matmul %114, %116, %cst_107 {dimension_numbers = #tpu.dot_dimension_numbers<[1], [0], [0], [1], [0, 0, 1, 1], [], []>} : vector<7x12xf32>, vector<12x32xf32>, vector<7x32xf32> -> vector<7x32xf32>
    %118 = arith.addf %110, %117 : vector<7x32xf32>
    %119 = vector.extract_strided_slice %113 {offsets = [1, 0], sizes = [7, 12], strides = [1, 1]} : vector<8x12xf32> to vector<7x12xf32>
    %c0_108 = arith.constant 0 : index
    %c1_109 = arith.constant 1 : index
    %c0_110 = arith.constant 0 : index
    %c0_111 = arith.constant 0 : index
    %120 = vector.load %arg3[%c0_108, %c1_109, %c0_110, %c0_111] : memref<2x2x12x32xf32, #tpu.memory_space<vmem>>, vector<1x1x12x32xf32>
    %121 = vector.shape_cast %120 : vector<1x1x12x32xf32> to vector<12x32xf32>
    %cst_112 = arith.constant dense<0.000000e+00> : vector<7x32xf32>
    %122 = tpu.matmul %119, %121, %cst_112 {dimension_numbers = #tpu.dot_dimension_numbers<[1], [0], [0], [1], [0, 0, 1, 1], [], []>} : vector<7x12xf32>, vector<12x32xf32>, vector<7x32xf32> -> vector<7x32xf32>
    %123 = arith.addf %118, %122 : vector<7x32xf32>
    %c0_113 = arith.constant 0 : index
    %c4 = arith.constant 4 : index
    %c0_114 = arith.constant 0 : index
    %c0_115 = arith.constant 0 : index
    %124 = vector.load %arg2[%c0_113, %c4, %c0_114, %c0_115] : memref<1x8x8x12xbf16, #tpu.memory_space<vmem>>, vector<1x1x8x12xbf16>
    %125 = vector.shape_cast %124 : vector<1x1x8x12xbf16> to vector<8x12xbf16>
    %126 = arith.extf %125 : vector<8x12xbf16> to vector<8x12xf32>
    %127 = vector.extract_strided_slice %126 {offsets = [0, 0], sizes = [7, 12], strides = [1, 1]} : vector<8x12xf32> to vector<7x12xf32>
    %c1_116 = arith.constant 1 : index
    %c0_117 = arith.constant 0 : index
    %c0_118 = arith.constant 0 : index
    %c0_119 = arith.constant 0 : index
    %128 = vector.load %arg3[%c1_116, %c0_117, %c0_118, %c0_119] : memref<2x2x12x32xf32, #tpu.memory_space<vmem>>, vector<1x1x12x32xf32>
    %129 = vector.shape_cast %128 : vector<1x1x12x32xf32> to vector<12x32xf32>
    %cst_120 = arith.constant dense<0.000000e+00> : vector<7x32xf32>
    %130 = tpu.matmul %127, %129, %cst_120 {dimension_numbers = #tpu.dot_dimension_numbers<[1], [0], [0], [1], [0, 0, 1, 1], [], []>} : vector<7x12xf32>, vector<12x32xf32>, vector<7x32xf32> -> vector<7x32xf32>
    %131 = arith.addf %123, %130 : vector<7x32xf32>
    %132 = vector.extract_strided_slice %126 {offsets = [1, 0], sizes = [7, 12], strides = [1, 1]} : vector<8x12xf32> to vector<7x12xf32>
    %c1_121 = arith.constant 1 : index
    %c1_122 = arith.constant 1 : index
    %c0_123 = arith.constant 0 : index
    %c0_124 = arith.constant 0 : index
    %133 = vector.load %arg3[%c1_121, %c1_122, %c0_123, %c0_124] : memref<2x2x12x32xf32, #tpu.memory_space<vmem>>, vector<1x1x12x32xf32>
    %134 = vector.shape_cast %133 : vector<1x1x12x32xf32> to vector<12x32xf32>
    %cst_125 = arith.constant dense<0.000000e+00> : vector<7x32xf32>
    %135 = tpu.matmul %132, %134, %cst_125 {dimension_numbers = #tpu.dot_dimension_numbers<[1], [0], [0], [1], [0, 0, 1, 1], [], []>} : vector<7x12xf32>, vector<12x32xf32>, vector<7x32xf32> -> vector<7x32xf32>
    %136 = arith.addf %131, %135 : vector<7x32xf32>
    %137 = vector.broadcast %0 : f32 to vector<7x32xf32>
    %138 = arith.mulf %136, %137 : vector<7x32xf32>
    %139 = vector.broadcast %1 : vector<1x32xf32> to vector<7x32xf32>
    %140 = arith.addf %138, %139 : vector<7x32xf32>
    %cst_126 = arith.constant 0.000000e+00 : f32
    %141 = vector.broadcast %cst_126 : f32 to vector<7x32xf32>
    %142 = arith.maximumf %140, %141 : vector<7x32xf32>
    %c3_127 = arith.constant 3 : index
    %c0_128 = arith.constant 0 : index
    %c0_129 = arith.constant 0 : index
    %143 = vector.load %arg8[%c3_127, %c0_128, %c0_129] : memref<7x7x32xf32, #tpu.memory_space<vmem>>, vector<1x7x32xf32>
    %144 = vector.shape_cast %143 : vector<1x7x32xf32> to vector<7x32xf32>
    %145 = vector.shape_cast %142 : vector<7x32xf32> to vector<1x7x32xf32>
    tpu.vector_store %arg8[%c3_127, %c0_128, %c0_129], %145 {strides = array<i32>} : memref<7x7x32xf32, #tpu.memory_space<vmem>>, vector<1x7x32xf32>,
    %cst_130 = arith.constant 0.000000e+00 : f32
    %146 = vector.broadcast %cst_130 : f32 to vector<7x32xf32>
    %c0_131 = arith.constant 0 : index
    %c4_132 = arith.constant 4 : index
    %c0_133 = arith.constant 0 : index
    %c0_134 = arith.constant 0 : index
    %147 = vector.load %arg2[%c0_131, %c4_132, %c0_133, %c0_134] : memref<1x8x8x12xbf16, #tpu.memory_space<vmem>>, vector<1x1x8x12xbf16>
    %148 = vector.shape_cast %147 : vector<1x1x8x12xbf16> to vector<8x12xbf16>
    %149 = arith.extf %148 : vector<8x12xbf16> to vector<8x12xf32>
    %150 = vector.extract_strided_slice %149 {offsets = [0, 0], sizes = [7, 12], strides = [1, 1]} : vector<8x12xf32> to vector<7x12xf32>
    %c0_135 = arith.constant 0 : index
    %c0_136 = arith.constant 0 : index
    %c0_137 = arith.constant 0 : index
    %c0_138 = arith.constant 0 : index
    %151 = vector.load %arg3[%c0_135, %c0_136, %c0_137, %c0_138] : memref<2x2x12x32xf32, #tpu.memory_space<vmem>>, vector<1x1x12x32xf32>
    %152 = vector.shape_cast %151 : vector<1x1x12x32xf32> to vector<12x32xf32>
    %cst_139 = arith.constant dense<0.000000e+00> : vector<7x32xf32>
    %153 = tpu.matmul %150, %152, %cst_139 {dimension_numbers = #tpu.dot_dimension_numbers<[1], [0], [0], [1], [0, 0, 1, 1], [], []>} : vector<7x12xf32>, vector<12x32xf32>, vector<7x32xf32> -> vector<7x32xf32>
    %154 = arith.addf %146, %153 : vector<7x32xf32>
    %155 = vector.extract_strided_slice %149 {offsets = [1, 0], sizes = [7, 12], strides = [1, 1]} : vector<8x12xf32> to vector<7x12xf32>
    %c0_140 = arith.constant 0 : index
    %c1_141 = arith.constant 1 : index
    %c0_142 = arith.constant 0 : index
    %c0_143 = arith.constant 0 : index
    %156 = vector.load %arg3[%c0_140, %c1_141, %c0_142, %c0_143] : memref<2x2x12x32xf32, #tpu.memory_space<vmem>>, vector<1x1x12x32xf32>
    %157 = vector.shape_cast %156 : vector<1x1x12x32xf32> to vector<12x32xf32>
    %cst_144 = arith.constant dense<0.000000e+00> : vector<7x32xf32>
    %158 = tpu.matmul %155, %157, %cst_144 {dimension_numbers = #tpu.dot_dimension_numbers<[1], [0], [0], [1], [0, 0, 1, 1], [], []>} : vector<7x12xf32>, vector<12x32xf32>, vector<7x32xf32> -> vector<7x32xf32>
    %159 = arith.addf %154, %158 : vector<7x32xf32>
    %c0_145 = arith.constant 0 : index
    %c5 = arith.constant 5 : index
    %c0_146 = arith.constant 0 : index
    %c0_147 = arith.constant 0 : index
    %160 = vector.load %arg2[%c0_145, %c5, %c0_146, %c0_147] : memref<1x8x8x12xbf16, #tpu.memory_space<vmem>>, vector<1x1x8x12xbf16>
    %161 = vector.shape_cast %160 : vector<1x1x8x12xbf16> to vector<8x12xbf16>
    %162 = arith.extf %161 : vector<8x12xbf16> to vector<8x12xf32>
    %163 = vector.extract_strided_slice %162 {offsets = [0, 0], sizes = [7, 12], strides = [1, 1]} : vector<8x12xf32> to vector<7x12xf32>
    %c1_148 = arith.constant 1 : index
    %c0_149 = arith.constant 0 : index
    %c0_150 = arith.constant 0 : index
    %c0_151 = arith.constant 0 : index
    %164 = vector.load %arg3[%c1_148, %c0_149, %c0_150, %c0_151] : memref<2x2x12x32xf32, #tpu.memory_space<vmem>>, vector<1x1x12x32xf32>
    %165 = vector.shape_cast %164 : vector<1x1x12x32xf32> to vector<12x32xf32>
    %cst_152 = arith.constant dense<0.000000e+00> : vector<7x32xf32>
    %166 = tpu.matmul %163, %165, %cst_152 {dimension_numbers = #tpu.dot_dimension_numbers<[1], [0], [0], [1], [0, 0, 1, 1], [], []>} : vector<7x12xf32>, vector<12x32xf32>, vector<7x32xf32> -> vector<7x32xf32>
    %167 = arith.addf %159, %166 : vector<7x32xf32>
    %168 = vector.extract_strided_slice %162 {offsets = [1, 0], sizes = [7, 12], strides = [1, 1]} : vector<8x12xf32> to vector<7x12xf32>
    %c1_153 = arith.constant 1 : index
    %c1_154 = arith.constant 1 : index
    %c0_155 = arith.constant 0 : index
    %c0_156 = arith.constant 0 : index
    %169 = vector.load %arg3[%c1_153, %c1_154, %c0_155, %c0_156] : memref<2x2x12x32xf32, #tpu.memory_space<vmem>>, vector<1x1x12x32xf32>
    %170 = vector.shape_cast %169 : vector<1x1x12x32xf32> to vector<12x32xf32>
    %cst_157 = arith.constant dense<0.000000e+00> : vector<7x32xf32>
    %171 = tpu.matmul %168, %170, %cst_157 {dimension_numbers = #tpu.dot_dimension_numbers<[1], [0], [0], [1], [0, 0, 1, 1], [], []>} : vector<7x12xf32>, vector<12x32xf32>, vector<7x32xf32> -> vector<7x32xf32>
    %172 = arith.addf %167, %171 : vector<7x32xf32>
    %173 = vector.broadcast %0 : f32 to vector<7x32xf32>
    %174 = arith.mulf %172, %173 : vector<7x32xf32>
    %175 = vector.broadcast %1 : vector<1x32xf32> to vector<7x32xf32>
    %176 = arith.addf %174, %175 : vector<7x32xf32>
    %cst_158 = arith.constant 0.000000e+00 : f32
    %177 = vector.broadcast %cst_158 : f32 to vector<7x32xf32>
    %178 = arith.maximumf %176, %177 : vector<7x32xf32>
    %c4_159 = arith.constant 4 : index
    %c0_160 = arith.constant 0 : index
    %c0_161 = arith.constant 0 : index
    %179 = vector.load %arg8[%c4_159, %c0_160, %c0_161] : memref<7x7x32xf32, #tpu.memory_space<vmem>>, vector<1x7x32xf32>
    %180 = vector.shape_cast %179 : vector<1x7x32xf32> to vector<7x32xf32>
    %181 = vector.shape_cast %178 : vector<7x32xf32> to vector<1x7x32xf32>
    tpu.vector_store %arg8[%c4_159, %c0_160, %c0_161], %181 {strides = array<i32>} : memref<7x7x32xf32, #tpu.memory_space<vmem>>, vector<1x7x32xf32>,
    %cst_162 = arith.constant 0.000000e+00 : f32
    %182 = vector.broadcast %cst_162 : f32 to vector<7x32xf32>
    %c0_163 = arith.constant 0 : index
    %c5_164 = arith.constant 5 : index
    %c0_165 = arith.constant 0 : index
    %c0_166 = arith.constant 0 : index
    %183 = vector.load %arg2[%c0_163, %c5_164, %c0_165, %c0_166] : memref<1x8x8x12xbf16, #tpu.memory_space<vmem>>, vector<1x1x8x12xbf16>
    %184 = vector.shape_cast %183 : vector<1x1x8x12xbf16> to vector<8x12xbf16>
    %185 = arith.extf %184 : vector<8x12xbf16> to vector<8x12xf32>
    %186 = vector.extract_strided_slice %185 {offsets = [0, 0], sizes = [7, 12], strides = [1, 1]} : vector<8x12xf32> to vector<7x12xf32>
    %c0_167 = arith.constant 0 : index
    %c0_168 = arith.constant 0 : index
    %c0_169 = arith.constant 0 : index
    %c0_170 = arith.constant 0 : index
    %187 = vector.load %arg3[%c0_167, %c0_168, %c0_169, %c0_170] : memref<2x2x12x32xf32, #tpu.memory_space<vmem>>, vector<1x1x12x32xf32>
    %188 = vector.shape_cast %187 : vector<1x1x12x32xf32> to vector<12x32xf32>
    %cst_171 = arith.constant dense<0.000000e+00> : vector<7x32xf32>
    %189 = tpu.matmul %186, %188, %cst_171 {dimension_numbers = #tpu.dot_dimension_numbers<[1], [0], [0], [1], [0, 0, 1, 1], [], []>} : vector<7x12xf32>, vector<12x32xf32>, vector<7x32xf32> -> vector<7x32xf32>
    %190 = arith.addf %182, %189 : vector<7x32xf32>
    %191 = vector.extract_strided_slice %185 {offsets = [1, 0], sizes = [7, 12], strides = [1, 1]} : vector<8x12xf32> to vector<7x12xf32>
    %c0_172 = arith.constant 0 : index
    %c1_173 = arith.constant 1 : index
    %c0_174 = arith.constant 0 : index
    %c0_175 = arith.constant 0 : index
    %192 = vector.load %arg3[%c0_172, %c1_173, %c0_174, %c0_175] : memref<2x2x12x32xf32, #tpu.memory_space<vmem>>, vector<1x1x12x32xf32>
    %193 = vector.shape_cast %192 : vector<1x1x12x32xf32> to vector<12x32xf32>
    %cst_176 = arith.constant dense<0.000000e+00> : vector<7x32xf32>
    %194 = tpu.matmul %191, %193, %cst_176 {dimension_numbers = #tpu.dot_dimension_numbers<[1], [0], [0], [1], [0, 0, 1, 1], [], []>} : vector<7x12xf32>, vector<12x32xf32>, vector<7x32xf32> -> vector<7x32xf32>
    %195 = arith.addf %190, %194 : vector<7x32xf32>
    %c0_177 = arith.constant 0 : index
    %c6 = arith.constant 6 : index
    %c0_178 = arith.constant 0 : index
    %c0_179 = arith.constant 0 : index
    %196 = vector.load %arg2[%c0_177, %c6, %c0_178, %c0_179] : memref<1x8x8x12xbf16, #tpu.memory_space<vmem>>, vector<1x1x8x12xbf16>
    %197 = vector.shape_cast %196 : vector<1x1x8x12xbf16> to vector<8x12xbf16>
    %198 = arith.extf %197 : vector<8x12xbf16> to vector<8x12xf32>
    %199 = vector.extract_strided_slice %198 {offsets = [0, 0], sizes = [7, 12], strides = [1, 1]} : vector<8x12xf32> to vector<7x12xf32>
    %c1_180 = arith.constant 1 : index
    %c0_181 = arith.constant 0 : index
    %c0_182 = arith.constant 0 : index
    %c0_183 = arith.constant 0 : index
    %200 = vector.load %arg3[%c1_180, %c0_181, %c0_182, %c0_183] : memref<2x2x12x32xf32, #tpu.memory_space<vmem>>, vector<1x1x12x32xf32>
    %201 = vector.shape_cast %200 : vector<1x1x12x32xf32> to vector<12x32xf32>
    %cst_184 = arith.constant dense<0.000000e+00> : vector<7x32xf32>
    %202 = tpu.matmul %199, %201, %cst_184 {dimension_numbers = #tpu.dot_dimension_numbers<[1], [0], [0], [1], [0, 0, 1, 1], [], []>} : vector<7x12xf32>, vector<12x32xf32>, vector<7x32xf32> -> vector<7x32xf32>
    %203 = arith.addf %195, %202 : vector<7x32xf32>
    %204 = vector.extract_strided_slice %198 {offsets = [1, 0], sizes = [7, 12], strides = [1, 1]} : vector<8x12xf32> to vector<7x12xf32>
    %c1_185 = arith.constant 1 : index
    %c1_186 = arith.constant 1 : index
    %c0_187 = arith.constant 0 : index
    %c0_188 = arith.constant 0 : index
    %205 = vector.load %arg3[%c1_185, %c1_186, %c0_187, %c0_188] : memref<2x2x12x32xf32, #tpu.memory_space<vmem>>, vector<1x1x12x32xf32>
    %206 = vector.shape_cast %205 : vector<1x1x12x32xf32> to vector<12x32xf32>
    %cst_189 = arith.constant dense<0.000000e+00> : vector<7x32xf32>
    %207 = tpu.matmul %204, %206, %cst_189 {dimension_numbers = #tpu.dot_dimension_numbers<[1], [0], [0], [1], [0, 0, 1, 1], [], []>} : vector<7x12xf32>, vector<12x32xf32>, vector<7x32xf32> -> vector<7x32xf32>
    %208 = arith.addf %203, %207 : vector<7x32xf32>
    %209 = vector.broadcast %0 : f32 to vector<7x32xf32>
    %210 = arith.mulf %208, %209 : vector<7x32xf32>
    %211 = vector.broadcast %1 : vector<1x32xf32> to vector<7x32xf32>
    %212 = arith.addf %210, %211 : vector<7x32xf32>
    %cst_190 = arith.constant 0.000000e+00 : f32
    %213 = vector.broadcast %cst_190 : f32 to vector<7x32xf32>
    %214 = arith.maximumf %212, %213 : vector<7x32xf32>
    %c5_191 = arith.constant 5 : index
    %c0_192 = arith.constant 0 : index
    %c0_193 = arith.constant 0 : index
    %215 = vector.load %arg8[%c5_191, %c0_192, %c0_193] : memref<7x7x32xf32, #tpu.memory_space<vmem>>, vector<1x7x32xf32>
    %216 = vector.shape_cast %215 : vector<1x7x32xf32> to vector<7x32xf32>
    %217 = vector.shape_cast %214 : vector<7x32xf32> to vector<1x7x32xf32>
    tpu.vector_store %arg8[%c5_191, %c0_192, %c0_193], %217 {strides = array<i32>} : memref<7x7x32xf32, #tpu.memory_space<vmem>>, vector<1x7x32xf32>,
    %cst_194 = arith.constant 0.000000e+00 : f32
    %218 = vector.broadcast %cst_194 : f32 to vector<7x32xf32>
    %c0_195 = arith.constant 0 : index
    %c6_196 = arith.constant 6 : index
    %c0_197 = arith.constant 0 : index
    %c0_198 = arith.constant 0 : index
    %219 = vector.load %arg2[%c0_195, %c6_196, %c0_197, %c0_198] : memref<1x8x8x12xbf16, #tpu.memory_space<vmem>>, vector<1x1x8x12xbf16>
    %220 = vector.shape_cast %219 : vector<1x1x8x12xbf16> to vector<8x12xbf16>
    %221 = arith.extf %220 : vector<8x12xbf16> to vector<8x12xf32>
    %222 = vector.extract_strided_slice %221 {offsets = [0, 0], sizes = [7, 12], strides = [1, 1]} : vector<8x12xf32> to vector<7x12xf32>
    %c0_199 = arith.constant 0 : index
    %c0_200 = arith.constant 0 : index
    %c0_201 = arith.constant 0 : index
    %c0_202 = arith.constant 0 : index
    %223 = vector.load %arg3[%c0_199, %c0_200, %c0_201, %c0_202] : memref<2x2x12x32xf32, #tpu.memory_space<vmem>>, vector<1x1x12x32xf32>
    %224 = vector.shape_cast %223 : vector<1x1x12x32xf32> to vector<12x32xf32>
    %cst_203 = arith.constant dense<0.000000e+00> : vector<7x32xf32>
    %225 = tpu.matmul %222, %224, %cst_203 {dimension_numbers = #tpu.dot_dimension_numbers<[1], [0], [0], [1], [0, 0, 1, 1], [], []>} : vector<7x12xf32>, vector<12x32xf32>, vector<7x32xf32> -> vector<7x32xf32>
    %226 = arith.addf %218, %225 : vector<7x32xf32>
    %227 = vector.extract_strided_slice %221 {offsets = [1, 0], sizes = [7, 12], strides = [1, 1]} : vector<8x12xf32> to vector<7x12xf32>
    %c0_204 = arith.constant 0 : index
    %c1_205 = arith.constant 1 : index
    %c0_206 = arith.constant 0 : index
    %c0_207 = arith.constant 0 : index
    %228 = vector.load %arg3[%c0_204, %c1_205, %c0_206, %c0_207] : memref<2x2x12x32xf32, #tpu.memory_space<vmem>>, vector<1x1x12x32xf32>
    %229 = vector.shape_cast %228 : vector<1x1x12x32xf32> to vector<12x32xf32>
    %cst_208 = arith.constant dense<0.000000e+00> : vector<7x32xf32>
    %230 = tpu.matmul %227, %229, %cst_208 {dimension_numbers = #tpu.dot_dimension_numbers<[1], [0], [0], [1], [0, 0, 1, 1], [], []>} : vector<7x12xf32>, vector<12x32xf32>, vector<7x32xf32> -> vector<7x32xf32>
    %231 = arith.addf %226, %230 : vector<7x32xf32>
    %c0_209 = arith.constant 0 : index
    %c7 = arith.constant 7 : index
    %c0_210 = arith.constant 0 : index
    %c0_211 = arith.constant 0 : index
    %232 = vector.load %arg2[%c0_209, %c7, %c0_210, %c0_211] : memref<1x8x8x12xbf16, #tpu.memory_space<vmem>>, vector<1x1x8x12xbf16>
    %233 = vector.shape_cast %232 : vector<1x1x8x12xbf16> to vector<8x12xbf16>
    %234 = arith.extf %233 : vector<8x12xbf16> to vector<8x12xf32>
    %235 = vector.extract_strided_slice %234 {offsets = [0, 0], sizes = [7, 12], strides = [1, 1]} : vector<8x12xf32> to vector<7x12xf32>
    %c1_212 = arith.constant 1 : index
    %c0_213 = arith.constant 0 : index
    %c0_214 = arith.constant 0 : index
    %c0_215 = arith.constant 0 : index
    %236 = vector.load %arg3[%c1_212, %c0_213, %c0_214, %c0_215] : memref<2x2x12x32xf32, #tpu.memory_space<vmem>>, vector<1x1x12x32xf32>
    %237 = vector.shape_cast %236 : vector<1x1x12x32xf32> to vector<12x32xf32>
    %cst_216 = arith.constant dense<0.000000e+00> : vector<7x32xf32>
    %238 = tpu.matmul %235, %237, %cst_216 {dimension_numbers = #tpu.dot_dimension_numbers<[1], [0], [0], [1], [0, 0, 1, 1], [], []>} : vector<7x12xf32>, vector<12x32xf32>, vector<7x32xf32> -> vector<7x32xf32>
    %239 = arith.addf %231, %238 : vector<7x32xf32>
    %240 = vector.extract_strided_slice %234 {offsets = [1, 0], sizes = [7, 12], strides = [1, 1]} : vector<8x12xf32> to vector<7x12xf32>
    %c1_217 = arith.constant 1 : index
    %c1_218 = arith.constant 1 : index
    %c0_219 = arith.constant 0 : index
    %c0_220 = arith.constant 0 : index
    %241 = vector.load %arg3[%c1_217, %c1_218, %c0_219, %c0_220] : memref<2x2x12x32xf32, #tpu.memory_space<vmem>>, vector<1x1x12x32xf32>
    %242 = vector.shape_cast %241 : vector<1x1x12x32xf32> to vector<12x32xf32>
    %cst_221 = arith.constant dense<0.000000e+00> : vector<7x32xf32>
    %243 = tpu.matmul %240, %242, %cst_221 {dimension_numbers = #tpu.dot_dimension_numbers<[1], [0], [0], [1], [0, 0, 1, 1], [], []>} : vector<7x12xf32>, vector<12x32xf32>, vector<7x32xf32> -> vector<7x32xf32>
    %244 = arith.addf %239, %243 : vector<7x32xf32>
    %245 = vector.broadcast %0 : f32 to vector<7x32xf32>
    %246 = arith.mulf %244, %245 : vector<7x32xf32>
    %247 = vector.broadcast %1 : vector<1x32xf32> to vector<7x32xf32>
    %248 = arith.addf %246, %247 : vector<7x32xf32>
    %cst_222 = arith.constant 0.000000e+00 : f32
    %249 = vector.broadcast %cst_222 : f32 to vector<7x32xf32>
    %250 = arith.maximumf %248, %249 : vector<7x32xf32>
    %c6_223 = arith.constant 6 : index
    %c0_224 = arith.constant 0 : index
    %c0_225 = arith.constant 0 : index
    %251 = vector.load %arg8[%c6_223, %c0_224, %c0_225] : memref<7x7x32xf32, #tpu.memory_space<vmem>>, vector<1x7x32xf32>
    %252 = vector.shape_cast %251 : vector<1x7x32xf32> to vector<7x32xf32>
    %253 = vector.shape_cast %250 : vector<7x32xf32> to vector<1x7x32xf32>
    tpu.vector_store %arg8[%c6_223, %c0_224, %c0_225], %253 {strides = array<i32>} : memref<7x7x32xf32, #tpu.memory_space<vmem>>, vector<1x7x32xf32>,
    %c0_226 = arith.constant 0 : index
    %c0_227 = arith.constant 0 : index
    %c0_228 = arith.constant 0 : index
    %254 = vector.load %arg6[%c0_226, %c0_227, %c0_228] : memref<1x1x32xf32, #tpu.memory_space<vmem>>, vector<1x1x32xf32>
    %255 = vector.shape_cast %254 : vector<1x1x32xf32> to vector<1x32xf32>
    %cst_229 = arith.constant 0.000000e+00 : f32
    %256 = vector.broadcast %cst_229 : f32 to vector<5x32xf32>
    %c0_230 = arith.constant 0 : index
    %c0_231 = arith.constant 0 : index
    %c0_232 = arith.constant 0 : index
    %257 = vector.load %arg8[%c0_230, %c0_231, %c0_232] : memref<7x7x32xf32, #tpu.memory_space<vmem>>, vector<1x7x32xf32>
    %258 = vector.shape_cast %257 : vector<1x7x32xf32> to vector<7x32xf32>
    %259 = vector.extract_strided_slice %258 {offsets = [0, 0], sizes = [5, 32], strides = [1, 1]} : vector<7x32xf32> to vector<5x32xf32>
    %c0_233 = arith.constant 0 : index
    %c0_234 = arith.constant 0 : index
    %c0_235 = arith.constant 0 : index
    %c0_236 = arith.constant 0 : index
    %c0_237 = arith.constant 0 : index
    %260 = vector.load %arg5[%c0_233, %c0_234, %c0_235, %c0_236, %c0_237] : memref<1x3x3x32x32xf32, #tpu.memory_space<vmem>>, vector<1x1x1x32x32xf32>
    %261 = vector.shape_cast %260 : vector<1x1x1x32x32xf32> to vector<32x32xf32>
    %cst_238 = arith.constant dense<0.000000e+00> : vector<5x32xf32>
    %262 = tpu.matmul %259, %261, %cst_238 {dimension_numbers = #tpu.dot_dimension_numbers<[1], [0], [0], [1], [0, 0, 1, 1], [], []>} : vector<5x32xf32>, vector<32x32xf32>, vector<5x32xf32> -> vector<5x32xf32>
    %263 = arith.addf %256, %262 : vector<5x32xf32>
    %264 = vector.extract_strided_slice %258 {offsets = [1, 0], sizes = [5, 32], strides = [1, 1]} : vector<7x32xf32> to vector<5x32xf32>
    %c0_239 = arith.constant 0 : index
    %c0_240 = arith.constant 0 : index
    %c1_241 = arith.constant 1 : index
    %c0_242 = arith.constant 0 : index
    %c0_243 = arith.constant 0 : index
    %265 = vector.load %arg5[%c0_239, %c0_240, %c1_241, %c0_242, %c0_243] : memref<1x3x3x32x32xf32, #tpu.memory_space<vmem>>, vector<1x1x1x32x32xf32>
    %266 = vector.shape_cast %265 : vector<1x1x1x32x32xf32> to vector<32x32xf32>
    %cst_244 = arith.constant dense<0.000000e+00> : vector<5x32xf32>
    %267 = tpu.matmul %264, %266, %cst_244 {dimension_numbers = #tpu.dot_dimension_numbers<[1], [0], [0], [1], [0, 0, 1, 1], [], []>} : vector<5x32xf32>, vector<32x32xf32>, vector<5x32xf32> -> vector<5x32xf32>
    %268 = arith.addf %263, %267 : vector<5x32xf32>
    %269 = vector.extract_strided_slice %258 {offsets = [2, 0], sizes = [5, 32], strides = [1, 1]} : vector<7x32xf32> to vector<5x32xf32>
    %c0_245 = arith.constant 0 : index
    %c0_246 = arith.constant 0 : index
    %c2_247 = arith.constant 2 : index
    %c0_248 = arith.constant 0 : index
    %c0_249 = arith.constant 0 : index
    %270 = vector.load %arg5[%c0_245, %c0_246, %c2_247, %c0_248, %c0_249] : memref<1x3x3x32x32xf32, #tpu.memory_space<vmem>>, vector<1x1x1x32x32xf32>
    %271 = vector.shape_cast %270 : vector<1x1x1x32x32xf32> to vector<32x32xf32>
    %cst_250 = arith.constant dense<0.000000e+00> : vector<5x32xf32>
    %272 = tpu.matmul %269, %271, %cst_250 {dimension_numbers = #tpu.dot_dimension_numbers<[1], [0], [0], [1], [0, 0, 1, 1], [], []>} : vector<5x32xf32>, vector<32x32xf32>, vector<5x32xf32> -> vector<5x32xf32>
    %273 = arith.addf %268, %272 : vector<5x32xf32>
    %c1_251 = arith.constant 1 : index
    %c0_252 = arith.constant 0 : index
    %c0_253 = arith.constant 0 : index
    %274 = vector.load %arg8[%c1_251, %c0_252, %c0_253] : memref<7x7x32xf32, #tpu.memory_space<vmem>>, vector<1x7x32xf32>
    %275 = vector.shape_cast %274 : vector<1x7x32xf32> to vector<7x32xf32>
    %276 = vector.extract_strided_slice %275 {offsets = [0, 0], sizes = [5, 32], strides = [1, 1]} : vector<7x32xf32> to vector<5x32xf32>
    %c0_254 = arith.constant 0 : index
    %c1_255 = arith.constant 1 : index
    %c0_256 = arith.constant 0 : index
    %c0_257 = arith.constant 0 : index
    %c0_258 = arith.constant 0 : index
    %277 = vector.load %arg5[%c0_254, %c1_255, %c0_256, %c0_257, %c0_258] : memref<1x3x3x32x32xf32, #tpu.memory_space<vmem>>, vector<1x1x1x32x32xf32>
    %278 = vector.shape_cast %277 : vector<1x1x1x32x32xf32> to vector<32x32xf32>
    %cst_259 = arith.constant dense<0.000000e+00> : vector<5x32xf32>
    %279 = tpu.matmul %276, %278, %cst_259 {dimension_numbers = #tpu.dot_dimension_numbers<[1], [0], [0], [1], [0, 0, 1, 1], [], []>} : vector<5x32xf32>, vector<32x32xf32>, vector<5x32xf32> -> vector<5x32xf32>
    %280 = arith.addf %273, %279 : vector<5x32xf32>
    %281 = vector.extract_strided_slice %275 {offsets = [1, 0], sizes = [5, 32], strides = [1, 1]} : vector<7x32xf32> to vector<5x32xf32>
    %c0_260 = arith.constant 0 : index
    %c1_261 = arith.constant 1 : index
    %c1_262 = arith.constant 1 : index
    %c0_263 = arith.constant 0 : index
    %c0_264 = arith.constant 0 : index
    %282 = vector.load %arg5[%c0_260, %c1_261, %c1_262, %c0_263, %c0_264] : memref<1x3x3x32x32xf32, #tpu.memory_space<vmem>>, vector<1x1x1x32x32xf32>
    %283 = vector.shape_cast %282 : vector<1x1x1x32x32xf32> to vector<32x32xf32>
    %cst_265 = arith.constant dense<0.000000e+00> : vector<5x32xf32>
    %284 = tpu.matmul %281, %283, %cst_265 {dimension_numbers = #tpu.dot_dimension_numbers<[1], [0], [0], [1], [0, 0, 1, 1], [], []>} : vector<5x32xf32>, vector<32x32xf32>, vector<5x32xf32> -> vector<5x32xf32>
    %285 = arith.addf %280, %284 : vector<5x32xf32>
    %286 = vector.extract_strided_slice %275 {offsets = [2, 0], sizes = [5, 32], strides = [1, 1]} : vector<7x32xf32> to vector<5x32xf32>
    %c0_266 = arith.constant 0 : index
    %c1_267 = arith.constant 1 : index
    %c2_268 = arith.constant 2 : index
    %c0_269 = arith.constant 0 : index
    %c0_270 = arith.constant 0 : index
    %287 = vector.load %arg5[%c0_266, %c1_267, %c2_268, %c0_269, %c0_270] : memref<1x3x3x32x32xf32, #tpu.memory_space<vmem>>, vector<1x1x1x32x32xf32>
    %288 = vector.shape_cast %287 : vector<1x1x1x32x32xf32> to vector<32x32xf32>
    %cst_271 = arith.constant dense<0.000000e+00> : vector<5x32xf32>
    %289 = tpu.matmul %286, %288, %cst_271 {dimension_numbers = #tpu.dot_dimension_numbers<[1], [0], [0], [1], [0, 0, 1, 1], [], []>} : vector<5x32xf32>, vector<32x32xf32>, vector<5x32xf32> -> vector<5x32xf32>
    %290 = arith.addf %285, %289 : vector<5x32xf32>
    %c2_272 = arith.constant 2 : index
    %c0_273 = arith.constant 0 : index
    %c0_274 = arith.constant 0 : index
    %291 = vector.load %arg8[%c2_272, %c0_273, %c0_274] : memref<7x7x32xf32, #tpu.memory_space<vmem>>, vector<1x7x32xf32>
    %292 = vector.shape_cast %291 : vector<1x7x32xf32> to vector<7x32xf32>
    %293 = vector.extract_strided_slice %292 {offsets = [0, 0], sizes = [5, 32], strides = [1, 1]} : vector<7x32xf32> to vector<5x32xf32>
    %c0_275 = arith.constant 0 : index
    %c2_276 = arith.constant 2 : index
    %c0_277 = arith.constant 0 : index
    %c0_278 = arith.constant 0 : index
    %c0_279 = arith.constant 0 : index
    %294 = vector.load %arg5[%c0_275, %c2_276, %c0_277, %c0_278, %c0_279] : memref<1x3x3x32x32xf32, #tpu.memory_space<vmem>>, vector<1x1x1x32x32xf32>
    %295 = vector.shape_cast %294 : vector<1x1x1x32x32xf32> to vector<32x32xf32>
    %cst_280 = arith.constant dense<0.000000e+00> : vector<5x32xf32>
    %296 = tpu.matmul %293, %295, %cst_280 {dimension_numbers = #tpu.dot_dimension_numbers<[1], [0], [0], [1], [0, 0, 1, 1], [], []>} : vector<5x32xf32>, vector<32x32xf32>, vector<5x32xf32> -> vector<5x32xf32>
    %297 = arith.addf %290, %296 : vector<5x32xf32>
    %298 = vector.extract_strided_slice %292 {offsets = [1, 0], sizes = [5, 32], strides = [1, 1]} : vector<7x32xf32> to vector<5x32xf32>
    %c0_281 = arith.constant 0 : index
    %c2_282 = arith.constant 2 : index
    %c1_283 = arith.constant 1 : index
    %c0_284 = arith.constant 0 : index
    %c0_285 = arith.constant 0 : index
    %299 = vector.load %arg5[%c0_281, %c2_282, %c1_283, %c0_284, %c0_285] : memref<1x3x3x32x32xf32, #tpu.memory_space<vmem>>, vector<1x1x1x32x32xf32>
    %300 = vector.shape_cast %299 : vector<1x1x1x32x32xf32> to vector<32x32xf32>
    %cst_286 = arith.constant dense<0.000000e+00> : vector<5x32xf32>
    %301 = tpu.matmul %298, %300, %cst_286 {dimension_numbers = #tpu.dot_dimension_numbers<[1], [0], [0], [1], [0, 0, 1, 1], [], []>} : vector<5x32xf32>, vector<32x32xf32>, vector<5x32xf32> -> vector<5x32xf32>
    %302 = arith.addf %297, %301 : vector<5x32xf32>
    %303 = vector.extract_strided_slice %292 {offsets = [2, 0], sizes = [5, 32], strides = [1, 1]} : vector<7x32xf32> to vector<5x32xf32>
    %c0_287 = arith.constant 0 : index
    %c2_288 = arith.constant 2 : index
    %c2_289 = arith.constant 2 : index
    %c0_290 = arith.constant 0 : index
    %c0_291 = arith.constant 0 : index
    %304 = vector.load %arg5[%c0_287, %c2_288, %c2_289, %c0_290, %c0_291] : memref<1x3x3x32x32xf32, #tpu.memory_space<vmem>>, vector<1x1x1x32x32xf32>
    %305 = vector.shape_cast %304 : vector<1x1x1x32x32xf32> to vector<32x32xf32>
    %cst_292 = arith.constant dense<0.000000e+00> : vector<5x32xf32>
    %306 = tpu.matmul %303, %305, %cst_292 {dimension_numbers = #tpu.dot_dimension_numbers<[1], [0], [0], [1], [0, 0, 1, 1], [], []>} : vector<5x32xf32>, vector<32x32xf32>, vector<5x32xf32> -> vector<5x32xf32>
    %307 = arith.addf %302, %306 : vector<5x32xf32>
    %308 = vector.broadcast %255 : vector<1x32xf32> to vector<5x32xf32>
    %309 = arith.addf %307, %308 : vector<5x32xf32>
    %cst_293 = arith.constant 0.000000e+00 : f32
    %310 = vector.broadcast %cst_293 : f32 to vector<5x32xf32>
    %311 = arith.maximumf %309, %310 : vector<5x32xf32>
    %312 = arith.truncf %311 : vector<5x32xf32> to vector<5x32xbf16>
    %c0_294 = arith.constant 0 : index
    %c0_295 = arith.constant 0 : index
    %c0_296 = arith.constant 0 : index
    %c0_297 = arith.constant 0 : index
    %313 = vector.load %arg7[%c0_294, %c0_295, %c0_296, %c0_297] : memref<1x5x5x32xbf16, #tpu.memory_space<vmem>>, vector<1x1x5x32xbf16>
    %314 = vector.shape_cast %313 : vector<1x1x5x32xbf16> to vector<5x32xbf16>
    %315 = vector.shape_cast %312 : vector<5x32xbf16> to vector<1x1x5x32xbf16>
    tpu.vector_store %arg7[%c0_294, %c0_295, %c0_296, %c0_297], %315 {strides = array<i32>} : memref<1x5x5x32xbf16, #tpu.memory_space<vmem>>, vector<1x1x5x32xbf16>,
    %cst_298 = arith.constant 0.000000e+00 : f32
    %316 = vector.broadcast %cst_298 : f32 to vector<5x32xf32>
    %c1_299 = arith.constant 1 : index
    %c0_300 = arith.constant 0 : index
    %c0_301 = arith.constant 0 : index
    %317 = vector.load %arg8[%c1_299, %c0_300, %c0_301] : memref<7x7x32xf32, #tpu.memory_space<vmem>>, vector<1x7x32xf32>
    %318 = vector.shape_cast %317 : vector<1x7x32xf32> to vector<7x32xf32>
    %319 = vector.extract_strided_slice %318 {offsets = [0, 0], sizes = [5, 32], strides = [1, 1]} : vector<7x32xf32> to vector<5x32xf32>
    %c0_302 = arith.constant 0 : index
    %c0_303 = arith.constant 0 : index
    %c0_304 = arith.constant 0 : index
    %c0_305 = arith.constant 0 : index
    %c0_306 = arith.constant 0 : index
    %320 = vector.load %arg5[%c0_302, %c0_303, %c0_304, %c0_305, %c0_306] : memref<1x3x3x32x32xf32, #tpu.memory_space<vmem>>, vector<1x1x1x32x32xf32>
    %321 = vector.shape_cast %320 : vector<1x1x1x32x32xf32> to vector<32x32xf32>
    %cst_307 = arith.constant dense<0.000000e+00> : vector<5x32xf32>
    %322 = tpu.matmul %319, %321, %cst_307 {dimension_numbers = #tpu.dot_dimension_numbers<[1], [0], [0], [1], [0, 0, 1, 1], [], []>} : vector<5x32xf32>, vector<32x32xf32>, vector<5x32xf32> -> vector<5x32xf32>
    %323 = arith.addf %316, %322 : vector<5x32xf32>
    %324 = vector.extract_strided_slice %318 {offsets = [1, 0], sizes = [5, 32], strides = [1, 1]} : vector<7x32xf32> to vector<5x32xf32>
    %c0_308 = arith.constant 0 : index
    %c0_309 = arith.constant 0 : index
    %c1_310 = arith.constant 1 : index
    %c0_311 = arith.constant 0 : index
    %c0_312 = arith.constant 0 : index
    %325 = vector.load %arg5[%c0_308, %c0_309, %c1_310, %c0_311, %c0_312] : memref<1x3x3x32x32xf32, #tpu.memory_space<vmem>>, vector<1x1x1x32x32xf32>
    %326 = vector.shape_cast %325 : vector<1x1x1x32x32xf32> to vector<32x32xf32>
    %cst_313 = arith.constant dense<0.000000e+00> : vector<5x32xf32>
    %327 = tpu.matmul %324, %326, %cst_313 {dimension_numbers = #tpu.dot_dimension_numbers<[1], [0], [0], [1], [0, 0, 1, 1], [], []>} : vector<5x32xf32>, vector<32x32xf32>, vector<5x32xf32> -> vector<5x32xf32>
    %328 = arith.addf %323, %327 : vector<5x32xf32>
    %329 = vector.extract_strided_slice %318 {offsets = [2, 0], sizes = [5, 32], strides = [1, 1]} : vector<7x32xf32> to vector<5x32xf32>
    %c0_314 = arith.constant 0 : index
    %c0_315 = arith.constant 0 : index
    %c2_316 = arith.constant 2 : index
    %c0_317 = arith.constant 0 : index
    %c0_318 = arith.constant 0 : index
    %330 = vector.load %arg5[%c0_314, %c0_315, %c2_316, %c0_317, %c0_318] : memref<1x3x3x32x32xf32, #tpu.memory_space<vmem>>, vector<1x1x1x32x32xf32>
    %331 = vector.shape_cast %330 : vector<1x1x1x32x32xf32> to vector<32x32xf32>
    %cst_319 = arith.constant dense<0.000000e+00> : vector<5x32xf32>
    %332 = tpu.matmul %329, %331, %cst_319 {dimension_numbers = #tpu.dot_dimension_numbers<[1], [0], [0], [1], [0, 0, 1, 1], [], []>} : vector<5x32xf32>, vector<32x32xf32>, vector<5x32xf32> -> vector<5x32xf32>
    %333 = arith.addf %328, %332 : vector<5x32xf32>
    %c2_320 = arith.constant 2 : index
    %c0_321 = arith.constant 0 : index
    %c0_322 = arith.constant 0 : index
    %334 = vector.load %arg8[%c2_320, %c0_321, %c0_322] : memref<7x7x32xf32, #tpu.memory_space<vmem>>, vector<1x7x32xf32>
    %335 = vector.shape_cast %334 : vector<1x7x32xf32> to vector<7x32xf32>
    %336 = vector.extract_strided_slice %335 {offsets = [0, 0], sizes = [5, 32], strides = [1, 1]} : vector<7x32xf32> to vector<5x32xf32>
    %c0_323 = arith.constant 0 : index
    %c1_324 = arith.constant 1 : index
    %c0_325 = arith.constant 0 : index
    %c0_326 = arith.constant 0 : index
    %c0_327 = arith.constant 0 : index
    %337 = vector.load %arg5[%c0_323, %c1_324, %c0_325, %c0_326, %c0_327] : memref<1x3x3x32x32xf32, #tpu.memory_space<vmem>>, vector<1x1x1x32x32xf32>
    %338 = vector.shape_cast %337 : vector<1x1x1x32x32xf32> to vector<32x32xf32>
    %cst_328 = arith.constant dense<0.000000e+00> : vector<5x32xf32>
    %339 = tpu.matmul %336, %338, %cst_328 {dimension_numbers = #tpu.dot_dimension_numbers<[1], [0], [0], [1], [0, 0, 1, 1], [], []>} : vector<5x32xf32>, vector<32x32xf32>, vector<5x32xf32> -> vector<5x32xf32>
    %340 = arith.addf %333, %339 : vector<5x32xf32>
    %341 = vector.extract_strided_slice %335 {offsets = [1, 0], sizes = [5, 32], strides = [1, 1]} : vector<7x32xf32> to vector<5x32xf32>
    %c0_329 = arith.constant 0 : index
    %c1_330 = arith.constant 1 : index
    %c1_331 = arith.constant 1 : index
    %c0_332 = arith.constant 0 : index
    %c0_333 = arith.constant 0 : index
    %342 = vector.load %arg5[%c0_329, %c1_330, %c1_331, %c0_332, %c0_333] : memref<1x3x3x32x32xf32, #tpu.memory_space<vmem>>, vector<1x1x1x32x32xf32>
    %343 = vector.shape_cast %342 : vector<1x1x1x32x32xf32> to vector<32x32xf32>
    %cst_334 = arith.constant dense<0.000000e+00> : vector<5x32xf32>
    %344 = tpu.matmul %341, %343, %cst_334 {dimension_numbers = #tpu.dot_dimension_numbers<[1], [0], [0], [1], [0, 0, 1, 1], [], []>} : vector<5x32xf32>, vector<32x32xf32>, vector<5x32xf32> -> vector<5x32xf32>
    %345 = arith.addf %340, %344 : vector<5x32xf32>
    %346 = vector.extract_strided_slice %335 {offsets = [2, 0], sizes = [5, 32], strides = [1, 1]} : vector<7x32xf32> to vector<5x32xf32>
    %c0_335 = arith.constant 0 : index
    %c1_336 = arith.constant 1 : index
    %c2_337 = arith.constant 2 : index
    %c0_338 = arith.constant 0 : index
    %c0_339 = arith.constant 0 : index
    %347 = vector.load %arg5[%c0_335, %c1_336, %c2_337, %c0_338, %c0_339] : memref<1x3x3x32x32xf32, #tpu.memory_space<vmem>>, vector<1x1x1x32x32xf32>
    %348 = vector.shape_cast %347 : vector<1x1x1x32x32xf32> to vector<32x32xf32>
    %cst_340 = arith.constant dense<0.000000e+00> : vector<5x32xf32>
    %349 = tpu.matmul %346, %348, %cst_340 {dimension_numbers = #tpu.dot_dimension_numbers<[1], [0], [0], [1], [0, 0, 1, 1], [], []>} : vector<5x32xf32>, vector<32x32xf32>, vector<5x32xf32> -> vector<5x32xf32>
    %350 = arith.addf %345, %349 : vector<5x32xf32>
    %c3_341 = arith.constant 3 : index
    %c0_342 = arith.constant 0 : index
    %c0_343 = arith.constant 0 : index
    %351 = vector.load %arg8[%c3_341, %c0_342, %c0_343] : memref<7x7x32xf32, #tpu.memory_space<vmem>>, vector<1x7x32xf32>
    %352 = vector.shape_cast %351 : vector<1x7x32xf32> to vector<7x32xf32>
    %353 = vector.extract_strided_slice %352 {offsets = [0, 0], sizes = [5, 32], strides = [1, 1]} : vector<7x32xf32> to vector<5x32xf32>
    %c0_344 = arith.constant 0 : index
    %c2_345 = arith.constant 2 : index
    %c0_346 = arith.constant 0 : index
    %c0_347 = arith.constant 0 : index
    %c0_348 = arith.constant 0 : index
    %354 = vector.load %arg5[%c0_344, %c2_345, %c0_346, %c0_347, %c0_348] : memref<1x3x3x32x32xf32, #tpu.memory_space<vmem>>, vector<1x1x1x32x32xf32>
    %355 = vector.shape_cast %354 : vector<1x1x1x32x32xf32> to vector<32x32xf32>
    %cst_349 = arith.constant dense<0.000000e+00> : vector<5x32xf32>
    %356 = tpu.matmul %353, %355, %cst_349 {dimension_numbers = #tpu.dot_dimension_numbers<[1], [0], [0], [1], [0, 0, 1, 1], [], []>} : vector<5x32xf32>, vector<32x32xf32>, vector<5x32xf32> -> vector<5x32xf32>
    %357 = arith.addf %350, %356 : vector<5x32xf32>
    %358 = vector.extract_strided_slice %352 {offsets = [1, 0], sizes = [5, 32], strides = [1, 1]} : vector<7x32xf32> to vector<5x32xf32>
    %c0_350 = arith.constant 0 : index
    %c2_351 = arith.constant 2 : index
    %c1_352 = arith.constant 1 : index
    %c0_353 = arith.constant 0 : index
    %c0_354 = arith.constant 0 : index
    %359 = vector.load %arg5[%c0_350, %c2_351, %c1_352, %c0_353, %c0_354] : memref<1x3x3x32x32xf32, #tpu.memory_space<vmem>>, vector<1x1x1x32x32xf32>
    %360 = vector.shape_cast %359 : vector<1x1x1x32x32xf32> to vector<32x32xf32>
    %cst_355 = arith.constant dense<0.000000e+00> : vector<5x32xf32>
    %361 = tpu.matmul %358, %360, %cst_355 {dimension_numbers = #tpu.dot_dimension_numbers<[1], [0], [0], [1], [0, 0, 1, 1], [], []>} : vector<5x32xf32>, vector<32x32xf32>, vector<5x32xf32> -> vector<5x32xf32>
    %362 = arith.addf %357, %361 : vector<5x32xf32>
    %363 = vector.extract_strided_slice %352 {offsets = [2, 0], sizes = [5, 32], strides = [1, 1]} : vector<7x32xf32> to vector<5x32xf32>
    %c0_356 = arith.constant 0 : index
    %c2_357 = arith.constant 2 : index
    %c2_358 = arith.constant 2 : index
    %c0_359 = arith.constant 0 : index
    %c0_360 = arith.constant 0 : index
    %364 = vector.load %arg5[%c0_356, %c2_357, %c2_358, %c0_359, %c0_360] : memref<1x3x3x32x32xf32, #tpu.memory_space<vmem>>, vector<1x1x1x32x32xf32>
    %365 = vector.shape_cast %364 : vector<1x1x1x32x32xf32> to vector<32x32xf32>
    %cst_361 = arith.constant dense<0.000000e+00> : vector<5x32xf32>
    %366 = tpu.matmul %363, %365, %cst_361 {dimension_numbers = #tpu.dot_dimension_numbers<[1], [0], [0], [1], [0, 0, 1, 1], [], []>} : vector<5x32xf32>, vector<32x32xf32>, vector<5x32xf32> -> vector<5x32xf32>
    %367 = arith.addf %362, %366 : vector<5x32xf32>
    %368 = vector.broadcast %255 : vector<1x32xf32> to vector<5x32xf32>
    %369 = arith.addf %367, %368 : vector<5x32xf32>
    %cst_362 = arith.constant 0.000000e+00 : f32
    %370 = vector.broadcast %cst_362 : f32 to vector<5x32xf32>
    %371 = arith.maximumf %369, %370 : vector<5x32xf32>
    %372 = arith.truncf %371 : vector<5x32xf32> to vector<5x32xbf16>
    %c0_363 = arith.constant 0 : index
    %c1_364 = arith.constant 1 : index
    %c0_365 = arith.constant 0 : index
    %c0_366 = arith.constant 0 : index
    %373 = vector.load %arg7[%c0_363, %c1_364, %c0_365, %c0_366] : memref<1x5x5x32xbf16, #tpu.memory_space<vmem>>, vector<1x1x5x32xbf16>
    %374 = vector.shape_cast %373 : vector<1x1x5x32xbf16> to vector<5x32xbf16>
    %375 = vector.shape_cast %372 : vector<5x32xbf16> to vector<1x1x5x32xbf16>
    tpu.vector_store %arg7[%c0_363, %c1_364, %c0_365, %c0_366], %375 {strides = array<i32>} : memref<1x5x5x32xbf16, #tpu.memory_space<vmem>>, vector<1x1x5x32xbf16>,
    %cst_367 = arith.constant 0.000000e+00 : f32
    %376 = vector.broadcast %cst_367 : f32 to vector<5x32xf32>
    %c2_368 = arith.constant 2 : index
    %c0_369 = arith.constant 0 : index
    %c0_370 = arith.constant 0 : index
    %377 = vector.load %arg8[%c2_368, %c0_369, %c0_370] : memref<7x7x32xf32, #tpu.memory_space<vmem>>, vector<1x7x32xf32>
    %378 = vector.shape_cast %377 : vector<1x7x32xf32> to vector<7x32xf32>
    %379 = vector.extract_strided_slice %378 {offsets = [0, 0], sizes = [5, 32], strides = [1, 1]} : vector<7x32xf32> to vector<5x32xf32>
    %c0_371 = arith.constant 0 : index
    %c0_372 = arith.constant 0 : index
    %c0_373 = arith.constant 0 : index
    %c0_374 = arith.constant 0 : index
    %c0_375 = arith.constant 0 : index
    %380 = vector.load %arg5[%c0_371, %c0_372, %c0_373, %c0_374, %c0_375] : memref<1x3x3x32x32xf32, #tpu.memory_space<vmem>>, vector<1x1x1x32x32xf32>
    %381 = vector.shape_cast %380 : vector<1x1x1x32x32xf32> to vector<32x32xf32>
    %cst_376 = arith.constant dense<0.000000e+00> : vector<5x32xf32>
    %382 = tpu.matmul %379, %381, %cst_376 {dimension_numbers = #tpu.dot_dimension_numbers<[1], [0], [0], [1], [0, 0, 1, 1], [], []>} : vector<5x32xf32>, vector<32x32xf32>, vector<5x32xf32> -> vector<5x32xf32>
    %383 = arith.addf %376, %382 : vector<5x32xf32>
    %384 = vector.extract_strided_slice %378 {offsets = [1, 0], sizes = [5, 32], strides = [1, 1]} : vector<7x32xf32> to vector<5x32xf32>
    %c0_377 = arith.constant 0 : index
    %c0_378 = arith.constant 0 : index
    %c1_379 = arith.constant 1 : index
    %c0_380 = arith.constant 0 : index
    %c0_381 = arith.constant 0 : index
    %385 = vector.load %arg5[%c0_377, %c0_378, %c1_379, %c0_380, %c0_381] : memref<1x3x3x32x32xf32, #tpu.memory_space<vmem>>, vector<1x1x1x32x32xf32>
    %386 = vector.shape_cast %385 : vector<1x1x1x32x32xf32> to vector<32x32xf32>
    %cst_382 = arith.constant dense<0.000000e+00> : vector<5x32xf32>
    %387 = tpu.matmul %384, %386, %cst_382 {dimension_numbers = #tpu.dot_dimension_numbers<[1], [0], [0], [1], [0, 0, 1, 1], [], []>} : vector<5x32xf32>, vector<32x32xf32>, vector<5x32xf32> -> vector<5x32xf32>
    %388 = arith.addf %383, %387 : vector<5x32xf32>
    %389 = vector.extract_strided_slice %378 {offsets = [2, 0], sizes = [5, 32], strides = [1, 1]} : vector<7x32xf32> to vector<5x32xf32>
    %c0_383 = arith.constant 0 : index
    %c0_384 = arith.constant 0 : index
    %c2_385 = arith.constant 2 : index
    %c0_386 = arith.constant 0 : index
    %c0_387 = arith.constant 0 : index
    %390 = vector.load %arg5[%c0_383, %c0_384, %c2_385, %c0_386, %c0_387] : memref<1x3x3x32x32xf32, #tpu.memory_space<vmem>>, vector<1x1x1x32x32xf32>
    %391 = vector.shape_cast %390 : vector<1x1x1x32x32xf32> to vector<32x32xf32>
    %cst_388 = arith.constant dense<0.000000e+00> : vector<5x32xf32>
    %392 = tpu.matmul %389, %391, %cst_388 {dimension_numbers = #tpu.dot_dimension_numbers<[1], [0], [0], [1], [0, 0, 1, 1], [], []>} : vector<5x32xf32>, vector<32x32xf32>, vector<5x32xf32> -> vector<5x32xf32>
    %393 = arith.addf %388, %392 : vector<5x32xf32>
    %c3_389 = arith.constant 3 : index
    %c0_390 = arith.constant 0 : index
    %c0_391 = arith.constant 0 : index
    %394 = vector.load %arg8[%c3_389, %c0_390, %c0_391] : memref<7x7x32xf32, #tpu.memory_space<vmem>>, vector<1x7x32xf32>
    %395 = vector.shape_cast %394 : vector<1x7x32xf32> to vector<7x32xf32>
    %396 = vector.extract_strided_slice %395 {offsets = [0, 0], sizes = [5, 32], strides = [1, 1]} : vector<7x32xf32> to vector<5x32xf32>
    %c0_392 = arith.constant 0 : index
    %c1_393 = arith.constant 1 : index
    %c0_394 = arith.constant 0 : index
    %c0_395 = arith.constant 0 : index
    %c0_396 = arith.constant 0 : index
    %397 = vector.load %arg5[%c0_392, %c1_393, %c0_394, %c0_395, %c0_396] : memref<1x3x3x32x32xf32, #tpu.memory_space<vmem>>, vector<1x1x1x32x32xf32>
    %398 = vector.shape_cast %397 : vector<1x1x1x32x32xf32> to vector<32x32xf32>
    %cst_397 = arith.constant dense<0.000000e+00> : vector<5x32xf32>
    %399 = tpu.matmul %396, %398, %cst_397 {dimension_numbers = #tpu.dot_dimension_numbers<[1], [0], [0], [1], [0, 0, 1, 1], [], []>} : vector<5x32xf32>, vector<32x32xf32>, vector<5x32xf32> -> vector<5x32xf32>
    %400 = arith.addf %393, %399 : vector<5x32xf32>
    %401 = vector.extract_strided_slice %395 {offsets = [1, 0], sizes = [5, 32], strides = [1, 1]} : vector<7x32xf32> to vector<5x32xf32>
    %c0_398 = arith.constant 0 : index
    %c1_399 = arith.constant 1 : index
    %c1_400 = arith.constant 1 : index
    %c0_401 = arith.constant 0 : index
    %c0_402 = arith.constant 0 : index
    %402 = vector.load %arg5[%c0_398, %c1_399, %c1_400, %c0_401, %c0_402] : memref<1x3x3x32x32xf32, #tpu.memory_space<vmem>>, vector<1x1x1x32x32xf32>
    %403 = vector.shape_cast %402 : vector<1x1x1x32x32xf32> to vector<32x32xf32>
    %cst_403 = arith.constant dense<0.000000e+00> : vector<5x32xf32>
    %404 = tpu.matmul %401, %403, %cst_403 {dimension_numbers = #tpu.dot_dimension_numbers<[1], [0], [0], [1], [0, 0, 1, 1], [], []>} : vector<5x32xf32>, vector<32x32xf32>, vector<5x32xf32> -> vector<5x32xf32>
    %405 = arith.addf %400, %404 : vector<5x32xf32>
    %406 = vector.extract_strided_slice %395 {offsets = [2, 0], sizes = [5, 32], strides = [1, 1]} : vector<7x32xf32> to vector<5x32xf32>
    %c0_404 = arith.constant 0 : index
    %c1_405 = arith.constant 1 : index
    %c2_406 = arith.constant 2 : index
    %c0_407 = arith.constant 0 : index
    %c0_408 = arith.constant 0 : index
    %407 = vector.load %arg5[%c0_404, %c1_405, %c2_406, %c0_407, %c0_408] : memref<1x3x3x32x32xf32, #tpu.memory_space<vmem>>, vector<1x1x1x32x32xf32>
    %408 = vector.shape_cast %407 : vector<1x1x1x32x32xf32> to vector<32x32xf32>
    %cst_409 = arith.constant dense<0.000000e+00> : vector<5x32xf32>
    %409 = tpu.matmul %406, %408, %cst_409 {dimension_numbers = #tpu.dot_dimension_numbers<[1], [0], [0], [1], [0, 0, 1, 1], [], []>} : vector<5x32xf32>, vector<32x32xf32>, vector<5x32xf32> -> vector<5x32xf32>
    %410 = arith.addf %405, %409 : vector<5x32xf32>
    %c4_410 = arith.constant 4 : index
    %c0_411 = arith.constant 0 : index
    %c0_412 = arith.constant 0 : index
    %411 = vector.load %arg8[%c4_410, %c0_411, %c0_412] : memref<7x7x32xf32, #tpu.memory_space<vmem>>, vector<1x7x32xf32>
    %412 = vector.shape_cast %411 : vector<1x7x32xf32> to vector<7x32xf32>
    %413 = vector.extract_strided_slice %412 {offsets = [0, 0], sizes = [5, 32], strides = [1, 1]} : vector<7x32xf32> to vector<5x32xf32>
    %c0_413 = arith.constant 0 : index
    %c2_414 = arith.constant 2 : index
    %c0_415 = arith.constant 0 : index
    %c0_416 = arith.constant 0 : index
    %c0_417 = arith.constant 0 : index
    %414 = vector.load %arg5[%c0_413, %c2_414, %c0_415, %c0_416, %c0_417] : memref<1x3x3x32x32xf32, #tpu.memory_space<vmem>>, vector<1x1x1x32x32xf32>
    %415 = vector.shape_cast %414 : vector<1x1x1x32x32xf32> to vector<32x32xf32>
    %cst_418 = arith.constant dense<0.000000e+00> : vector<5x32xf32>
    %416 = tpu.matmul %413, %415, %cst_418 {dimension_numbers = #tpu.dot_dimension_numbers<[1], [0], [0], [1], [0, 0, 1, 1], [], []>} : vector<5x32xf32>, vector<32x32xf32>, vector<5x32xf32> -> vector<5x32xf32>
    %417 = arith.addf %410, %416 : vector<5x32xf32>
    %418 = vector.extract_strided_slice %412 {offsets = [1, 0], sizes = [5, 32], strides = [1, 1]} : vector<7x32xf32> to vector<5x32xf32>
    %c0_419 = arith.constant 0 : index
    %c2_420 = arith.constant 2 : index
    %c1_421 = arith.constant 1 : index
    %c0_422 = arith.constant 0 : index
    %c0_423 = arith.constant 0 : index
    %419 = vector.load %arg5[%c0_419, %c2_420, %c1_421, %c0_422, %c0_423] : memref<1x3x3x32x32xf32, #tpu.memory_space<vmem>>, vector<1x1x1x32x32xf32>
    %420 = vector.shape_cast %419 : vector<1x1x1x32x32xf32> to vector<32x32xf32>
    %cst_424 = arith.constant dense<0.000000e+00> : vector<5x32xf32>
    %421 = tpu.matmul %418, %420, %cst_424 {dimension_numbers = #tpu.dot_dimension_numbers<[1], [0], [0], [1], [0, 0, 1, 1], [], []>} : vector<5x32xf32>, vector<32x32xf32>, vector<5x32xf32> -> vector<5x32xf32>
    %422 = arith.addf %417, %421 : vector<5x32xf32>
    %423 = vector.extract_strided_slice %412 {offsets = [2, 0], sizes = [5, 32], strides = [1, 1]} : vector<7x32xf32> to vector<5x32xf32>
    %c0_425 = arith.constant 0 : index
    %c2_426 = arith.constant 2 : index
    %c2_427 = arith.constant 2 : index
    %c0_428 = arith.constant 0 : index
    %c0_429 = arith.constant 0 : index
    %424 = vector.load %arg5[%c0_425, %c2_426, %c2_427, %c0_428, %c0_429] : memref<1x3x3x32x32xf32, #tpu.memory_space<vmem>>, vector<1x1x1x32x32xf32>
    %425 = vector.shape_cast %424 : vector<1x1x1x32x32xf32> to vector<32x32xf32>
    %cst_430 = arith.constant dense<0.000000e+00> : vector<5x32xf32>
    %426 = tpu.matmul %423, %425, %cst_430 {dimension_numbers = #tpu.dot_dimension_numbers<[1], [0], [0], [1], [0, 0, 1, 1], [], []>} : vector<5x32xf32>, vector<32x32xf32>, vector<5x32xf32> -> vector<5x32xf32>
    %427 = arith.addf %422, %426 : vector<5x32xf32>
    %428 = vector.broadcast %255 : vector<1x32xf32> to vector<5x32xf32>
    %429 = arith.addf %427, %428 : vector<5x32xf32>
    %cst_431 = arith.constant 0.000000e+00 : f32
    %430 = vector.broadcast %cst_431 : f32 to vector<5x32xf32>
    %431 = arith.maximumf %429, %430 : vector<5x32xf32>
    %432 = arith.truncf %431 : vector<5x32xf32> to vector<5x32xbf16>
    %c0_432 = arith.constant 0 : index
    %c2_433 = arith.constant 2 : index
    %c0_434 = arith.constant 0 : index
    %c0_435 = arith.constant 0 : index
    %433 = vector.load %arg7[%c0_432, %c2_433, %c0_434, %c0_435] : memref<1x5x5x32xbf16, #tpu.memory_space<vmem>>, vector<1x1x5x32xbf16>
    %434 = vector.shape_cast %433 : vector<1x1x5x32xbf16> to vector<5x32xbf16>
    %435 = vector.shape_cast %432 : vector<5x32xbf16> to vector<1x1x5x32xbf16>
    tpu.vector_store %arg7[%c0_432, %c2_433, %c0_434, %c0_435], %435 {strides = array<i32>} : memref<1x5x5x32xbf16, #tpu.memory_space<vmem>>, vector<1x1x5x32xbf16>,
    %cst_436 = arith.constant 0.000000e+00 : f32
    %436 = vector.broadcast %cst_436 : f32 to vector<5x32xf32>
    %c3_437 = arith.constant 3 : index
    %c0_438 = arith.constant 0 : index
    %c0_439 = arith.constant 0 : index
    %437 = vector.load %arg8[%c3_437, %c0_438, %c0_439] : memref<7x7x32xf32, #tpu.memory_space<vmem>>, vector<1x7x32xf32>
    %438 = vector.shape_cast %437 : vector<1x7x32xf32> to vector<7x32xf32>
    %439 = vector.extract_strided_slice %438 {offsets = [0, 0], sizes = [5, 32], strides = [1, 1]} : vector<7x32xf32> to vector<5x32xf32>
    %c0_440 = arith.constant 0 : index
    %c0_441 = arith.constant 0 : index
    %c0_442 = arith.constant 0 : index
    %c0_443 = arith.constant 0 : index
    %c0_444 = arith.constant 0 : index
    %440 = vector.load %arg5[%c0_440, %c0_441, %c0_442, %c0_443, %c0_444] : memref<1x3x3x32x32xf32, #tpu.memory_space<vmem>>, vector<1x1x1x32x32xf32>
    %441 = vector.shape_cast %440 : vector<1x1x1x32x32xf32> to vector<32x32xf32>
    %cst_445 = arith.constant dense<0.000000e+00> : vector<5x32xf32>
    %442 = tpu.matmul %439, %441, %cst_445 {dimension_numbers = #tpu.dot_dimension_numbers<[1], [0], [0], [1], [0, 0, 1, 1], [], []>} : vector<5x32xf32>, vector<32x32xf32>, vector<5x32xf32> -> vector<5x32xf32>
    %443 = arith.addf %436, %442 : vector<5x32xf32>
    %444 = vector.extract_strided_slice %438 {offsets = [1, 0], sizes = [5, 32], strides = [1, 1]} : vector<7x32xf32> to vector<5x32xf32>
    %c0_446 = arith.constant 0 : index
    %c0_447 = arith.constant 0 : index
    %c1_448 = arith.constant 1 : index
    %c0_449 = arith.constant 0 : index
    %c0_450 = arith.constant 0 : index
    %445 = vector.load %arg5[%c0_446, %c0_447, %c1_448, %c0_449, %c0_450] : memref<1x3x3x32x32xf32, #tpu.memory_space<vmem>>, vector<1x1x1x32x32xf32>
    %446 = vector.shape_cast %445 : vector<1x1x1x32x32xf32> to vector<32x32xf32>
    %cst_451 = arith.constant dense<0.000000e+00> : vector<5x32xf32>
    %447 = tpu.matmul %444, %446, %cst_451 {dimension_numbers = #tpu.dot_dimension_numbers<[1], [0], [0], [1], [0, 0, 1, 1], [], []>} : vector<5x32xf32>, vector<32x32xf32>, vector<5x32xf32> -> vector<5x32xf32>
    %448 = arith.addf %443, %447 : vector<5x32xf32>
    %449 = vector.extract_strided_slice %438 {offsets = [2, 0], sizes = [5, 32], strides = [1, 1]} : vector<7x32xf32> to vector<5x32xf32>
    %c0_452 = arith.constant 0 : index
    %c0_453 = arith.constant 0 : index
    %c2_454 = arith.constant 2 : index
    %c0_455 = arith.constant 0 : index
    %c0_456 = arith.constant 0 : index
    %450 = vector.load %arg5[%c0_452, %c0_453, %c2_454, %c0_455, %c0_456] : memref<1x3x3x32x32xf32, #tpu.memory_space<vmem>>, vector<1x1x1x32x32xf32>
    %451 = vector.shape_cast %450 : vector<1x1x1x32x32xf32> to vector<32x32xf32>
    %cst_457 = arith.constant dense<0.000000e+00> : vector<5x32xf32>
    %452 = tpu.matmul %449, %451, %cst_457 {dimension_numbers = #tpu.dot_dimension_numbers<[1], [0], [0], [1], [0, 0, 1, 1], [], []>} : vector<5x32xf32>, vector<32x32xf32>, vector<5x32xf32> -> vector<5x32xf32>
    %453 = arith.addf %448, %452 : vector<5x32xf32>
    %c4_458 = arith.constant 4 : index
    %c0_459 = arith.constant 0 : index
    %c0_460 = arith.constant 0 : index
    %454 = vector.load %arg8[%c4_458, %c0_459, %c0_460] : memref<7x7x32xf32, #tpu.memory_space<vmem>>, vector<1x7x32xf32>
    %455 = vector.shape_cast %454 : vector<1x7x32xf32> to vector<7x32xf32>
    %456 = vector.extract_strided_slice %455 {offsets = [0, 0], sizes = [5, 32], strides = [1, 1]} : vector<7x32xf32> to vector<5x32xf32>
    %c0_461 = arith.constant 0 : index
    %c1_462 = arith.constant 1 : index
    %c0_463 = arith.constant 0 : index
    %c0_464 = arith.constant 0 : index
    %c0_465 = arith.constant 0 : index
    %457 = vector.load %arg5[%c0_461, %c1_462, %c0_463, %c0_464, %c0_465] : memref<1x3x3x32x32xf32, #tpu.memory_space<vmem>>, vector<1x1x1x32x32xf32>
    %458 = vector.shape_cast %457 : vector<1x1x1x32x32xf32> to vector<32x32xf32>
    %cst_466 = arith.constant dense<0.000000e+00> : vector<5x32xf32>
    %459 = tpu.matmul %456, %458, %cst_466 {dimension_numbers = #tpu.dot_dimension_numbers<[1], [0], [0], [1], [0, 0, 1, 1], [], []>} : vector<5x32xf32>, vector<32x32xf32>, vector<5x32xf32> -> vector<5x32xf32>
    %460 = arith.addf %453, %459 : vector<5x32xf32>
    %461 = vector.extract_strided_slice %455 {offsets = [1, 0], sizes = [5, 32], strides = [1, 1]} : vector<7x32xf32> to vector<5x32xf32>
    %c0_467 = arith.constant 0 : index
    %c1_468 = arith.constant 1 : index
    %c1_469 = arith.constant 1 : index
    %c0_470 = arith.constant 0 : index
    %c0_471 = arith.constant 0 : index
    %462 = vector.load %arg5[%c0_467, %c1_468, %c1_469, %c0_470, %c0_471] : memref<1x3x3x32x32xf32, #tpu.memory_space<vmem>>, vector<1x1x1x32x32xf32>
    %463 = vector.shape_cast %462 : vector<1x1x1x32x32xf32> to vector<32x32xf32>
    %cst_472 = arith.constant dense<0.000000e+00> : vector<5x32xf32>
    %464 = tpu.matmul %461, %463, %cst_472 {dimension_numbers = #tpu.dot_dimension_numbers<[1], [0], [0], [1], [0, 0, 1, 1], [], []>} : vector<5x32xf32>, vector<32x32xf32>, vector<5x32xf32> -> vector<5x32xf32>
    %465 = arith.addf %460, %464 : vector<5x32xf32>
    %466 = vector.extract_strided_slice %455 {offsets = [2, 0], sizes = [5, 32], strides = [1, 1]} : vector<7x32xf32> to vector<5x32xf32>
    %c0_473 = arith.constant 0 : index
    %c1_474 = arith.constant 1 : index
    %c2_475 = arith.constant 2 : index
    %c0_476 = arith.constant 0 : index
    %c0_477 = arith.constant 0 : index
    %467 = vector.load %arg5[%c0_473, %c1_474, %c2_475, %c0_476, %c0_477] : memref<1x3x3x32x32xf32, #tpu.memory_space<vmem>>, vector<1x1x1x32x32xf32>
    %468 = vector.shape_cast %467 : vector<1x1x1x32x32xf32> to vector<32x32xf32>
    %cst_478 = arith.constant dense<0.000000e+00> : vector<5x32xf32>
    %469 = tpu.matmul %466, %468, %cst_478 {dimension_numbers = #tpu.dot_dimension_numbers<[1], [0], [0], [1], [0, 0, 1, 1], [], []>} : vector<5x32xf32>, vector<32x32xf32>, vector<5x32xf32> -> vector<5x32xf32>
    %470 = arith.addf %465, %469 : vector<5x32xf32>
    %c5_479 = arith.constant 5 : index
    %c0_480 = arith.constant 0 : index
    %c0_481 = arith.constant 0 : index
    %471 = vector.load %arg8[%c5_479, %c0_480, %c0_481] : memref<7x7x32xf32, #tpu.memory_space<vmem>>, vector<1x7x32xf32>
    %472 = vector.shape_cast %471 : vector<1x7x32xf32> to vector<7x32xf32>
    %473 = vector.extract_strided_slice %472 {offsets = [0, 0], sizes = [5, 32], strides = [1, 1]} : vector<7x32xf32> to vector<5x32xf32>
    %c0_482 = arith.constant 0 : index
    %c2_483 = arith.constant 2 : index
    %c0_484 = arith.constant 0 : index
    %c0_485 = arith.constant 0 : index
    %c0_486 = arith.constant 0 : index
    %474 = vector.load %arg5[%c0_482, %c2_483, %c0_484, %c0_485, %c0_486] : memref<1x3x3x32x32xf32, #tpu.memory_space<vmem>>, vector<1x1x1x32x32xf32>
    %475 = vector.shape_cast %474 : vector<1x1x1x32x32xf32> to vector<32x32xf32>
    %cst_487 = arith.constant dense<0.000000e+00> : vector<5x32xf32>
    %476 = tpu.matmul %473, %475, %cst_487 {dimension_numbers = #tpu.dot_dimension_numbers<[1], [0], [0], [1], [0, 0, 1, 1], [], []>} : vector<5x32xf32>, vector<32x32xf32>, vector<5x32xf32> -> vector<5x32xf32>
    %477 = arith.addf %470, %476 : vector<5x32xf32>
    %478 = vector.extract_strided_slice %472 {offsets = [1, 0], sizes = [5, 32], strides = [1, 1]} : vector<7x32xf32> to vector<5x32xf32>
    %c0_488 = arith.constant 0 : index
    %c2_489 = arith.constant 2 : index
    %c1_490 = arith.constant 1 : index
    %c0_491 = arith.constant 0 : index
    %c0_492 = arith.constant 0 : index
    %479 = vector.load %arg5[%c0_488, %c2_489, %c1_490, %c0_491, %c0_492] : memref<1x3x3x32x32xf32, #tpu.memory_space<vmem>>, vector<1x1x1x32x32xf32>
    %480 = vector.shape_cast %479 : vector<1x1x1x32x32xf32> to vector<32x32xf32>
    %cst_493 = arith.constant dense<0.000000e+00> : vector<5x32xf32>
    %481 = tpu.matmul %478, %480, %cst_493 {dimension_numbers = #tpu.dot_dimension_numbers<[1], [0], [0], [1], [0, 0, 1, 1], [], []>} : vector<5x32xf32>, vector<32x32xf32>, vector<5x32xf32> -> vector<5x32xf32>
    %482 = arith.addf %477, %481 : vector<5x32xf32>
    %483 = vector.extract_strided_slice %472 {offsets = [2, 0], sizes = [5, 32], strides = [1, 1]} : vector<7x32xf32> to vector<5x32xf32>
    %c0_494 = arith.constant 0 : index
    %c2_495 = arith.constant 2 : index
    %c2_496 = arith.constant 2 : index
    %c0_497 = arith.constant 0 : index
    %c0_498 = arith.constant 0 : index
    %484 = vector.load %arg5[%c0_494, %c2_495, %c2_496, %c0_497, %c0_498] : memref<1x3x3x32x32xf32, #tpu.memory_space<vmem>>, vector<1x1x1x32x32xf32>
    %485 = vector.shape_cast %484 : vector<1x1x1x32x32xf32> to vector<32x32xf32>
    %cst_499 = arith.constant dense<0.000000e+00> : vector<5x32xf32>
    %486 = tpu.matmul %483, %485, %cst_499 {dimension_numbers = #tpu.dot_dimension_numbers<[1], [0], [0], [1], [0, 0, 1, 1], [], []>} : vector<5x32xf32>, vector<32x32xf32>, vector<5x32xf32> -> vector<5x32xf32>
    %487 = arith.addf %482, %486 : vector<5x32xf32>
    %488 = vector.broadcast %255 : vector<1x32xf32> to vector<5x32xf32>
    %489 = arith.addf %487, %488 : vector<5x32xf32>
    %cst_500 = arith.constant 0.000000e+00 : f32
    %490 = vector.broadcast %cst_500 : f32 to vector<5x32xf32>
    %491 = arith.maximumf %489, %490 : vector<5x32xf32>
    %492 = arith.truncf %491 : vector<5x32xf32> to vector<5x32xbf16>
    %c0_501 = arith.constant 0 : index
    %c3_502 = arith.constant 3 : index
    %c0_503 = arith.constant 0 : index
    %c0_504 = arith.constant 0 : index
    %493 = vector.load %arg7[%c0_501, %c3_502, %c0_503, %c0_504] : memref<1x5x5x32xbf16, #tpu.memory_space<vmem>>, vector<1x1x5x32xbf16>
    %494 = vector.shape_cast %493 : vector<1x1x5x32xbf16> to vector<5x32xbf16>
    %495 = vector.shape_cast %492 : vector<5x32xbf16> to vector<1x1x5x32xbf16>
    tpu.vector_store %arg7[%c0_501, %c3_502, %c0_503, %c0_504], %495 {strides = array<i32>} : memref<1x5x5x32xbf16, #tpu.memory_space<vmem>>, vector<1x1x5x32xbf16>,
    %cst_505 = arith.constant 0.000000e+00 : f32
    %496 = vector.broadcast %cst_505 : f32 to vector<5x32xf32>
    %c4_506 = arith.constant 4 : index
    %c0_507 = arith.constant 0 : index
    %c0_508 = arith.constant 0 : index
    %497 = vector.load %arg8[%c4_506, %c0_507, %c0_508] : memref<7x7x32xf32, #tpu.memory_space<vmem>>, vector<1x7x32xf32>
    %498 = vector.shape_cast %497 : vector<1x7x32xf32> to vector<7x32xf32>
    %499 = vector.extract_strided_slice %498 {offsets = [0, 0], sizes = [5, 32], strides = [1, 1]} : vector<7x32xf32> to vector<5x32xf32>
    %c0_509 = arith.constant 0 : index
    %c0_510 = arith.constant 0 : index
    %c0_511 = arith.constant 0 : index
    %c0_512 = arith.constant 0 : index
    %c0_513 = arith.constant 0 : index
    %500 = vector.load %arg5[%c0_509, %c0_510, %c0_511, %c0_512, %c0_513] : memref<1x3x3x32x32xf32, #tpu.memory_space<vmem>>, vector<1x1x1x32x32xf32>
    %501 = vector.shape_cast %500 : vector<1x1x1x32x32xf32> to vector<32x32xf32>
    %cst_514 = arith.constant dense<0.000000e+00> : vector<5x32xf32>
    %502 = tpu.matmul %499, %501, %cst_514 {dimension_numbers = #tpu.dot_dimension_numbers<[1], [0], [0], [1], [0, 0, 1, 1], [], []>} : vector<5x32xf32>, vector<32x32xf32>, vector<5x32xf32> -> vector<5x32xf32>
    %503 = arith.addf %496, %502 : vector<5x32xf32>
    %504 = vector.extract_strided_slice %498 {offsets = [1, 0], sizes = [5, 32], strides = [1, 1]} : vector<7x32xf32> to vector<5x32xf32>
    %c0_515 = arith.constant 0 : index
    %c0_516 = arith.constant 0 : index
    %c1_517 = arith.constant 1 : index
    %c0_518 = arith.constant 0 : index
    %c0_519 = arith.constant 0 : index
    %505 = vector.load %arg5[%c0_515, %c0_516, %c1_517, %c0_518, %c0_519] : memref<1x3x3x32x32xf32, #tpu.memory_space<vmem>>, vector<1x1x1x32x32xf32>
    %506 = vector.shape_cast %505 : vector<1x1x1x32x32xf32> to vector<32x32xf32>
    %cst_520 = arith.constant dense<0.000000e+00> : vector<5x32xf32>
    %507 = tpu.matmul %504, %506, %cst_520 {dimension_numbers = #tpu.dot_dimension_numbers<[1], [0], [0], [1], [0, 0, 1, 1], [], []>} : vector<5x32xf32>, vector<32x32xf32>, vector<5x32xf32> -> vector<5x32xf32>
    %508 = arith.addf %503, %507 : vector<5x32xf32>
    %509 = vector.extract_strided_slice %498 {offsets = [2, 0], sizes = [5, 32], strides = [1, 1]} : vector<7x32xf32> to vector<5x32xf32>
    %c0_521 = arith.constant 0 : index
    %c0_522 = arith.constant 0 : index
    %c2_523 = arith.constant 2 : index
    %c0_524 = arith.constant 0 : index
    %c0_525 = arith.constant 0 : index
    %510 = vector.load %arg5[%c0_521, %c0_522, %c2_523, %c0_524, %c0_525] : memref<1x3x3x32x32xf32, #tpu.memory_space<vmem>>, vector<1x1x1x32x32xf32>
    %511 = vector.shape_cast %510 : vector<1x1x1x32x32xf32> to vector<32x32xf32>
    %cst_526 = arith.constant dense<0.000000e+00> : vector<5x32xf32>
    %512 = tpu.matmul %509, %511, %cst_526 {dimension_numbers = #tpu.dot_dimension_numbers<[1], [0], [0], [1], [0, 0, 1, 1], [], []>} : vector<5x32xf32>, vector<32x32xf32>, vector<5x32xf32> -> vector<5x32xf32>
    %513 = arith.addf %508, %512 : vector<5x32xf32>
    %c5_527 = arith.constant 5 : index
    %c0_528 = arith.constant 0 : index
    %c0_529 = arith.constant 0 : index
    %514 = vector.load %arg8[%c5_527, %c0_528, %c0_529] : memref<7x7x32xf32, #tpu.memory_space<vmem>>, vector<1x7x32xf32>
    %515 = vector.shape_cast %514 : vector<1x7x32xf32> to vector<7x32xf32>
    %516 = vector.extract_strided_slice %515 {offsets = [0, 0], sizes = [5, 32], strides = [1, 1]} : vector<7x32xf32> to vector<5x32xf32>
    %c0_530 = arith.constant 0 : index
    %c1_531 = arith.constant 1 : index
    %c0_532 = arith.constant 0 : index
    %c0_533 = arith.constant 0 : index
    %c0_534 = arith.constant 0 : index
    %517 = vector.load %arg5[%c0_530, %c1_531, %c0_532, %c0_533, %c0_534] : memref<1x3x3x32x32xf32, #tpu.memory_space<vmem>>, vector<1x1x1x32x32xf32>
    %518 = vector.shape_cast %517 : vector<1x1x1x32x32xf32> to vector<32x32xf32>
    %cst_535 = arith.constant dense<0.000000e+00> : vector<5x32xf32>
    %519 = tpu.matmul %516, %518, %cst_535 {dimension_numbers = #tpu.dot_dimension_numbers<[1], [0], [0], [1], [0, 0, 1, 1], [], []>} : vector<5x32xf32>, vector<32x32xf32>, vector<5x32xf32> -> vector<5x32xf32>
    %520 = arith.addf %513, %519 : vector<5x32xf32>
    %521 = vector.extract_strided_slice %515 {offsets = [1, 0], sizes = [5, 32], strides = [1, 1]} : vector<7x32xf32> to vector<5x32xf32>
    %c0_536 = arith.constant 0 : index
    %c1_537 = arith.constant 1 : index
    %c1_538 = arith.constant 1 : index
    %c0_539 = arith.constant 0 : index
    %c0_540 = arith.constant 0 : index
    %522 = vector.load %arg5[%c0_536, %c1_537, %c1_538, %c0_539, %c0_540] : memref<1x3x3x32x32xf32, #tpu.memory_space<vmem>>, vector<1x1x1x32x32xf32>
    %523 = vector.shape_cast %522 : vector<1x1x1x32x32xf32> to vector<32x32xf32>
    %cst_541 = arith.constant dense<0.000000e+00> : vector<5x32xf32>
    %524 = tpu.matmul %521, %523, %cst_541 {dimension_numbers = #tpu.dot_dimension_numbers<[1], [0], [0], [1], [0, 0, 1, 1], [], []>} : vector<5x32xf32>, vector<32x32xf32>, vector<5x32xf32> -> vector<5x32xf32>
    %525 = arith.addf %520, %524 : vector<5x32xf32>
    %526 = vector.extract_strided_slice %515 {offsets = [2, 0], sizes = [5, 32], strides = [1, 1]} : vector<7x32xf32> to vector<5x32xf32>
    %c0_542 = arith.constant 0 : index
    %c1_543 = arith.constant 1 : index
    %c2_544 = arith.constant 2 : index
    %c0_545 = arith.constant 0 : index
    %c0_546 = arith.constant 0 : index
    %527 = vector.load %arg5[%c0_542, %c1_543, %c2_544, %c0_545, %c0_546] : memref<1x3x3x32x32xf32, #tpu.memory_space<vmem>>, vector<1x1x1x32x32xf32>
    %528 = vector.shape_cast %527 : vector<1x1x1x32x32xf32> to vector<32x32xf32>
    %cst_547 = arith.constant dense<0.000000e+00> : vector<5x32xf32>
    %529 = tpu.matmul %526, %528, %cst_547 {dimension_numbers = #tpu.dot_dimension_numbers<[1], [0], [0], [1], [0, 0, 1, 1], [], []>} : vector<5x32xf32>, vector<32x32xf32>, vector<5x32xf32> -> vector<5x32xf32>
    %530 = arith.addf %525, %529 : vector<5x32xf32>
    %c6_548 = arith.constant 6 : index
    %c0_549 = arith.constant 0 : index
    %c0_550 = arith.constant 0 : index
    %531 = vector.load %arg8[%c6_548, %c0_549, %c0_550] : memref<7x7x32xf32, #tpu.memory_space<vmem>>, vector<1x7x32xf32>
    %532 = vector.shape_cast %531 : vector<1x7x32xf32> to vector<7x32xf32>
    %533 = vector.extract_strided_slice %532 {offsets = [0, 0], sizes = [5, 32], strides = [1, 1]} : vector<7x32xf32> to vector<5x32xf32>
    %c0_551 = arith.constant 0 : index
    %c2_552 = arith.constant 2 : index
    %c0_553 = arith.constant 0 : index
    %c0_554 = arith.constant 0 : index
    %c0_555 = arith.constant 0 : index
    %534 = vector.load %arg5[%c0_551, %c2_552, %c0_553, %c0_554, %c0_555] : memref<1x3x3x32x32xf32, #tpu.memory_space<vmem>>, vector<1x1x1x32x32xf32>
    %535 = vector.shape_cast %534 : vector<1x1x1x32x32xf32> to vector<32x32xf32>
    %cst_556 = arith.constant dense<0.000000e+00> : vector<5x32xf32>
    %536 = tpu.matmul %533, %535, %cst_556 {dimension_numbers = #tpu.dot_dimension_numbers<[1], [0], [0], [1], [0, 0, 1, 1], [], []>} : vector<5x32xf32>, vector<32x32xf32>, vector<5x32xf32> -> vector<5x32xf32>
    %537 = arith.addf %530, %536 : vector<5x32xf32>
    %538 = vector.extract_strided_slice %532 {offsets = [1, 0], sizes = [5, 32], strides = [1, 1]} : vector<7x32xf32> to vector<5x32xf32>
    %c0_557 = arith.constant 0 : index
    %c2_558 = arith.constant 2 : index
    %c1_559 = arith.constant 1 : index
    %c0_560 = arith.constant 0 : index
    %c0_561 = arith.constant 0 : index
    %539 = vector.load %arg5[%c0_557, %c2_558, %c1_559, %c0_560, %c0_561] : memref<1x3x3x32x32xf32, #tpu.memory_space<vmem>>, vector<1x1x1x32x32xf32>
    %540 = vector.shape_cast %539 : vector<1x1x1x32x32xf32> to vector<32x32xf32>
    %cst_562 = arith.constant dense<0.000000e+00> : vector<5x32xf32>
    %541 = tpu.matmul %538, %540, %cst_562 {dimension_numbers = #tpu.dot_dimension_numbers<[1], [0], [0], [1], [0, 0, 1, 1], [], []>} : vector<5x32xf32>, vector<32x32xf32>, vector<5x32xf32> -> vector<5x32xf32>
    %542 = arith.addf %537, %541 : vector<5x32xf32>
    %543 = vector.extract_strided_slice %532 {offsets = [2, 0], sizes = [5, 32], strides = [1, 1]} : vector<7x32xf32> to vector<5x32xf32>
    %c0_563 = arith.constant 0 : index
    %c2_564 = arith.constant 2 : index
    %c2_565 = arith.constant 2 : index
    %c0_566 = arith.constant 0 : index
    %c0_567 = arith.constant 0 : index
    %544 = vector.load %arg5[%c0_563, %c2_564, %c2_565, %c0_566, %c0_567] : memref<1x3x3x32x32xf32, #tpu.memory_space<vmem>>, vector<1x1x1x32x32xf32>
    %545 = vector.shape_cast %544 : vector<1x1x1x32x32xf32> to vector<32x32xf32>
    %cst_568 = arith.constant dense<0.000000e+00> : vector<5x32xf32>
    %546 = tpu.matmul %543, %545, %cst_568 {dimension_numbers = #tpu.dot_dimension_numbers<[1], [0], [0], [1], [0, 0, 1, 1], [], []>} : vector<5x32xf32>, vector<32x32xf32>, vector<5x32xf32> -> vector<5x32xf32>
    %547 = arith.addf %542, %546 : vector<5x32xf32>
    %548 = vector.broadcast %255 : vector<1x32xf32> to vector<5x32xf32>
    %549 = arith.addf %547, %548 : vector<5x32xf32>
    %cst_569 = arith.constant 0.000000e+00 : f32
    %550 = vector.broadcast %cst_569 : f32 to vector<5x32xf32>
    %551 = arith.maximumf %549, %550 : vector<5x32xf32>
    %552 = arith.truncf %551 : vector<5x32xf32> to vector<5x32xbf16>
    %c0_570 = arith.constant 0 : index
    %c4_571 = arith.constant 4 : index
    %c0_572 = arith.constant 0 : index
    %c0_573 = arith.constant 0 : index
    %553 = vector.load %arg7[%c0_570, %c4_571, %c0_572, %c0_573] : memref<1x5x5x32xbf16, #tpu.memory_space<vmem>>, vector<1x1x5x32xbf16>
    %554 = vector.shape_cast %553 : vector<1x1x5x32xbf16> to vector<5x32xbf16>
    %555 = vector.shape_cast %552 : vector<5x32xbf16> to vector<1x1x5x32xbf16>
    tpu.vector_store %arg7[%c0_570, %c4_571, %c0_572, %c0_573], %555 {strides = array<i32>} : memref<1x5x5x32xbf16, #tpu.memory_space<vmem>>, vector<1x1x5x32xbf16>,
    return
  }
  func.func @transform_0(%arg0: i32) -> (i32, i32) {
    %c0_i32 = arith.constant 0 : i32
    %c0_i32_0 = arith.constant 0 : i32
    %c0_i32_1 = arith.constant 0 : i32
    return %c0_i32, %c0_i32_0 : i32, i32
  }
  func.func @transform_1(%arg0: i32) -> (i32, i32, i32, i32) {
    %c0_i32 = arith.constant 0 : i32
    %c0_i32_0 = arith.constant 0 : i32
    %c0_i32_1 = arith.constant 0 : i32
    %c0_i32_2 = arith.constant 0 : i32
    return %arg0, %c0_i32, %c0_i32_0, %c0_i32_1 : i32, i32, i32, i32
  }
  func.func @transform_2(%arg0: i32) -> (i32, i32, i32, i32) {
    %c0_i32 = arith.constant 0 : i32
    %c0_i32_0 = arith.constant 0 : i32
    %c0_i32_1 = arith.constant 0 : i32
    %c0_i32_2 = arith.constant 0 : i32
    %c0_i32_3 = arith.constant 0 : i32
    return %c0_i32, %c0_i32_0, %c0_i32_1, %c0_i32_2 : i32, i32, i32, i32
  }
  func.func @transform_3(%arg0: i32) -> (i32, i32) {
    %c0_i32 = arith.constant 0 : i32
    %c0_i32_0 = arith.constant 0 : i32
    %c0_i32_1 = arith.constant 0 : i32
    return %c0_i32, %c0_i32_0 : i32, i32
  }
  func.func @transform_4(%arg0: i32) -> (i32, i32, i32, i32, i32) {
    %c0_i32 = arith.constant 0 : i32
    %c0_i32_0 = arith.constant 0 : i32
    %c0_i32_1 = arith.constant 0 : i32
    %c0_i32_2 = arith.constant 0 : i32
    %c0_i32_3 = arith.constant 0 : i32
    %c0_i32_4 = arith.constant 0 : i32
    return %c0_i32, %c0_i32_0, %c0_i32_1, %c0_i32_2, %c0_i32_3 : i32, i32, i32, i32, i32
  }
  func.func @transform_5(%arg0: i32) -> (i32, i32, i32) {
    %c0_i32 = arith.constant 0 : i32
    %c0_i32_0 = arith.constant 0 : i32
    %c0_i32_1 = arith.constant 0 : i32
    %c0_i32_2 = arith.constant 0 : i32
    return %c0_i32, %c0_i32_0, %c0_i32_1 : i32, i32, i32
  }
  func.func @transform_6(%arg0: i32) -> (i32, i32, i32, i32) {
    %c0_i32 = arith.constant 0 : i32
    %c0_i32_0 = arith.constant 0 : i32
    %c0_i32_1 = arith.constant 0 : i32
    %c0_i32_2 = arith.constant 0 : i32
    return %arg0, %c0_i32, %c0_i32_0, %c0_i32_1 : i32, i32, i32, i32
  }
}

</mosaic_0001>

<bundles_post_ra>
// kernel: _forward_impl.3
= control target key start
LH: loop header
LB: loop body
LE: loop exit
PB: predicated region body
PF: predicated region fallthrough
CT: control target
= control target key end

     0   :  { %v135_v29 = vlaneseq  ;;  %v910_v33 = vmov 1966171168   ;;  %v911_v40 = vmov 0.0   ;;  %vm912_vm0 = vmmov 0   ;;  %s1121_s0 = inlined_call_operand.vmem [shape: bf16[2,800], index: 0, kind: input, shape index: {}]   ;;  %s1122_s1 = inlined_call_operand.vmem [shape: bf16[800,32], index: 1, kind: input, shape index: {}]   ;;  %s1123_s2 = inlined_call_operand.vmem [shape: f32[1,32], index: 2, kind: input, shape index: {}]   ;;  %s1124_s3 = inlined_call_operand.vmem [shape: f32[1,32], index: 3, kind: input, shape index: {}]   ;;  %s1125_s4 = inlined_call_operand.vmem [shape: f32[1,32], index: 4, kind: input, shape index: {}]   ;;  %s1126_s5 = inlined_call_operand.hbm [shape: f32[2,32], index: 5, kind: output, shape index: {}]  }
   0x1   :  { %v831_v0 = vld [vmem:[%s1122_s1 + $0x40] sm:$0xff]   ;;  %v835_v4 = vld [vmem:[%s1122_s1 + $0x48] sm:$0xff]   ;;  %v839_v8 = vld [vmem:[%s1122_s1 + $0x50] sm:$0xff]   ;;  %v133_v34 = vunpack.c.l.s4 %v910_v33 }
   0x2   :  { %v832_v1 = vld [vmem:[%s1122_s1] sm:$0xff]   ;;  %750 = vmatprep.subr.bf16.mxu0 %v831_v0  ;;  %v836_v5 = vld [vmem:[%s1122_s1 + $0x8] sm:$0xff]   ;;  %v840_v9 = vld [vmem:[%s1122_s1 + $0x10] sm:$0xff]   ;;  %v136_v35 = vshrl.u32 %v135_v29, 7 }
   0x3   :  { %v833_v2 = vld [vmem:[%s1122_s1 + $0xc0] sm:$0xff]   ;;  %751 = vmatpush3.bf16.msra.mxu0 %v832_v1  ;;  %v837_v6 = vld [vmem:[%s1122_s1 + $0xc8] sm:$0xff]   ;;  %v841_v10 = vld [vmem:[%s1122_s1 + $0xd0] sm:$0xff]   ;;  %v134_v39 = vunpack.c.0.s8 %v133_v34 }
   0x4   :  { %v834_v3 = vld [vmem:[%s1122_s1 + $0x80] sm:$0xff]   ;;  %772 = vmatprep.subr.bf16.mxu1 %v833_v2  ;;  %752 = vmatprep.subr.bf16.mxu0 %v835_v4  ;;  %v838_v7 = vld [vmem:[%s1122_s1 + $0x88] sm:$0xff]   ;;  %v842_v11 = vld [vmem:[%s1122_s1 + $0x90] sm:$0xff]  }
   0x5   :  { %773 = vmatpush3.bf16.msra.mxu1 %v834_v3  ;;  %v843_v12 = vld [vmem:[%s1122_s1 + $0x58] sm:$0xff]   ;;  %v847_v16 = vld [vmem:[%s1122_s1 + $0x60] sm:$0xff]   ;;  %v851_v20 = vld [vmem:[%s1122_s1 + $0x68] sm:$0xff]   ;;  %v137_v41 = vsub.s32 %v134_v39, %v136_v35 }
   0x6   :  { %774 = vmatprep.subr.bf16.mxu1 %v837_v6  ;;  %v844_v13 = vld [vmem:[%s1122_s1 + $0x18] sm:$0xff]   ;;  %v848_v17 = vld [vmem:[%s1122_s1 + $0x20] sm:$0xff]   ;;  %v852_v21 = vld [vmem:[%s1122_s1 + $0x28] sm:$0xff]  }
   0x7   :  { %753 = vmatpush3.bf16.msra.mxu0 %v836_v5  ;;  %v845_v14 = vld [vmem:[%s1122_s1 + $0xd8] sm:$0xff]   ;;  %v849_v18 = vld [vmem:[%s1122_s1 + $0xe0] sm:$0xff]   ;;  %v853_v22 = vld [vmem:[%s1122_s1 + $0xe8] sm:$0xff]  }
   0x8   :  { %754 = vmatprep.subr.bf16.mxu0 %v839_v8  ;;  %v846_v15 = vld [vmem:[%s1122_s1 + $0x98] sm:$0xff]   ;;  %v850_v19 = vld [vmem:[%s1122_s1 + $0xa0] sm:$0xff]   ;;  %v854_v23 = vld [vmem:[%s1122_s1 + $0xa8] sm:$0xff]  }
   0x9   :  { %775 = vmatpush3.bf16.msra.mxu1 %v838_v7  ;;  %v855_v24 = vld [vmem:[%s1122_s1 + $0x70] sm:$0xff]   ;;  %v859_v28 = vld [vmem:[%s1122_s1 + $0x78] sm:$0xff]   ;;  %v22_v32 = vld [vmem:[%s1121_s0] sm:$0x7f] }
   0xa   :  { %776 = vmatprep.subr.bf16.mxu1 %v841_v10  ;;  %v856_v25 = vld [vmem:[%s1122_s1 + $0x30] sm:$0xff]   ;;  %v860_v30 = vld [vmem:[%s1122_s1 + $0x38] sm:$0xff]   ;;  %v864_v37 = vld [vmem:[%s1122_s1 + $0x140] sm:$0xff]   ;;  %v131_v38 = vcombine.high %v22_v32, %v22_v32  ;;  %v138_v42 = vrot.slane %v22_v32, %v137_v41 }
   0xb   :  { %755 = vmatpush3.bf16.msra.mxu0 %v840_v9  ;;  %v857_v26 = vld [vmem:[%s1122_s1 + $0xf0] sm:$0xff]   ;;  %v861_v31 = vld [vmem:[%s1122_s1 + $0xf8] sm:$0xff]   ;;  %v865_v48 = vld [vmem:[%s1122_s1 + $0x100] sm:$0xff]  }
   0xc   :  { %756 = vmatprep.subr.bf16.mxu0 %v843_v12  ;;  %v858_v27 = vld [vmem:[%s1122_s1 + $0xb0] sm:$0xff]   ;;  %v863_v36 = vld [vmem:[%s1122_s1 + $0xb8] sm:$0xff]   ;;  %v145_v43 = vrot.slane %v131_v38, %v137_v41  ;;  %v146_v44 = vcombine.high %v138_v42, %v138_v42  ;;  %v154_v45 = vrot.slane %v138_v42, %v137_v41  ;;  %v866_v50 = vld [vmem:[%s1122_s1 + $0x148] sm:$0xff]  }
   0xd   :  { %777 = vmatpush3.bf16.msra.mxu1 %v842_v11  ;;  %v867_v53 = vld [vmem:[%s1122_s1 + $0x108] sm:$0xff]   ;;  %v868_v54 = vld [vmem:[%s1122_s1 + $0x150] sm:$0xff]   ;;  %v878_v55 = vld [vmem:[%s1122_s1 + $0x180] sm:$0xff]  }
   0xe   :  { %778 = vmatprep.subr.bf16.mxu1 %v845_v14  ;;  %v147_v46 = vcombine.high %v145_v43, %v145_v43  ;;  %v168_v47 = vrot.slane %v146_v44, %v137_v41  ;;  %v176_v49 = vcombine.high %v154_v45, %v154_v45  ;;  %v161_v56 = vrot.slane %v145_v43, %v137_v41  ;;  %v869_v57 = vld [vmem:[%s1122_s1 + $0x110] sm:$0xff]   ;;  %v881_v58 = vld [vmem:[%s1122_s1 + $0x188] sm:$0xff]  }
   0xf   :  { %757 = vmatpush3.bf16.msra.mxu0 %v844_v13 }
  0x10   :  { %758 = vmatprep.subr.bf16.mxu0 %v847_v16  ;;  %521 = vmatprep.mubr.bf16.mxu0 %v168_v47  ;;  %v178_v51 = vcombine.high %v168_v47, %v168_v47  ;;  %v175_v52 = vrot.slane %v147_v46, %v137_v41 }
  0x11   :  { %779 = vmatpush3.bf16.msra.mxu1 %v846_v15 }
  0x12   :  { %780 = vmatprep.subr.bf16.mxu1 %v849_v18  ;;  %561 = vmatprep.mubr.bf16.mxu1 %v178_v51 }
  0x13   :  { %759 = vmatpush3.bf16.msra.mxu0 %v848_v17 }
  0x14   :  { %760 = vmatprep.subr.bf16.mxu0 %v851_v20 }
  0x15   :  { %781 = vmatpush3.bf16.msra.mxu1 %v850_v19 }
  0x16   :  { %782 = vmatprep.subr.bf16.mxu1 %v853_v22 }
  0x17   :  { %761 = vmatpush3.bf16.msra.mxu0 %v852_v21 }
  0x18   :  { %762 = vmatprep.subr.bf16.mxu0 %v855_v24 }
  0x19   :  { %783 = vmatpush3.bf16.msra.mxu1 %v854_v23 }
  0x1a   :  { %784 = vmatprep.subr.bf16.mxu1 %v857_v26 }
  0x1b   :  { %763 = vmatpush3.bf16.msra.mxu0 %v856_v25 }
  0x1c   :  { %764 = vmatprep.subr.bf16.mxu0 %v859_v28 }
  0x1d   :  { %785 = vmatpush3.bf16.msra.mxu1 %v858_v27 }
  0x1e   :  { %786 = vmatprep.subr.bf16.mxu1 %v861_v31 }
  0x1f   :  { %765 = vmatpush3.bf16.msra.mxu0 %v860_v30 }
  0x20   :  { %794 = vmatprep.subr.bf16.mxu0 %v864_v37 }
  0x21   :  { %787 = vmatpush3.bf16.msra.mxu1 %v863_v36 }
  0x22   :  { %819 = vmatprep.subr.bf16.mxu1 %v911_v40  ;;  %522 = vmatmul.mubr.bf16.vlgmr.msra.gmra.mrb[0].mxu0 %v154_v45 }
  0x23   :  { %795 = vmatpush3.bf16.msra.mxu0 %v865_v48  ;;  %601 = vmatprep.mubr.bf16.mxu0 %v175_v52 }
  0x24   :  { %562 = vmatmul.mubr.bf16.vlgmr.msra.gmra.mrb[0].mxu1 %v176_v49  ;;  %796 = vmatprep.subr.bf16.mxu0 %v866_v50 }
  0x25   :  { %823 = vmatprep.mubr.msk.bf16.mxu1 %vm912_vm0, %v911_v40  ;;  %820 = vmatpush3.bf16.msra.mxu1 %v878_v55 }
  0x26   :  { %821 = vmatprep.subr.bf16.mxu1 %v911_v40 }
  0x27   :  { %797 = vmatpush3.bf16.msra.mxu0 %v867_v53 }
  0x28   :  { %10 = vsyncpa [#allocation3], 0  ;;  %798 = vmatprep.subr.bf16.mxu0 %v868_v54  ;;  %v870_v59 = vld [vmem:[%s1122_s1 + $0x158] sm:$0xff]   ;;  %v177_v60 = vcombine.high %v161_v56, %v161_v56  ;;  %vm485_vm1 = vcmask 261120   ;;  %v872_v62 = vld [vmem:[%s1122_s1 + $0x160] sm:$0xff]   ;;  %vm649_vm2 = vcmask 254976  }
  0x29   :  { %822 = vmatpush3.bf16.msra.mxu1 %v881_v58  ;;  %v871_v61 = vld [vmem:[%s1122_s1 + $0x118] sm:$0xff]   ;;  %v873_v63 = vld [vmem:[%s1122_s1 + $0x120] sm:$0xff]   ;;  %v874_v0 = vld [vmem:[%s1122_s1 + $0x168] sm:$0xff]   ;;  %s913_s22 = smov [#allocation2]  }
  0x2a   :  { %v875_v1 = vld [vmem:[%s1122_s1 + $0x128] sm:$0xff]   ;;  %v876_v2 = vld [vmem:[%s1122_s1 + $0x170] sm:$0xff]   ;;  %v879_v4 = vld [vmem:[%s1122_s1 + $0x178] sm:$0xff]   ;;  %s688_s23 = sshll.u32 %s913_s22, 4  ;;  %s689_s23 = int_to_ptr.vmem [resolvable:$true] %s688_s23 }
  0x2b   :  { %799 = vmatpush3.bf16.msra.mxu0 %v869_v57  ;;  %v877_v3 = vld [vmem:[%s1122_s1 + $0x130] sm:$0xff]   ;;  %v880_v5 = vld [vmem:[%s1122_s1 + $0x138] sm:$0xff]   ;;  %v696_v7 = vld [vmem:[%s1123_s2] ss:$0 sm:$0xff]  ;;  %s886_s24 = scalar_lea.vmem %s689_s23, 32  ;;  %p891_p1 = scmp.lt.s32.totalorder %s689_s23, %s689_s23 }
  0x2c   :  { %800 = vmatprep.subr.bf16.mxu0 %v870_v59  ;;  %824 = vmatmul.mubr.msk.bf16.vlgmr.msra.gmra.mrb[4].mxu1 %vm485_vm1, %v177_v60  ;;  %v748_v40 = vld [vmem:[%s1124_s3] ss:$0 sm:$0xff]  ;;  %p887_p0 = scmp.ne.s32.totalorder %s689_s23, %s886_s24  ;;  %p892_p2 = scmp.lt.s32.totalorder %s886_s24, %s886_s24 }
  0x2d   :  { %v749_v42 = vld [vmem:[%s1125_s4] ss:$0 sm:$0xff] }
  0x2e   :  { %p893_p3 = por %p892_p2, %p891_p1 }
  0x2f   :  { %801 = vmatpush3.bf16.msra.mxu0 %v871_v61 }
  0x30   :  { %802 = vmatprep.subr.bf16.mxu0 %v872_v62  ;;  %p894_p4 = pnand %p893_p3, %p887_p0 }
  0x33   :  { %803 = vmatpush3.bf16.msra.mxu0 %v873_v63 }
  0x34   :  { %804 = vmatprep.subr.bf16.mxu0 %v874_v0 }
  0x37   :  { %805 = vmatpush3.bf16.msra.mxu0 %v875_v1 }
  0x38   :  { %806 = vmatprep.subr.bf16.mxu0 %v876_v2 }
  0x3b   :  { %807 = vmatpush3.bf16.msra.mxu0 %v877_v3 }
  0x3c   :  { %808 = vmatprep.subr.bf16.mxu0 %v879_v4 }
  0x3f   :  { %809 = vmatpush3.bf16.msra.mxu0 %v880_v5 }
  0x42   :  { %602 = vmatmul.mubr.bf16.vlgmr.msra.gmra.mrb[4].mxu0 %v161_v56 }
  0xf5   :  { %v766_v6 = vpop.f32.mrb[0].mxu0 }
  0xf6   :  { %v767_v8 = vpop.f32.mrb[1].mxu0 }
  0xf7   :  { %v768_v9 = vadd.f32 %v767_v8, %v766_v6  ;;  %v769_v10 = vpop.f32.mrb[2].mxu0  ;;  %v788_v11 = vpop.f32.mrb[0].mxu1 }
  0xf8   :  { %v770_v12 = vpop.f32.mrb[3].mxu0  ;;  %v789_v13 = vpop.f32.mrb[1].mxu1 }
  0xf9   :  { %v524_v14 = vadd.f32 %v768_v9, %v696_v7  ;;  %v790_v15 = vadd.f32 %v789_v13, %v788_v11  ;;  %v791_v16 = vpop.f32.mrb[2].mxu1 }
  0xfa   :  { %v792_v17 = vpop.f32.mrb[3].mxu1 }
  0xfb   :  { %v564_v18 = vadd.f32 %v790_v15, %v524_v14 }
  0xff   :  { %v643_v19 = vpop.f32.mrb[4].mxu1 }
 0x100   :  { %v825_v20 = vpop.f32.mrb[5].mxu1 }
 0x101   :  { %v646_v21 = vpop.f32.mrb[6].mxu1 }
 0x102   :  { %v826_v22 = vpop.f32.mrb[7].mxu1 }
 0x115   :  { %v810_v23 = vpop.f32.mrb[4].mxu0 }
 0x116   :  { %v811_v24 = vpop.f32.mrb[5].mxu0 }
 0x117   :  { %v812_v25 = vadd.f32 %v811_v24, %v810_v23  ;;  %v813_v26 = vpop.f32.mrb[6].mxu0 }
 0x118   :  { %v814_v27 = vpop.f32.mrb[7].mxu0 }
 0x119   :  { %v604_v28 = vadd.f32 %v812_v25, %v564_v18 }
 0x11b   :  { %v644_v29 = vadd.f32 %v643_v19, %v604_v28 }
 0x11d   :  { %v650_v30 = vsel %vm649_vm2, %v644_v29, 0.0 }
 0x11e   :  { %651 = vadd.xlane.f32.xlu0 %v650_v30 }
 0x1ab   :  { %v652_v31 = vpop.xlane.xlu0 %651 }
 0x1ac   :  { %v654_v32 = vmul.f32 0.03125, %v652_v31 }
 0x1ae   :  { %v655_v33 = vsub.f32 %v644_v29, %v654_v32 }
 0x1b0   :  { %v656_v34 = vmul.f32 %v655_v33, %v655_v33 }
 0x1b2   :  { %v657_v35 = vsel %vm649_vm2, %v656_v34, 0.0 }
 0x1b3   :  { %658 = vadd.xlane.f32.xlu0 %v657_v35 }
 0x240   :  { %v659_v36 = vpop.xlane.xlu0 %658 }
 0x241   :  { %v660_v37 = vmul.f32 0.03125, %v659_v36 }
 0x243   :  { %v661_v38 = vadd.f32 1e-05, %v660_v37 }
 0x245   :  { %882 = vrsqrt.f32 %v661_v38 }
 0x24f   :  { %v883_v39 = vpop.eup %882 }
 0x250   :  { %v663_v41 = vmul.f32 %v883_v39, %v655_v33 }
 0x252   :  { %v671_v43 = vmul.f32 %v748_v40, %v663_v41 }
 0x254   :  { %v679_v44 = vadd.f32 %v749_v42, %v671_v43 }
 0x256   :  { %884 = vtanh.f32 %v679_v44 }
 0x260   :  { %v885_v45 = vpop.eup %884 }
 0x261   :  { %681 = vst.msk [vmem:[#allocation2] sm:$0x3] %vm649_vm2, %v885_v45 }
 0x262   :  { %897 = shalt.err (!%p894_p4)
}
 0x263   :  { %s898_s4 = scalar_lea.hbm %s1126_s5, 32 }
 0x264   :  { %p899_p5 = scmp.ne.s32.totalorder %s1126_s5, %s898_s4  ;;  %p902_p6 = scmp.lt.u32.totalorder %s898_s4, %s1126_s5 }
 0x266   :  { %p904_p7 = pnand %p902_p6, %p899_p5 }
 0x268   :  { %907 = shalt.err (!%p904_p7)
}
 0x269   :  { %691 = dma.vmem_to_hbm [thread:$0]  %s689_s23, 32, %s1126_s5, [#allocation3]  }
 0x26a   :  { %908 = dma.done.wait [#allocation3], 32  }
 0x26b   :  { %909 = vsyncadd [#allocation3], 4294967264 }
 0x26c   :  { %695 = vsyncpa [#allocation3], 1 }

// kernel: _forward_impl.2
= control target key start
LH: loop header
LB: loop body
LE: loop exit
PB: predicated region body
PF: predicated region fallthrough
CT: control target
= control target key end

     0   :  { %s7981_s23 = smov 0   ;;  %s8848_s0 = inlined_call_operand.<no memory space> [shape: f32[1,1], index: 0, kind: input, shape index: {}]   ;;  %s8849_s1 = inlined_call_operand.vmem [shape: bf16[2,8,8,12], index: 1, kind: input, shape index: {}]   ;;  %s8850_s2 = inlined_call_operand.vmem [shape: f32[2,2,12,32], index: 2, kind: input, shape index: {}]   ;;  %s8851_s3 = inlined_call_operand.vmem [shape: f32[1,32], index: 3, kind: input, shape index: {}]   ;;  %s8852_s4 = inlined_call_operand.vmem [shape: f32[1,3,3,32,32], index: 4, kind: input, shape index: {}]   ;;  %s8853_s5 = inlined_call_operand.vmem [shape: f32[1,1,32], index: 5, kind: input, shape index: {}]   ;;  %s8854_s6 = inlined_call_operand.vmem [shape: bf16[2,5,5,32], index: 6, kind: output, shape index: {}]  }
   0x1   :  { %11 = sst [smem:[#allocation3]] %s8848_s0 }
   0x2 LB: > { %s6158_s24 = sadd.s32 4294967295, %s7937_s23   ;;  %p6162_p0 = scmp.ge.s32.totalorder %s7937_s23, 1  ;;  %s7937_s23 = sphi %s7981_s23, %s17_s23  }
   0x3   : > { %p213_p1 = scmp.lt.s32.totalorder %s7937_s23, 3 }
   0x5   : > { %p214_p2 = pnand %p6162_p0, %p213_p1 }
   0x6   : > { %v7992_v0 = vld [vmem:[%s8850_s2] sm:$0xff] (!%p214_p2)  ;;  %v258_v1 = vld [vmem:[%s8850_s2 + $0x8] sm:$0xf] (!%p214_p2)  ;;  %vm267_vm0 = vcmask (!%p214_p2), 1043456   ;;  %v7939_v2 = vmov (!%p214_p2), 0.0|0.0   ;;  %vm7940_vm1 = vmmov (!%p214_p2), 1  }
   0x7   : > { %217 = sbr.rel (%p214_p2) target bundleno = 666 (0x29a), region = 44  ;;  %7499 = vmatprep.subr.bf16.mxu0 (!%p214_p2), %v7939_v2  ;;  %vm7998_vm2 = vmpackc.low (!%p214_p2), %vm267_vm0, %vm7940_vm1  ;;  %v7500_v4 = vpack.c.bf16 (!%p214_p2), %v258_v1, %v7992_v0  ;;  %7495 = vmatprep.subr.bf16.mxu1 (!%p214_p2), %v7939_v2  ;;  %v8007_v5 = vld [vmem:[%s8850_s2 + $0x10] sm:$0xff] (!%p214_p2)  ;;  %v6167_v6 = vld [vmem:[%s8850_s2 + $0x18] sm:$0xf] (!%p214_p2)  ;;  %p243_p3 = scmp.lt.s32.totalorder (!%p214_p2), %s6158_s24, 1  ;;  %vm7941_vm3 = vmmov (!%p214_p2), 0  }
   0x8   : > { %v7496_v7 = vpack.c.bf16 (!%p214_p2), %v6167_v6, %v8007_v5  ;;  %v7942_v8 = vmov (!%p214_p2), 0.0   ;;  %v8027_v9 = vld [vmem:[%s8850_s2 + $0x20] sm:$0xff] (!%p214_p2)  ;;  %v6174_v10 = vld [vmem:[%s8850_s2 + $0x28] sm:$0xf] (!%p214_p2)  ;;  %v6184_v11 = vld [vmem:[%s8850_s2 + $0x18] sm:$0xf] (!%p214_p2) }
   0x9   : > { %6815 = vmatprep.mubr.msk.f32.mxu0 (!%p214_p2), %vm7941_vm3, %v7942_v8  ;;  %6808 = vmatprep.mubr.msk.f32.mxu1 (!%p214_p2), %vm7941_vm3, %v7942_v8  ;;  %vm264_vm4 = vcmask (!%p214_p2), 97280   ;;  %v7504_v13 = vpack.c.bf16 (!%p214_p2), %v6174_v10, %v8027_v9  ;;  %v7512_v16 = vpack.c.bf16 (!%p214_p2), %v6184_v11, %v8007_v5  ;;  %v594_v18 = vld [vmem:[%s8850_s2 + $0x8] sm:$0xf] (!%p214_p2)  ;;  %v8059_v21 = vld [vmem:[%s8850_s2 + $0x30] sm:$0xff] (!%p214_p2)  ;;  %v6178_v22 = vld [vmem:[%s8850_s2 + $0x38] sm:$0xf] (!%p214_p2) }
   0xa   : > { %7502 = vmatpush3.bf16.msk.msra.mxu0 (!%p214_p2), %vm7998_vm2, %v7500_v4  ;;  %7498 = vmatpush3.bf16.msk.msra.mxu1 (!%p214_p2), %vm7998_vm2, %v7496_v7  ;;  %v7516_v23 = vpack.c.bf16 (!%p214_p2), %v594_v18, %v7992_v0  ;;  %v7508_v25 = vpack.c.bf16 (!%p214_p2), %v6178_v22, %v8059_v21  ;;  %v6191_v26 = vld [vmem:[%s8850_s2 + $0x28] sm:$0xf] (!%p214_p2)  ;;  %v6200_v27 = vld [vmem:[%s8850_s2 + $0x18] sm:$0xf] (!%p214_p2)  ;;  %s253_s17 = sld [smem:[#allocation3]] (!%p214_p2)  ;;  %vm589_vm5 = vcmask (!%p214_p2), 260096  }
   0xb   : > { %7503 = vmatprep.subr.bf16.mxu0 (!%p214_p2), %v7939_v2  ;;  %7511 = vmatprep.subr.bf16.mxu1 (!%p214_p2), %v7939_v2  ;;  %v7520_v28 = vpack.c.bf16 (!%p214_p2), %v6191_v26, %v8027_v9  ;;  %v7528_v31 = vpack.c.bf16 (!%p214_p2), %v6200_v27, %v8007_v5  ;;  %v918_v32 = vld [vmem:[%s8850_s2 + $0x8] sm:$0xf] (!%p214_p2)  ;;  %v6195_v35 = vld [vmem:[%s8850_s2 + $0x38] sm:$0xf] (!%p214_p2)  ;;  %vm2548_vm6 = vcmask (!%p214_p2), 261120   ;;  %vm3257_vm7 = vcmask (!%p214_p2), 256000  }
   0xc   : > { %v7532_v36 = vpack.c.bf16 (!%p214_p2), %v918_v32, %v7992_v0  ;;  %v7524_v38 = vpack.c.bf16 (!%p214_p2), %v6195_v35, %v8059_v21  ;;  %v6207_v39 = vld [vmem:[%s8850_s2 + $0x28] sm:$0xf] (!%p214_p2)  ;;  %v6216_v40 = vld [vmem:[%s8850_s2 + $0x18] sm:$0xf] (!%p214_p2)  ;;  %vm3258_vm8 = vsmask.f32 (!%p214_p2), 2304 }
   0xd   : > { %v7536_v41 = vpack.c.bf16 (!%p214_p2), %v6207_v39, %v8027_v9  ;;  %v7544_v44 = vpack.c.bf16 (!%p214_p2), %v6216_v40, %v8007_v5  ;;  %v1242_v45 = vld [vmem:[%s8850_s2 + $0x8] sm:$0xf] (!%p214_p2)  ;;  %v6211_v48 = vld [vmem:[%s8850_s2 + $0x38] sm:$0xf] (!%p214_p2)  ;;  %v6284_v39 = vld [vmem:[%s8852_s4 + $0x40] sm:$0xff] (!%p214_p2) }
   0xe   : > { %s8860_s24 = smov (!%p243_p3, %s6158_s24), 1  ;;  %v7548_v49 = vpack.c.bf16 %v1242_v45, %v7992_v0  ;;  %v7540_v51 = vpack.c.bf16 %v6211_v48, %v8059_v21  ;;  %v6223_v52 = vld [vmem:[%s8850_s2 + $0x28] sm:$0xf]  ;;  %v6232_v54 = vld [vmem:[%s8850_s2 + $0x18] sm:$0xf]  ;;  %v6286_v45 = vld [vmem:[%s8852_s4 + $0x50] sm:$0xff] }
   0xf   : > { %s6494_s12 = sshll.u32 %s8860_s24, 5  ;;  %v7552_v55 = vpack.c.bf16 %v6223_v52, %v8027_v9  ;;  %v7560_v58 = vpack.c.bf16 %v6232_v54, %v8007_v5  ;;  %v1566_v59 = vld [vmem:[%s8850_s2 + $0x8] sm:$0xf]  ;;  %v6227_v60 = vld [vmem:[%s8850_s2 + $0x38] sm:$0xf]  ;;  %s7918_s14 = smul.u32 20, %s8860_s24  ;;  %vm8817_vm9 = vmand %vm3257_vm7, %vm3258_vm8 }
  0x10   : > { %s8037_s15 = scalar_lea.vmem %s8849_s1, %s6494_s12  ;;  %v7564_v62 = vpack.c.bf16 %v1566_v59, %v7992_v0  ;;  %v7556_v1 = vpack.c.bf16 %v6227_v60, %v8059_v21  ;;  %v6239_v4 = vld [vmem:[%s8850_s2 + $0x28] sm:$0xf]  ;;  %v6248_v7 = vld [vmem:[%s8850_s2 + $0x18] sm:$0xf]  ;;  %v8359_v54 = vld [vmem:[%s8851_s3] ss:$0 sm:$0xff] }
  0x11   : > { %v255_v12 = vld [vmem:[%s8037_s15] sm:$0xff]   ;;  %v6189_v33 = vld [vmem:[%s8037_s15 + $0x8] sm:$0xff]   ;;  %v6230_v53 = vld [vmem:[%s8037_s15 + $0x10] sm:$0xff]   ;;  %v7568_v10 = vpack.c.bf16 %v6239_v4, %v8027_v9  ;;  %s8814_s19 = scalar_lea.vmem %s8854_s6, %s7918_s14 }
  0x12   : > { %v256_v14 = vunpack.c.l.bf16 %v255_v12  ;;  %v592_v15 = vunpack.c.h.bf16 %v255_v12  ;;  %v6172_v19 = vld [vmem:[%s8037_s15 + $0x4] sm:$0xff]   ;;  %v751_v37 = vunpack.c.l.bf16 %v6189_v33  ;;  %v1240_v43 = vunpack.c.h.bf16 %v6189_v33  ;;  %v6205_v46 = vld [vmem:[%s8037_s15 + $0xc] sm:$0xff]   ;;  %v6246_v6 = vld [vmem:[%s8037_s15 + $0x14] sm:$0xff]  }
  0x13   : > { %v418_v24 = vunpack.c.l.bf16 %v6172_v19  ;;  %v916_v30 = vunpack.c.h.bf16 %v6172_v19  ;;  %v1075_v50 = vunpack.c.l.bf16 %v6205_v46  ;;  %v1564_v57 = vunpack.c.l.bf16 %v6230_v53  ;;  %v6262_v22 = vld [vmem:[%s8037_s15 + $0x18] sm:$0xff]   ;;  %v6279_v3 = vld [vmem:[%s8852_s4 + $0x28] sm:$0xff]  ;;  %v6294_v60 = vld [vmem:[%s8852_s4 + $0x80] sm:$0xff] }
  0x14   : > { %6816 = vmatmul.mubr.msk.f32.vlgmr.msra.gmra.mrb[0].mxu0 %vm264_vm4, %v256_v14  ;;  %v263_v17 = vrot.slane %v256_v14, 1  ;;  %v598_v20 = vrot.slane %v592_v15, 1  ;;  %v833_v42 = vrot.slane %v751_v37, 1  ;;  %v1246_v47 = vrot.slane %v1240_v43, 1  ;;  %v1890_v14 = vld [vmem:[%s8850_s2 + $0x8] sm:$0xf] }
  0x15   : > { %7506 = vmatpush3.bf16.msk.msra.mxu0 %vm7998_vm2, %v7504_v13  ;;  %6822 = vmatprep.mubr.msk.f32.mxu0 %vm7941_vm3, %v7942_v8  ;;  %v502_v29 = vrot.slane %v418_v24, 1  ;;  %v922_v34 = vrot.slane %v916_v30, 1  ;;  %v1157_v56 = vrot.slane %v1075_v50, 1  ;;  %v1570_v61 = vrot.slane %v1564_v57, 1  ;;  %v6275_v35 = vld [vmem:[%s8850_s2 + $0x38] sm:$0xf] }
  0x16   : > { %6809 = vmatmul.mubr.msk.f32.vlgmr.msra.gmra.mrb[0].mxu1 %vm264_vm4, %v263_v17  ;;  %7507 = vmatprep.subr.bf16.mxu0 %v7939_v2  ;;  %v1399_v63 = vunpack.c.h.bf16 %v6205_v46  ;;  %v1888_v12 = vunpack.c.l.bf16 %v6246_v6  ;;  %v7576_v13 = vpack.c.bf16 %v6248_v7, %v8007_v5  ;;  %v7580_v17 = vpack.c.bf16 %v1890_v14, %v7992_v0  ;;  %v6285_v40 = vld [vmem:[%s8852_s4 + $0x48] sm:$0xff]  ;;  %v6287_v46 = vld [vmem:[%s8852_s4 + $0x58] sm:$0xff]  ;;  %v2539_v7 = vld [vmem:[%s8852_s4 + $0x10] sm:$0xff] }
  0x17   : > { %7514 = vmatpush3.bf16.msk.msra.mxu1 %vm7998_vm2, %v7512_v16  ;;  %6836 = vmatprep.mubr.msk.f32.mxu1 %vm7941_vm3, %v7942_v8  ;;  %v1723_v18 = vunpack.c.h.bf16 %v6230_v53  ;;  %v2212_v26 = vunpack.c.l.bf16 %v6262_v22  ;;  %v2538_v59 = vld [vmem:[%s8852_s4 + $0x8] sm:$0xff]  ;;  %v2540_v14 = vld [vmem:[%s8852_s4 + $0x18] sm:$0xff] }
  0x18   : > { %7515 = vmatprep.subr.bf16.mxu1 %v7939_v2  ;;  %v1481_v11 = vrot.slane %v1399_v63, 1  ;;  %v1894_v16 = vrot.slane %v1888_v12, 1 }
  0x1a   : > { %6837 = vmatmul.mubr.msk.f32.vlgmr.msra.gmra.mrb[2].mxu1 %vm264_vm4, %v598_v20  ;;  %v6255_v20 = vld [vmem:[%s8850_s2 + $0x28] sm:$0xf] }
  0x1b   : > { %7518 = vmatpush3.bf16.msk.msra.mxu1 %vm7998_vm2, %v7516_v23  ;;  %6843 = vmatprep.mubr.msk.f32.mxu1 %vm7941_vm3, %v7942_v8  ;;  %v6264_v23 = vld [vmem:[%s8850_s2 + $0x18] sm:$0xf] }
  0x1c   : > { %6823 = vmatmul.mubr.msk.f32.vlgmr.msra.gmra.mrb[0].mxu0 %vm264_vm4, %v418_v24  ;;  %7519 = vmatprep.subr.bf16.mxu1 %v7939_v2  ;;  %v7584_v24 = vpack.c.bf16 %v6255_v20, %v8027_v9  ;;  %v7592_v27 = vpack.c.bf16 %v6264_v23, %v8007_v5  ;;  %v6259_v5 = vld [vmem:[%s8850_s2 + $0x38] sm:$0xf]  ;;  %v6289_v20 = vld [vmem:[%s8852_s4 + $0x60] sm:$0xff] }
  0x1d   : > { %7510 = vmatpush3.bf16.msk.msra.mxu0 %vm7998_vm2, %v7508_v25  ;;  %6829 = vmatprep.mubr.msk.f32.mxu0 %vm7941_vm3, %v7942_v8  ;;  %v1805_v25 = vrot.slane %v1723_v18, 1  ;;  %v7588_v32 = vpack.c.bf16 %v6259_v5, %v8059_v21 }
  0x1e   : > { %7527 = vmatprep.subr.bf16.mxu0 %v7939_v2 }
  0x22   : > { %6844 = vmatmul.mubr.msk.f32.vlgmr.msra.gmra.mrb[2].mxu1 %vm264_vm4, %v592_v15  ;;  %v6243_v15 = vld [vmem:[%s8850_s2 + $0x38] sm:$0xf] }
  0x23   : > { %7522 = vmatpush3.bf16.msk.msra.mxu1 %vm7998_vm2, %v7520_v28  ;;  %6850 = vmatprep.mubr.msk.f32.mxu1 %vm7941_vm3, %v7942_v8  ;;  %v7572_v19 = vpack.c.bf16 %v6243_v15, %v8059_v21  ;;  %v2214_v28 = vld [vmem:[%s8850_s2 + $0x8] sm:$0xf]  ;;  %v6296_v15 = vld [vmem:[%s8852_s4 + $0x90] sm:$0xff] }
  0x24   : > { %6830 = vmatmul.mubr.msk.f32.vlgmr.msra.gmra.mrb[0].mxu0 %vm264_vm4, %v502_v29  ;;  %7523 = vmatprep.subr.bf16.mxu1 %v7939_v2  ;;  %v2218_v29 = vrot.slane %v2212_v26, 1 }
  0x25   : > { %7530 = vmatpush3.bf16.msk.msra.mxu0 %vm7998_vm2, %v7528_v31  ;;  %6864 = vmatprep.mubr.msk.f32.mxu0 %vm7941_vm3, %v7942_v8  ;;  %v2047_v31 = vunpack.c.h.bf16 %v6246_v6 }
  0x26   : > { %7531 = vmatprep.subr.bf16.mxu0 %v7939_v2 }
  0x28   : > { %6865 = vmatmul.mubr.msk.f32.vlgmr.msra.gmra.mrb[2].mxu0 %vm264_vm4, %v922_v34  ;;  %v2129_v34 = vrot.slane %v2047_v31, 1 }
  0x29   : > { %7534 = vmatpush3.bf16.msk.msra.mxu0 %vm7998_vm2, %v7532_v36  ;;  %6871 = vmatprep.mubr.msk.f32.mxu0 %vm7941_vm3, %v7942_v8  ;;  %v7604_v36 = vpack.c.bf16 %v6275_v35, %v8059_v21  ;;  %v6278_v21 = vld [vmem:[%s8852_s4 + $0x20] sm:$0xff]  ;;  %v6306_v35 = vld [vmem:[%s8852_s4 + $0xd0] sm:$0xff] }
  0x2a   : > { %6851 = vmatmul.mubr.msk.f32.vlgmr.msra.gmra.mrb[2].mxu1 %vm264_vm4, %v751_v37  ;;  %7535 = vmatprep.subr.bf16.mxu0 %v7939_v2 }
  0x2b   : > { %7526 = vmatpush3.bf16.msk.msra.mxu1 %vm7998_vm2, %v7524_v38  ;;  %6857 = vmatprep.mubr.msk.f32.mxu1 %vm7941_vm3, %v7942_v8  ;;  %v8320_v38 = vpack.c.bf16 %v6279_v3, %v6278_v21 }
  0x2c   : > { %7543 = vmatprep.subr.bf16.mxu1 %v7939_v2 }
  0x30   : > { %6872 = vmatmul.mubr.msk.f32.vlgmr.msra.gmra.mrb[2].mxu0 %vm264_vm4, %v916_v30  ;;  %v7596_v30 = vpack.c.bf16 %v2214_v28, %v7992_v0  ;;  %v6271_v0 = vld [vmem:[%s8850_s2 + $0x28] sm:$0xf] }
  0x31   : > { %7538 = vmatpush3.bf16.msk.msra.mxu0 %vm7998_vm2, %v7536_v41  ;;  %6878 = vmatprep.mubr.msk.f32.mxu0 %vm7941_vm3, %v7942_v8  ;;  %v7600_v33 = vpack.c.bf16 %v6271_v0, %v8027_v9  ;;  %v2371_v9 = vunpack.c.h.bf16 %v6262_v22  ;;  %v8328_v41 = vpack.c.bf16 %v6285_v40, %v6284_v39  ;;  %v6290_v22 = vld [vmem:[%s8852_s4 + $0x68] sm:$0xff]  ;;  %v6301_v39 = vld [vmem:[%s8852_s4 + $0xb0] sm:$0xff]  ;;  %v6302_v40 = vld [vmem:[%s8852_s4 + $0xb8] sm:$0xff] }
  0x32   : > { %6858 = vmatmul.mubr.msk.f32.vlgmr.msra.gmra.mrb[2].mxu1 %vm264_vm4, %v833_v42  ;;  %7539 = vmatprep.subr.bf16.mxu0 %v7939_v2  ;;  %v6280_v42 = vld [vmem:[%s8852_s4 + $0x30] sm:$0xff]  ;;  %v8416_v23 = vpack.c.bf16 %v6290_v22, %v6289_v20 }
  0x33   : > { %7546 = vmatpush3.bf16.msk.msra.mxu1 %vm7998_vm2, %v7544_v44  ;;  %6892 = vmatprep.mubr.msk.f32.mxu1 %vm7941_vm3, %v7942_v8  ;;  %v2453_v37 = vrot.slane %v2371_v9, 1 }
  0x34   : > { %7547 = vmatprep.subr.bf16.mxu1 %v7939_v2 }
  0x36   : > { %6893 = vmatmul.mubr.msk.f32.vlgmr.msra.gmra.mrb[4].mxu1 %vm264_vm4, %v1246_v47  ;;  %v8348_v47 = vpack.c.bf16 %v6287_v46, %v6286_v45  ;;  %v6310_v45 = vld [vmem:[%s8852_s4 + $0xe8] sm:$0xff]  ;;  %v6314_v46 = vld [vmem:[%s8852_s4 + $0x100] sm:$0xff] }
  0x37   : > { %7550 = vmatpush3.bf16.msk.msra.mxu1 %vm7998_vm2, %v7548_v49  ;;  %6899 = vmatprep.mubr.msk.f32.mxu1 %vm7941_vm3, %v7942_v8 }
  0x38   : > { %6879 = vmatmul.mubr.msk.f32.vlgmr.msra.gmra.mrb[2].mxu0 %vm264_vm4, %v1075_v50  ;;  %7551 = vmatprep.subr.bf16.mxu1 %v7939_v2 }
  0x39   : > { %7542 = vmatpush3.bf16.msk.msra.mxu0 %vm7998_vm2, %v7540_v51  ;;  %6885 = vmatprep.mubr.msk.f32.mxu0 %vm7941_vm3, %v7942_v8  ;;  %v8354_v51 = vstv %s253_s17 }
  0x3a   : > { %7559 = vmatprep.subr.bf16.mxu0 %v7939_v2 }
  0x3e   : > { %6900 = vmatmul.mubr.msk.f32.vlgmr.msra.gmra.mrb[4].mxu1 %vm264_vm4, %v1240_v43  ;;  %v6281_v43 = vld [vmem:[%s8852_s4 + $0x38] sm:$0xff] }
  0x3f   : > { %7554 = vmatpush3.bf16.msk.msra.mxu1 %vm7998_vm2, %v7552_v55  ;;  %6906 = vmatprep.mubr.msk.f32.mxu1 %vm7941_vm3, %v7942_v8  ;;  %v8339_v44 = vpack.c.bf16 %v6281_v43, %v6280_v42  ;;  %v8476_v42 = vpack.c.bf16 %v6302_v40, %v6301_v39  ;;  %v6309_v43 = vld [vmem:[%s8852_s4 + $0xe0] sm:$0xff] }
  0x40   : > { %6886 = vmatmul.mubr.msk.f32.vlgmr.msra.gmra.mrb[2].mxu0 %vm264_vm4, %v1157_v56  ;;  %7555 = vmatprep.subr.bf16.mxu1 %v7939_v2 }
  0x41   : > { %7562 = vmatpush3.bf16.msk.msra.mxu0 %vm7998_vm2, %v7560_v58  ;;  %6920 = vmatprep.mubr.msk.f32.mxu0 %vm7941_vm3, %v7942_v8  ;;  %v2537_v58 = vld [vmem:[%s8852_s4] sm:$0xff] }
  0x42   : > { %7563 = vmatprep.subr.bf16.mxu0 %v7939_v2  ;;  %v8377_v6 = vpack.c.bf16 %v2538_v59, %v2537_v58 }
  0x44   : > { %6921 = vmatmul.mubr.msk.f32.vlgmr.msra.gmra.mrb[4].mxu0 %vm264_vm4, %v1570_v61  ;;  %v6295_v61 = vld [vmem:[%s8852_s4 + $0x88] sm:$0xff] }
  0x45   : > { %7566 = vmatpush3.bf16.msk.msra.mxu0 %vm7998_vm2, %v7564_v62  ;;  %6927 = vmatprep.mubr.msk.f32.mxu0 %vm7941_vm3, %v7942_v8 }
  0x46   : > { %6907 = vmatmul.mubr.msk.f32.vlgmr.msra.gmra.mrb[4].mxu1 %vm264_vm4, %v1399_v63  ;;  %7567 = vmatprep.subr.bf16.mxu0 %v7939_v2 }
  0x47   : > { %7558 = vmatpush3.bf16.msk.msra.mxu1 %vm7998_vm2, %v7556_v1  ;;  %6913 = vmatprep.mubr.msk.f32.mxu1 %vm7941_vm3, %v7942_v8 }
  0x48   : > { %7575 = vmatprep.subr.bf16.mxu1 %v7939_v2 }
  0x4c   : > { %6928 = vmatmul.mubr.msk.f32.vlgmr.msra.gmra.mrb[4].mxu0 %vm264_vm4, %v1564_v57 }
  0x4d   : > { %7570 = vmatpush3.bf16.msk.msra.mxu0 %vm7998_vm2, %v7568_v10  ;;  %6934 = vmatprep.mubr.msk.f32.mxu0 %vm7941_vm3, %v7942_v8  ;;  %v8382_v10 = vpack.c.bf16 %v6295_v61, %v6294_v60 }
  0x4e   : > { %6914 = vmatmul.mubr.msk.f32.vlgmr.msra.gmra.mrb[4].mxu1 %vm264_vm4, %v1481_v11  ;;  %7571 = vmatprep.subr.bf16.mxu0 %v7939_v2 }
  0x4f   : > { %7578 = vmatpush3.bf16.msk.msra.mxu1 %vm7998_vm2, %v7576_v13  ;;  %6948 = vmatprep.mubr.msk.f32.mxu1 %vm7941_vm3, %v7942_v8 }
  0x50   : > { %7579 = vmatprep.subr.bf16.mxu1 %v7939_v2 }
  0x52   : > { %6949 = vmatmul.mubr.msk.f32.vlgmr.msra.gmra.mrb[6].mxu1 %vm264_vm4, %v1894_v16  ;;  %v6297_v16 = vld [vmem:[%s8852_s4 + $0x98] sm:$0xff] }
  0x53   : > { %7582 = vmatpush3.bf16.msk.msra.mxu1 %vm7998_vm2, %v7580_v17  ;;  %6955 = vmatprep.mubr.msk.f32.mxu1 %vm7941_vm3, %v7942_v8 }
  0x54   : > { %6935 = vmatmul.mubr.msk.f32.vlgmr.msra.gmra.mrb[4].mxu0 %vm264_vm4, %v1723_v18  ;;  %7583 = vmatprep.subr.bf16.mxu1 %v7939_v2  ;;  %v8397_v18 = vpack.c.bf16 %v2540_v14, %v2539_v7 }
  0x55   : > { %7574 = vmatpush3.bf16.msk.msra.mxu0 %vm7998_vm2, %v7572_v19  ;;  %6941 = vmatprep.mubr.msk.f32.mxu0 %vm7941_vm3, %v7942_v8  ;;  %v8400_v19 = vpack.c.bf16 %v6297_v16, %v6296_v15 }
  0x56   : > { %7591 = vmatprep.subr.bf16.mxu0 %v7939_v2 }
  0x5a   : > { %6956 = vmatmul.mubr.msk.f32.vlgmr.msra.gmra.mrb[6].mxu1 %vm264_vm4, %v1888_v12 }
  0x5b   : > { %7586 = vmatpush3.bf16.msk.msra.mxu1 %vm7998_vm2, %v7584_v24  ;;  %6962 = vmatprep.mubr.msk.f32.mxu1 %vm7941_vm3, %v7942_v8  ;;  %v6291_v24 = vld [vmem:[%s8852_s4 + $0x70] sm:$0xff] }
  0x5c   : > { %6942 = vmatmul.mubr.msk.f32.vlgmr.msra.gmra.mrb[4].mxu0 %vm264_vm4, %v1805_v25  ;;  %7587 = vmatprep.subr.bf16.mxu1 %v7939_v2  ;;  %v6292_v25 = vld [vmem:[%s8852_s4 + $0x78] sm:$0xff] }
  0x5d   : > { %7594 = vmatpush3.bf16.msk.msra.mxu0 %vm7998_vm2, %v7592_v27  ;;  %6976 = vmatprep.mubr.msk.f32.mxu0 %vm7941_vm3, %v7942_v8  ;;  %v6305_v27 = vld [vmem:[%s8852_s4 + $0xc8] sm:$0xff]  ;;  %v8435_v5 = vpack.c.bf16 %v6292_v25, %v6291_v24 }
  0x5e   : > { %7595 = vmatprep.subr.bf16.mxu0 %v7939_v2 }
  0x60   : > { %6977 = vmatmul.mubr.msk.f32.vlgmr.msra.gmra.mrb[6].mxu0 %vm264_vm4, %v2218_v29 }
  0x61   : > { %7598 = vmatpush3.bf16.msk.msra.mxu0 %vm7998_vm2, %v7596_v30  ;;  %6983 = vmatprep.mubr.msk.f32.mxu0 %vm7941_vm3, %v7942_v8  ;;  %v6299_v30 = vld [vmem:[%s8852_s4 + $0xa0] sm:$0xff] }
  0x62   : > { %6963 = vmatmul.mubr.msk.f32.vlgmr.msra.gmra.mrb[6].mxu1 %vm264_vm4, %v2047_v31  ;;  %7599 = vmatprep.subr.bf16.mxu0 %v7939_v2 }
  0x63   : > { %7590 = vmatpush3.bf16.msk.msra.mxu1 %vm7998_vm2, %v7588_v32  ;;  %6969 = vmatprep.mubr.msk.f32.mxu1 %vm7941_vm3, %v7942_v8 }
  0x64   : > { %7607 = vmatprep.subr.bf16.mxu1 %v7939_v2 }
  0x68   : > { %6984 = vmatmul.mubr.msk.f32.vlgmr.msra.gmra.mrb[6].mxu0 %vm264_vm4, %v2212_v26  ;;  %v6304_v26 = vld [vmem:[%s8852_s4 + $0xc0] sm:$0xff] }
  0x69   : > { %7602 = vmatpush3.bf16.msk.msra.mxu0 %vm7998_vm2, %v7600_v33  ;;  %6990 = vmatprep.mubr.msk.f32.mxu0 %vm7941_vm3, %v7942_v8  ;;  %v8442_v31 = vpack.c.bf16 %v6305_v27, %v6304_v26 }
  0x6a   : > { %6970 = vmatmul.mubr.msk.f32.vlgmr.msra.gmra.mrb[6].mxu1 %vm264_vm4, %v2129_v34  ;;  %7603 = vmatprep.subr.bf16.mxu0 %v7939_v2  ;;  %v6300_v34 = vld [vmem:[%s8852_s4 + $0xa8] sm:$0xff] }
  0x6b   : > { %7008 = vmatprep.mubr.msk.f32.mxu1 %vm7941_vm3, %v7942_v8  ;;  %7609 = vmatpush3.bf16.msra.mxu1 %v8320_v38 }
  0x6c   : > { %7610 = vmatprep.subr.bf16.mxu1 %v7939_v2 }
  0x6f   : > { %7612 = vmatpush3.bf16.msra.mxu1 %v8339_v44 }
  0x70   : > { %6991 = vmatmul.mubr.msk.f32.vlgmr.msra.gmra.mrb[6].mxu0 %vm264_vm4, %v2371_v9  ;;  %7613 = vmatprep.subr.bf16.mxu1 %v7939_v2  ;;  %v6307_v9 = vld [vmem:[%s8852_s4 + $0xd8] sm:$0xff] }
  0x71   : > { %7606 = vmatpush3.bf16.msk.msra.mxu0 %vm7998_vm2, %v7604_v36  ;;  %6997 = vmatprep.mubr.msk.f32.mxu0 %vm7941_vm3, %v7942_v8  ;;  %v8461_v21 = vpack.c.bf16 %v6307_v9, %v6306_v35 }
  0x72   : > { %7619 = vmatprep.subr.bf16.mxu0 %v7939_v2 }
  0x78   : > { %6998 = vmatmul.mubr.msk.f32.vlgmr.msra.gmra.mrb[6].mxu0 %vm264_vm4, %v2453_v37  ;;  %v8458_v37 = vpack.c.bf16 %v6300_v34, %v6299_v30 }
  0x79   : > { %7030 = vmatprep.mubr.msk.f32.mxu0 %vm7941_vm3, %v7942_v8  ;;  %7621 = vmatpush3.bf16.msra.mxu0 %v8328_v41 }
  0x7a   : > { %7622 = vmatprep.subr.bf16.mxu0 %v7939_v2 }
  0x7d   : > { %7624 = vmatpush3.bf16.msra.mxu0 %v8348_v47 }
  0x7e   : > { %7631 = vmatprep.subr.bf16.mxu0 %v7939_v2 }
  0xe9   : > { %v337_v48 = vpop.f32.mrb[0].mxu1 }
  0xea   : > { %v6810_v49 = vpop.f32.mrb[1].mxu1 }
  0xeb   : > { %v8496_v49 = vpack.c.bf16 %v6310_v45, %v6309_v43 }
  0xf7   : > { %v574_v50 = vpop.f32.mrb[0].mxu0 }
  0xf8   : > { %v7877_v52 = vadd.f32 %v574_v50, %v337_v48  ;;  %v6831_v53 = vpop.f32.mrb[1].mxu0  ;;  %v6315_v48 = vld [vmem:[%s8852_s4 + $0x108] sm:$0xff] }
  0xf9   : > { %v8498_v50 = vpack.c.bf16 %v6315_v48, %v6314_v46 }
  0xfa   : > { %v580_v55 = vmul.f32 %v7877_v52, %v8354_v51  ;;  %v6311_v52 = vld [vmem:[%s8852_s4 + $0xf0] sm:$0xff] }
  0xfc   : > { %v587_v56 = vadd.f32 %v8359_v54, %v580_v55  ;;  %v6312_v55 = vld [vmem:[%s8852_s4 + $0xf8] sm:$0xff] }
  0xfe   : > { %v588_v57 = vmax.f32 %v587_v56, 0.0  ;;  %v6316_v56 = vld [vmem:[%s8852_s4 + $0x110] sm:$0xff] }
 0x100   : > { %590 = vst.msk [vmem:[#allocation2] sm:$0x7f] %vm589_vm5, %v588_v57  ;;  %v6317_v57 = vld [vmem:[%s8852_s4 + $0x118] sm:$0xff] }
 0x105   : > { %v905_v62 = vpop.f32.mrb[2].mxu1 }
 0x106   : > { %v910_v63 = vmul.f32 %v905_v62, %v8354_v51  ;;  %v6859_v1 = vpop.f32.mrb[3].mxu1  ;;  %v8518_v62 = vpack.c.bf16 %v6312_v55, %v6311_v52 }
 0x107   : > { %v2536_v4 = vld [vmem:[#allocation2] sm:$0x7f] }
 0x108   : > { %v911_v11 = vadd.f32 %v8359_v54, %v910_v63  ;;  %v2547_v12 = vrot.slane %v2536_v4, 1  ;;  %v2698_v13 = vrot.slane %v2536_v4, 2  ;;  %v8520_v63 = vpack.c.bf16 %v6317_v57, %v6316_v56 }
 0x10a   : > { %v912_v17 = vmax.f32 %v911_v11, 0.0  ;;  %7009 = vmatmul.mubr.msk.f32.vlgmr.msra.gmra.mrb[8].mxu1 %vm2548_vm6, %v2547_v12  ;;  %7031 = vmatmul.mubr.msk.f32.vlgmr.msra.gmra.mrb[8].mxu0 %vm2548_vm6, %v2698_v13 }
 0x10b   : > { %7615 = vmatpush3.bf16.msra.mxu1 %v8377_v6  ;;  %7633 = vmatpush3.bf16.msra.mxu0 %v8382_v10 }
 0x10c   : > { %914 = vst.msk [vmem:[#allocation2 + $0x8] sm:$0x7f] %vm589_vm5, %v912_v17  ;;  %7616 = vmatprep.subr.bf16.mxu1 %v7939_v2  ;;  %7019 = vmatprep.mubr.msk.f32.mxu1 %vm7941_vm3, %v7942_v8 }
 0x10d   : > { %7634 = vmatprep.subr.bf16.mxu0 %v7939_v2  ;;  %7052 = vmatprep.mubr.msk.f32.mxu0 %vm7941_vm3, %v7942_v8 }
 0x10f   : > { %7618 = vmatpush3.bf16.msra.mxu1 %v8397_v18  ;;  %7636 = vmatpush3.bf16.msra.mxu0 %v8400_v19 }
 0x110   : > { %7625 = vmatprep.subr.bf16.mxu1 %v7939_v2  ;;  %7643 = vmatprep.subr.bf16.mxu0 %v7939_v2 }
 0x112   : > { %7020 = vmatmul.mubr.msk.f32.vlgmr.msra.gmra.mrb[10].mxu1 %vm2548_vm6, %v2536_v4 }
 0x113   : > { %7627 = vmatpush3.bf16.msra.mxu1 %v8416_v23  ;;  %v1229_v28 = vpop.f32.mrb[2].mxu0  ;;  %v2772_v29 = vld [vmem:[#allocation2 + $0x8] sm:$0x7f]  ;;  %7041 = vmatprep.mubr.msk.f32.mxu1 %vm7941_vm3, %v7942_v8 }
 0x114   : > { %v1234_v32 = vmul.f32 %v1229_v28, %v8354_v51  ;;  %v6887_v0 = vpop.f32.mrb[3].mxu0  ;;  %7628 = vmatprep.subr.bf16.mxu1 %v7939_v2  ;;  %v2857_v33 = vrot.slane %v2772_v29, 1  ;;  %v2936_v53 = vrot.slane %v2772_v29, 2  ;;  %v3263_v12 = vld [vmem:[#allocation2 + $0x8] sm:$0x7f] }
 0x115   : > { %v3273_v14 = vrot.slane %v3263_v12, 1  ;;  %v3422_v22 = vrot.slane %v3263_v12, 2 }
 0x116   : > { %v1235_v36 = vadd.f32 %v8359_v54, %v1234_v32  ;;  %7053 = vmatmul.mubr.msk.f32.vlgmr.msra.gmra.mrb[10].mxu0 %vm2548_vm6, %v2857_v33 }
 0x117   : > { %7630 = vmatpush3.bf16.msra.mxu1 %v8435_v5  ;;  %7645 = vmatpush3.bf16.msra.mxu0 %v8442_v31 }
 0x118   : > { %v1236_v3 = vmax.f32 %v1235_v36, 0.0  ;;  %7637 = vmatprep.subr.bf16.mxu1 %v7939_v2  ;;  %7646 = vmatprep.subr.bf16.mxu0 %v7939_v2 }
 0x119   : > { %7074 = vmatprep.mubr.msk.f32.mxu0 %vm7941_vm3, %v7942_v8 }
 0x11a   : > { %1238 = vst.msk [vmem:[#allocation2 + $0x10] sm:$0x7f] %vm589_vm5, %v1236_v3  ;;  %7042 = vmatmul.mubr.msk.f32.vlgmr.msra.gmra.mrb[12].mxu1 %vm2548_vm6, %v2772_v29 }
 0x11b   : > { %7639 = vmatpush3.bf16.msra.mxu1 %v8458_v37  ;;  %7648 = vmatpush3.bf16.msra.mxu0 %v8461_v21 }
 0x11c   : > { %7640 = vmatprep.subr.bf16.mxu1 %v7939_v2  ;;  %7063 = vmatprep.mubr.msk.f32.mxu1 %vm7941_vm3, %v7942_v8 }
 0x11d   : > { %7655 = vmatprep.subr.bf16.mxu0 %v7939_v2 }
 0x11f   : > { %7642 = vmatpush3.bf16.msra.mxu1 %v8476_v42 }
 0x120   : > { %7649 = vmatprep.subr.bf16.mxu1 %v7939_v2 }
 0x121   : > { %v1553_v58 = vpop.f32.mrb[4].mxu1  ;;  %v3010_v59 = vld [vmem:[#allocation2 + $0x10] sm:$0x7f] }
 0x122   : > { %7064 = vmatmul.mubr.msk.f32.vlgmr.msra.gmra.mrb[14].mxu1 %vm2548_vm6, %v2936_v53  ;;  %v1558_v60 = vmul.f32 %v1553_v58, %v8354_v51  ;;  %7075 = vmatmul.mubr.msk.f32.vlgmr.msra.gmra.mrb[12].mxu0 %vm2548_vm6, %v3010_v59  ;;  %v6915_v61 = vpop.f32.mrb[5].mxu1  ;;  %v3095_v7 = vrot.slane %v3010_v59, 1  ;;  %v3174_v11 = vrot.slane %v3010_v59, 2  ;;  %v3496_v24 = vld [vmem:[#allocation2 + $0x10] sm:$0x7f] }
 0x123   : > { %7651 = vmatpush3.bf16.msra.mxu1 %v8496_v49  ;;  %7657 = vmatpush3.bf16.msra.mxu0 %v8498_v50  ;;  %v3579_v28 = vrot.slane %v3496_v24, 1  ;;  %v3657_v29 = vrot.slane %v3496_v24, 2  ;;  %v3973_v36 = vld [vmem:[#allocation2 + $0x10] sm:$0x7f]  ;;  %v6455_v61 = vld [vmem:[%s8852_s4 + $0x40] sm:$0xff] }
 0x124   : > { %v1559_v1 = vadd.f32 %v8359_v54, %v1558_v60  ;;  %7652 = vmatprep.subr.bf16.mxu1 %v7939_v2  ;;  %7658 = vmatprep.subr.bf16.mxu0 %v7939_v2  ;;  %v3983_v40 = vrot.slane %v3973_v36, 1 }
 0x125   : > { %7085 = vmatprep.mubr.msk.f32.mxu1 %vm7941_vm3, %v7942_v8  ;;  %7096 = vmatprep.mubr.msk.f32.mxu0 %vm7941_vm3, %v7942_v8 }
 0x126   : > { %v1560_v4 = vmax.f32 %v1559_v1, 0.0  ;;  %v6456_v1 = vld [vmem:[%s8852_s4 + $0x48] sm:$0xff] }
 0x127   : > { %7654 = vmatpush3.bf16.msra.mxu1 %v8518_v62  ;;  %7660 = vmatpush3.bf16.msra.mxu0 %v8520_v63 }
 0x128   : > { %1562 = vst.msk [vmem:[#allocation2 + $0x18] sm:$0x7f] %vm589_vm5, %v1560_v4  ;;  %7661 = vmatprep.subr.bf16.mxu1 %v7939_v2  ;;  %7667 = vmatprep.subr.bf16.mxu0 %v7939_v2 }
 0x12a   : > { %7086 = vmatmul.mubr.msk.f32.vlgmr.msra.gmra.mrb[16].mxu1 %vm2548_vm6, %v3095_v7  ;;  %7097 = vmatmul.mubr.msk.f32.vlgmr.msra.gmra.mrb[14].mxu0 %vm2548_vm6, %v3174_v11 }
 0x12b   : > { %7663 = vmatpush3.bf16.msra.mxu1 %v8320_v38  ;;  %7669 = vmatpush3.bf16.msra.mxu0 %v8377_v6 }
 0x12c   : > { %7664 = vmatprep.subr.bf16.mxu1 %v7939_v2  ;;  %7670 = vmatprep.subr.bf16.mxu0 %v7939_v2 }
 0x12d   : > { %7107 = vmatprep.mubr.msk.f32.mxu1 %vm7941_vm3, %v7942_v8  ;;  %7118 = vmatprep.mubr.msk.f32.mxu0 %vm7941_vm3, %v7942_v8 }
 0x12f   : > { %7666 = vmatpush3.bf16.msra.mxu1 %v8339_v44  ;;  %7672 = vmatpush3.bf16.msra.mxu0 %v8397_v18  ;;  %v1877_v13 = vpop.f32.mrb[4].mxu0  ;;  %v3731_v0 = vld [vmem:[#allocation2 + $0x18] sm:$0x7f] }
 0x130   : > { %7673 = vmatprep.subr.bf16.mxu1 %v7939_v2  ;;  %7679 = vmatprep.subr.bf16.mxu0 %v7939_v2  ;;  %v1882_v15 = vmul.f32 %v1877_v13, %v8354_v51  ;;  %v6943_v16 = vpop.f32.mrb[5].mxu0  ;;  %v3814_v33 = vrot.slane %v3731_v0, 1  ;;  %v3892_v39 = vrot.slane %v3731_v0, 2  ;;  %v4206_v43 = vld [vmem:[#allocation2 + $0x18] sm:$0x7f] }
 0x131   : > { %v4289_v45 = vrot.slane %v4206_v43, 1  ;;  %v4367_v46 = vrot.slane %v4206_v43, 2  ;;  %v4683_v55 = vld [vmem:[#allocation2 + $0x18] sm:$0x7f] }
 0x132   : > { %7108 = vmatmul.mubr.msk.f32.vlgmr.msra.gmra.mrb[18].mxu1 %vm2548_vm6, %v3273_v14  ;;  %7119 = vmatmul.mubr.msk.f32.vlgmr.msra.gmra.mrb[16].mxu0 %vm2548_vm6, %v3263_v12  ;;  %v1883_v17 = vadd.f32 %v8359_v54, %v1882_v15  ;;  %v4693_v56 = vrot.slane %v4683_v55, 1  ;;  %v4842_v57 = vrot.slane %v4683_v55, 2  ;;  %v6457_v12 = vld [vmem:[%s8852_s4 + $0x50] sm:$0xff]  ;;  %v6458_v13 = vld [vmem:[%s8852_s4 + $0x58] sm:$0xff] }
 0x133   : > { %7675 = vmatpush3.bf16.msra.mxu1 %v8328_v41  ;;  %7681 = vmatpush3.bf16.msra.mxu0 %v8416_v23 }
 0x134   : > { %7676 = vmatprep.subr.bf16.mxu1 %v7939_v2  ;;  %7682 = vmatprep.subr.bf16.mxu0 %v7939_v2  ;;  %v1884_v20 = vmax.f32 %v1883_v17, 0.0 }
 0x135   : > { %7129 = vmatprep.mubr.msk.f32.mxu1 %vm7941_vm3, %v7942_v8  ;;  %7140 = vmatprep.mubr.msk.f32.mxu0 %vm7941_vm3, %v7942_v8 }
 0x136   : > { %1886 = vst.msk [vmem:[#allocation2 + $0x20] sm:$0x7f] %vm589_vm5, %v1884_v20 }
 0x137   : > { %7678 = vmatpush3.bf16.msra.mxu1 %v8348_v47  ;;  %7684 = vmatpush3.bf16.msra.mxu0 %v8435_v5 }
 0x138   : > { %7685 = vmatprep.subr.bf16.mxu1 %v7939_v2  ;;  %7691 = vmatprep.subr.bf16.mxu0 %v7939_v2 }
 0x13a   : > { %7130 = vmatmul.mubr.msk.f32.vlgmr.msra.gmra.mrb[20].mxu1 %vm2548_vm6, %v3422_v22  ;;  %7141 = vmatmul.mubr.msk.f32.vlgmr.msra.gmra.mrb[18].mxu0 %vm2548_vm6, %v3496_v24 }
 0x13b   : > { %7687 = vmatpush3.bf16.msra.mxu1 %v8382_v10  ;;  %7693 = vmatpush3.bf16.msra.mxu0 %v8458_v37 }
 0x13c   : > { %7688 = vmatprep.subr.bf16.mxu1 %v7939_v2  ;;  %7694 = vmatprep.subr.bf16.mxu0 %v7939_v2 }
 0x13d   : > { %7151 = vmatprep.mubr.msk.f32.mxu1 %vm7941_vm3, %v7942_v8  ;;  %7162 = vmatprep.mubr.msk.f32.mxu0 %vm7941_vm3, %v7942_v8  ;;  %v2201_v25 = vpop.f32.mrb[6].mxu1  ;;  %v4441_v48 = vld [vmem:[#allocation2 + $0x20] sm:$0x7f] }
 0x13e   : > { %v2206_v26 = vmul.f32 %v2201_v25, %v8354_v51  ;;  %v6971_v27 = vpop.f32.mrb[7].mxu1  ;;  %v4524_v52 = vrot.slane %v4441_v48, 1  ;;  %v4602_v53 = vrot.slane %v4441_v48, 2  ;;  %v5393_v4 = vld [vmem:[#allocation2 + $0x20] sm:$0x7f] }
 0x13f   : > { %7690 = vmatpush3.bf16.msra.mxu1 %v8400_v19  ;;  %7696 = vmatpush3.bf16.msra.mxu0 %v8476_v42  ;;  %v5403_v11 = vrot.slane %v5393_v4, 1  ;;  %v5552_v14 = vrot.slane %v5393_v4, 2 }
 0x140   : > { %7697 = vmatprep.subr.bf16.mxu1 %v7939_v2  ;;  %7703 = vmatprep.subr.bf16.mxu0 %v7939_v2  ;;  %v2207_v30 = vadd.f32 %v8359_v54, %v2206_v26 }
 0x142   : > { %7152 = vmatmul.mubr.msk.f32.vlgmr.msra.gmra.mrb[22].mxu1 %vm2548_vm6, %v3579_v28  ;;  %7163 = vmatmul.mubr.msk.f32.vlgmr.msra.gmra.mrb[20].mxu0 %vm2548_vm6, %v3657_v29  ;;  %v2208_v32 = vmax.f32 %v2207_v30, 0.0 }
 0x143   : > { %7699 = vmatpush3.bf16.msra.mxu1 %v8442_v31  ;;  %7705 = vmatpush3.bf16.msra.mxu0 %v8496_v49 }
 0x144   : > { %7700 = vmatprep.subr.bf16.mxu1 %v7939_v2  ;;  %7706 = vmatprep.subr.bf16.mxu0 %v7939_v2  ;;  %2210 = vst.msk [vmem:[#allocation2 + $0x28] sm:$0x7f] %vm589_vm5, %v2208_v32 }
 0x145   : > { %7173 = vmatprep.mubr.msk.f32.mxu1 %vm7941_vm3, %v7942_v8  ;;  %7184 = vmatprep.mubr.msk.f32.mxu0 %vm7941_vm3, %v7942_v8 }
 0x147   : > { %7702 = vmatpush3.bf16.msra.mxu1 %v8461_v21  ;;  %7708 = vmatpush3.bf16.msra.mxu0 %v8518_v62 }
 0x148   : > { %7709 = vmatprep.subr.bf16.mxu1 %v7939_v2  ;;  %7715 = vmatprep.subr.bf16.mxu0 %v7939_v2 }
 0x14a   : > { %7174 = vmatmul.mubr.msk.f32.vlgmr.msra.gmra.mrb[24].mxu1 %vm2548_vm6, %v3731_v0  ;;  %7185 = vmatmul.mubr.msk.f32.vlgmr.msra.gmra.mrb[22].mxu0 %vm2548_vm6, %v3814_v33 }
 0x14b   : > { %7711 = vmatpush3.bf16.msra.mxu1 %v8498_v50  ;;  %7717 = vmatpush3.bf16.msra.mxu0 %v8320_v38  ;;  %v2525_v34 = vpop.f32.mrb[6].mxu0  ;;  %v5151_v59 = vld [vmem:[#allocation2 + $0x28] sm:$0x7f] }
 0x14c   : > { %7712 = vmatprep.subr.bf16.mxu1 %v7939_v2  ;;  %7718 = vmatprep.subr.bf16.mxu0 %v7939_v2  ;;  %v2530_v35 = vmul.f32 %v2525_v34, %v8354_v51  ;;  %v6999_v9 = vpop.f32.mrb[7].mxu0  ;;  %v5234_v60 = vrot.slane %v5151_v59, 1  ;;  %v5312_v7 = vrot.slane %v5151_v59, 2  ;;  %v8809_v34 = vld [vmem:[%s8853_s5] ss:$0 sm:$0xff] }
 0x14d   : > { %7195 = vmatprep.mubr.msk.f32.mxu1 %vm7941_vm3, %v7942_v8  ;;  %7206 = vmatprep.mubr.msk.f32.mxu0 %vm7941_vm3, %v7942_v8 }
 0x14e   : > { %v2531_v3 = vadd.f32 %v8359_v54, %v2530_v35  ;;  %v4132_v54 = vrot.slane %v3973_v36, 2 }
 0x14f   : > { %7714 = vmatpush3.bf16.msra.mxu1 %v8520_v63  ;;  %7720 = vmatpush3.bf16.msra.mxu0 %v8339_v44 }
 0x150   : > { %7721 = vmatprep.subr.bf16.mxu1 %v7939_v2  ;;  %7727 = vmatprep.subr.bf16.mxu0 %v7939_v2  ;;  %v2532_v51 = vmax.f32 %v2531_v3, 0.0 }
 0x152   : > { %7196 = vmatmul.mubr.msk.f32.vlgmr.msra.gmra.mrb[26].mxu1 %vm2548_vm6, %v3892_v39  ;;  %7207 = vmatmul.mubr.msk.f32.vlgmr.msra.gmra.mrb[24].mxu0 %vm2548_vm6, %v3983_v40  ;;  %2534 = vst.msk [vmem:[#allocation2 + $0x30] sm:$0x7f] %vm589_vm5, %v2532_v51  ;;  %v3260_v39 = vld [vmem:[%s8814_s19] sm:$0x7] }
 0x153   : > { %7723 = vmatpush3.bf16.msra.mxu1 %v8377_v6  ;;  %7729 = vmatpush3.bf16.msra.mxu0 %v8328_v41 }
 0x154   : > { %7724 = vmatprep.subr.bf16.mxu1 %v7939_v2  ;;  %7730 = vmatprep.subr.bf16.mxu0 %v7939_v2 }
 0x155   : > { %7217 = vmatprep.mubr.msk.f32.mxu1 %vm7941_vm3, %v7942_v8  ;;  %7228 = vmatprep.mubr.msk.f32.mxu0 %vm7941_vm3, %v7942_v8 }
 0x157   : > { %7726 = vmatpush3.bf16.msra.mxu1 %v8397_v18  ;;  %7732 = vmatpush3.bf16.msra.mxu0 %v8348_v47 }
 0x158   : > { %7733 = vmatprep.subr.bf16.mxu1 %v7939_v2  ;;  %7739 = vmatprep.subr.bf16.mxu0 %v7939_v2 }
 0x15a   : > { %7218 = vmatmul.mubr.msk.f32.vlgmr.msra.gmra.mrb[28].mxu1 %vm2548_vm6, %v3973_v36  ;;  %7229 = vmatmul.mubr.msk.f32.vlgmr.msra.gmra.mrb[26].mxu0 %vm2548_vm6, %v4132_v54 }
 0x15b   : > { %7735 = vmatpush3.bf16.msra.mxu1 %v8416_v23  ;;  %7741 = vmatpush3.bf16.msra.mxu0 %v8382_v10 }
 0x15c   : > { %7736 = vmatprep.subr.bf16.mxu1 %v7939_v2  ;;  %7742 = vmatprep.subr.bf16.mxu0 %v7939_v2 }
 0x15d   : > { %7239 = vmatprep.mubr.msk.f32.mxu1 %vm7941_vm3, %v7942_v8  ;;  %7250 = vmatprep.mubr.msk.f32.mxu0 %vm7941_vm3, %v7942_v8 }
 0x15f   : > { %7738 = vmatpush3.bf16.msra.mxu1 %v8435_v5  ;;  %7744 = vmatpush3.bf16.msra.mxu0 %v8400_v19 }
 0x160   : > { %7745 = vmatprep.subr.bf16.mxu1 %v7939_v2  ;;  %7751 = vmatprep.subr.bf16.mxu0 %v7939_v2 }
 0x162   : > { %7240 = vmatmul.mubr.msk.f32.vlgmr.msra.gmra.mrb[30].mxu1 %vm2548_vm6, %v4206_v43  ;;  %7251 = vmatmul.mubr.msk.f32.vlgmr.msra.gmra.mrb[28].mxu0 %vm2548_vm6, %v4289_v45 }
 0x163   : > { %7747 = vmatpush3.bf16.msra.mxu1 %v8458_v37  ;;  %7753 = vmatpush3.bf16.msra.mxu0 %v8442_v31 }
 0x164   : > { %7748 = vmatprep.subr.bf16.mxu1 %v7939_v2  ;;  %7754 = vmatprep.subr.bf16.mxu0 %v7939_v2 }
 0x165   : > { %7261 = vmatprep.mubr.msk.f32.mxu1 %vm7941_vm3, %v7942_v8  ;;  %7272 = vmatprep.mubr.msk.f32.mxu0 %vm7941_vm3, %v7942_v8 }
 0x167   : > { %7750 = vmatpush3.bf16.msra.mxu1 %v8476_v42  ;;  %7756 = vmatpush3.bf16.msra.mxu0 %v8461_v21 }
 0x168   : > { %7757 = vmatprep.subr.bf16.mxu1 %v7939_v2  ;;  %7763 = vmatprep.subr.bf16.mxu0 %v7939_v2 }
 0x16a   : > { %7262 = vmatmul.mubr.msk.f32.vlgmr.msra.gmra.mrb[32].mxu1 %vm2548_vm6, %v4367_v46  ;;  %7273 = vmatmul.mubr.msk.f32.vlgmr.msra.gmra.mrb[30].mxu0 %vm2548_vm6, %v4441_v48 }
 0x16b   : > { %7759 = vmatpush3.bf16.msra.mxu1 %v8496_v49  ;;  %7765 = vmatpush3.bf16.msra.mxu0 %v8498_v50 }
 0x16c   : > { %7760 = vmatprep.subr.bf16.mxu1 %v7939_v2  ;;  %7766 = vmatprep.subr.bf16.mxu0 %v7939_v2 }
 0x16d   : > { %7283 = vmatprep.mubr.msk.f32.mxu1 %vm7941_vm3, %v7942_v8  ;;  %7294 = vmatprep.mubr.msk.f32.mxu0 %vm7941_vm3, %v7942_v8 }
 0x16f   : > { %7762 = vmatpush3.bf16.msra.mxu1 %v8518_v62  ;;  %7768 = vmatpush3.bf16.msra.mxu0 %v8520_v63 }
 0x170   : > { %7769 = vmatprep.subr.bf16.mxu1 %v7939_v2  ;;  %7775 = vmatprep.subr.bf16.mxu0 %v7939_v2 }
 0x172   : > { %7284 = vmatmul.mubr.msk.f32.vlgmr.msra.gmra.mrb[34].mxu1 %vm2548_vm6, %v4524_v52  ;;  %7295 = vmatmul.mubr.msk.f32.vlgmr.msra.gmra.mrb[32].mxu0 %vm2548_vm6, %v4602_v53 }
 0x173   : > { %7771 = vmatpush3.bf16.msra.mxu1 %v8320_v38  ;;  %7777 = vmatpush3.bf16.msra.mxu0 %v8377_v6 }
 0x174   : > { %7772 = vmatprep.subr.bf16.mxu1 %v7939_v2  ;;  %7778 = vmatprep.subr.bf16.mxu0 %v7939_v2 }
 0x175   : > { %7305 = vmatprep.mubr.msk.f32.mxu1 %vm7941_vm3, %v7942_v8  ;;  %7316 = vmatprep.mubr.msk.f32.mxu0 %vm7941_vm3, %v7942_v8 }
 0x177   : > { %7774 = vmatpush3.bf16.msra.mxu1 %v8339_v44  ;;  %7780 = vmatpush3.bf16.msra.mxu0 %v8397_v18 }
 0x178   : > { %7781 = vmatprep.subr.bf16.mxu1 %v7939_v2  ;;  %7787 = vmatprep.subr.bf16.mxu0 %v7939_v2 }
 0x17a   : > { %7306 = vmatmul.mubr.msk.f32.vlgmr.msra.gmra.mrb[36].mxu1 %vm2548_vm6, %v4693_v56  ;;  %7317 = vmatmul.mubr.msk.f32.vlgmr.msra.gmra.mrb[34].mxu0 %vm2548_vm6, %v4683_v55 }
 0x17b   : > { %7783 = vmatpush3.bf16.msra.mxu1 %v8328_v41  ;;  %7789 = vmatpush3.bf16.msra.mxu0 %v8416_v23  ;;  %v4916_v41 = vld [vmem:[#allocation2 + $0x20] sm:$0x7f] }
 0x17c   : > { %7784 = vmatprep.subr.bf16.mxu1 %v7939_v2  ;;  %7790 = vmatprep.subr.bf16.mxu0 %v7939_v2  ;;  %v5077_v58 = vrot.slane %v4916_v41, 2 }
 0x17d   : > { %7327 = vmatprep.mubr.msk.f32.mxu1 %vm7941_vm3, %v7942_v8  ;;  %7338 = vmatprep.mubr.msk.f32.mxu0 %vm7941_vm3, %v7942_v8 }
 0x17f   : > { %7786 = vmatpush3.bf16.msra.mxu1 %v8348_v47  ;;  %7792 = vmatpush3.bf16.msra.mxu0 %v8435_v5  ;;  %v4999_v47 = vrot.slane %v4916_v41, 1 }
 0x180   : > { %7793 = vmatprep.subr.bf16.mxu1 %v7939_v2  ;;  %7799 = vmatprep.subr.bf16.mxu0 %v7939_v2 }
 0x182   : > { %7328 = vmatmul.mubr.msk.f32.vlgmr.msra.gmra.mrb[38].mxu1 %vm2548_vm6, %v4842_v57  ;;  %7339 = vmatmul.mubr.msk.f32.vlgmr.msra.gmra.mrb[36].mxu0 %vm2548_vm6, %v4916_v41 }
 0x183   : > { %7795 = vmatpush3.bf16.msra.mxu1 %v8382_v10  ;;  %7801 = vmatpush3.bf16.msra.mxu0 %v8458_v37 }
 0x184   : > { %7796 = vmatprep.subr.bf16.mxu1 %v7939_v2  ;;  %7802 = vmatprep.subr.bf16.mxu0 %v7939_v2 }
 0x185   : > { %7349 = vmatprep.mubr.msk.f32.mxu1 %vm7941_vm3, %v7942_v8  ;;  %7360 = vmatprep.mubr.msk.f32.mxu0 %vm7941_vm3, %v7942_v8 }
 0x187   : > { %7798 = vmatpush3.bf16.msra.mxu1 %v8400_v19  ;;  %7804 = vmatpush3.bf16.msra.mxu0 %v8476_v42 }
 0x188   : > { %7805 = vmatprep.subr.bf16.mxu1 %v7939_v2  ;;  %7811 = vmatprep.subr.bf16.mxu0 %v7939_v2 }
 0x18a   : > { %7350 = vmatmul.mubr.msk.f32.vlgmr.msra.gmra.mrb[40].mxu1 %vm2548_vm6, %v4999_v47  ;;  %7361 = vmatmul.mubr.msk.f32.vlgmr.msra.gmra.mrb[38].mxu0 %vm2548_vm6, %v5077_v58 }
 0x18b   : > { %7807 = vmatpush3.bf16.msra.mxu1 %v8442_v31  ;;  %7813 = vmatpush3.bf16.msra.mxu0 %v8496_v49 }
 0x18c   : > { %7808 = vmatprep.subr.bf16.mxu1 %v7939_v2  ;;  %7814 = vmatprep.subr.bf16.mxu0 %v7939_v2 }
 0x18d   : > { %7371 = vmatprep.mubr.msk.f32.mxu1 %vm7941_vm3, %v7942_v8  ;;  %7382 = vmatprep.mubr.msk.f32.mxu0 %vm7941_vm3, %v7942_v8 }
 0x18f   : > { %7810 = vmatpush3.bf16.msra.mxu1 %v8461_v21  ;;  %7816 = vmatpush3.bf16.msra.mxu0 %v8518_v62 }
 0x190   : > { %7817 = vmatprep.subr.bf16.mxu1 %v7939_v2  ;;  %7823 = vmatprep.subr.bf16.mxu0 %v7939_v2 }
 0x192   : > { %7372 = vmatmul.mubr.msk.f32.vlgmr.msra.gmra.mrb[42].mxu1 %vm2548_vm6, %v5151_v59  ;;  %7383 = vmatmul.mubr.msk.f32.vlgmr.msra.gmra.mrb[40].mxu0 %vm2548_vm6, %v5234_v60 }
 0x193   : > { %7819 = vmatpush3.bf16.msra.mxu1 %v8498_v50  ;;  %7825 = vmatpush3.bf16.msra.mxu0 %v8320_v38  ;;  %v7836_v38 = vpack.c.bf16 %v6456_v1, %v6455_v61 }
 0x194   : > { %7820 = vmatprep.subr.bf16.mxu1 %v7939_v2  ;;  %7826 = vmatprep.subr.bf16.mxu0 %v7939_v2 }
 0x195   : > { %7393 = vmatprep.mubr.msk.f32.mxu1 %vm7941_vm3, %v7942_v8  ;;  %7404 = vmatprep.mubr.msk.f32.mxu0 %vm7941_vm3, %v7942_v8 }
 0x197   : > { %7822 = vmatpush3.bf16.msra.mxu1 %v8520_v63  ;;  %7828 = vmatpush3.bf16.msra.mxu0 %v8339_v44  ;;  %v7839_v44 = vpack.c.bf16 %v6458_v13, %v6457_v12 }
 0x198   : > { %7829 = vmatprep.subr.bf16.mxu1 %v7939_v2  ;;  %7835 = vmatprep.subr.bf16.mxu0 %v7939_v2 }
 0x19a   : > { %7394 = vmatmul.mubr.msk.f32.vlgmr.msra.gmra.mrb[44].mxu1 %vm2548_vm6, %v5312_v7  ;;  %7405 = vmatmul.mubr.msk.f32.vlgmr.msra.gmra.mrb[42].mxu0 %vm2548_vm6, %v5403_v11 }
 0x19b   : > { %7831 = vmatpush3.bf16.msra.mxu1 %v8377_v6  ;;  %7837 = vmatpush3.bf16.msra.mxu0 %v7836_v38  ;;  %v5626_v6 = vld [vmem:[#allocation2 + $0x28] sm:$0x7f] }
 0x19c   : > { %7832 = vmatprep.subr.bf16.mxu1 %v7939_v2  ;;  %7838 = vmatprep.subr.bf16.mxu0 %v7939_v2 }
 0x19d   : > { %7415 = vmatprep.mubr.msk.f32.mxu1 %vm7941_vm3, %v7942_v8  ;;  %7426 = vmatprep.mubr.msk.f32.mxu0 %vm7941_vm3, %v7942_v8 }
 0x19f   : > { %7834 = vmatpush3.bf16.msra.mxu1 %v8397_v18  ;;  %7840 = vmatpush3.bf16.msra.mxu0 %v7839_v44  ;;  %v5709_v18 = vrot.slane %v5626_v6, 1 }
 0x1a0   : > { %7841 = vmatprep.subr.bf16.mxu1 %v7939_v2  ;;  %7847 = vmatprep.subr.bf16.mxu0 %v7939_v2 }
 0x1a2   : > { %7416 = vmatmul.mubr.msk.f32.vlgmr.msra.gmra.mrb[46].mxu1 %vm2548_vm6, %v5393_v4  ;;  %7427 = vmatmul.mubr.msk.f32.vlgmr.msra.gmra.mrb[44].mxu0 %vm2548_vm6, %v5552_v14 }
 0x1a3   : > { %7843 = vmatpush3.bf16.msra.mxu1 %v8416_v23  ;;  %7849 = vmatpush3.bf16.msra.mxu0 %v8382_v10  ;;  %v5787_v10 = vrot.slane %v5626_v6, 2 }
 0x1a4   : > { %7844 = vmatprep.subr.bf16.mxu1 %v7939_v2  ;;  %7850 = vmatprep.subr.bf16.mxu0 %v7939_v2 }
 0x1a5   : > { %7437 = vmatprep.mubr.msk.f32.mxu1 %vm7941_vm3, %v7942_v8  ;;  %7448 = vmatprep.mubr.msk.f32.mxu0 %vm7941_vm3, %v7942_v8 }
 0x1a7   : > { %7846 = vmatpush3.bf16.msra.mxu1 %v8435_v5  ;;  %7852 = vmatpush3.bf16.msra.mxu0 %v8400_v19  ;;  %v5861_v19 = vld [vmem:[#allocation2 + $0x30] sm:$0x7f] }
 0x1a8   : > { %7853 = vmatprep.subr.bf16.mxu1 %v7939_v2  ;;  %7859 = vmatprep.subr.bf16.mxu0 %v7939_v2  ;;  %v5944_v23 = vrot.slane %v5861_v19, 1  ;;  %v6022_v5 = vrot.slane %v5861_v19, 2 }
 0x1aa   : > { %7438 = vmatmul.mubr.msk.f32.vlgmr.msra.gmra.mrb[48].mxu1 %vm2548_vm6, %v5626_v6  ;;  %7449 = vmatmul.mubr.msk.f32.vlgmr.msra.gmra.mrb[46].mxu0 %vm2548_vm6, %v5709_v18 }
 0x1ab   : > { %7855 = vmatpush3.bf16.msra.mxu1 %v8458_v37  ;;  %7861 = vmatpush3.bf16.msra.mxu0 %v8442_v31 }
 0x1ac   : > { %7856 = vmatprep.subr.bf16.mxu1 %v7939_v2  ;;  %7862 = vmatprep.subr.bf16.mxu0 %v7939_v2 }
 0x1ad   : > { %7459 = vmatprep.mubr.msk.f32.mxu1 %vm7941_vm3, %v7942_v8  ;;  %7470 = vmatprep.mubr.msk.f32.mxu0 %vm7941_vm3, %v7942_v8 }
 0x1af   : > { %7858 = vmatpush3.bf16.msra.mxu1 %v8476_v42  ;;  %7864 = vmatpush3.bf16.msra.mxu0 %v8461_v21 }
 0x1b0   : > { %7865 = vmatprep.subr.bf16.mxu1 %v7939_v2  ;;  %7871 = vmatprep.subr.bf16.mxu0 %v7939_v2 }
 0x1b2   : > { %7460 = vmatmul.mubr.msk.f32.vlgmr.msra.gmra.mrb[50].mxu1 %vm2548_vm6, %v5787_v10  ;;  %7471 = vmatmul.mubr.msk.f32.vlgmr.msra.gmra.mrb[48].mxu0 %vm2548_vm6, %v5861_v19 }
 0x1b3   : > { %7867 = vmatpush3.bf16.msra.mxu1 %v8496_v49  ;;  %7873 = vmatpush3.bf16.msra.mxu0 %v8498_v50 }
 0x1b4   : > { %7868 = vmatprep.subr.bf16.mxu1 %v7939_v2  ;;  %7874 = vmatprep.subr.bf16.mxu0 %v7939_v2 }
 0x1b5   : > { %7481 = vmatprep.mubr.msk.f32.mxu1 %vm7941_vm3, %v7942_v8  ;;  %7492 = vmatprep.mubr.msk.f32.mxu0 %vm7941_vm3, %v7942_v8 }
 0x1b7   : > { %7870 = vmatpush3.bf16.msra.mxu1 %v8518_v62  ;;  %7876 = vmatpush3.bf16.msra.mxu0 %v8520_v63 }
 0x1ba   : > { %7482 = vmatmul.mubr.msk.f32.vlgmr.msra.gmra.mrb[52].mxu1 %vm2548_vm6, %v5944_v23  ;;  %7493 = vmatmul.mubr.msk.f32.vlgmr.msra.gmra.mrb[50].mxu0 %vm2548_vm6, %v6022_v5  ;;  %v6361_v5 = vld [vmem:[%s8814_s19 + $0x4] sm:$0x7] }
 0x1dd   : > { %v2617_v31 = vpop.f32.mrb[8].mxu1  ;;  %v2767_v37 = vpop.f32.mrb[8].mxu0 }
 0x1de   : > { %v7010_v21 = vpop.f32.mrb[9].mxu1  ;;  %v7032_v2 = vpop.f32.mrb[9].mxu0 }
 0x1e5   : > { %v2689_v42 = vpop.f32.mrb[10].mxu1 }
 0x1e6   : > { %v2690_v49 = vadd.f32 %v2689_v42, %v2617_v31  ;;  %v7021_v50 = vpop.f32.mrb[11].mxu1 }
 0x1e8   : > { %v2771_v15 = vadd.f32 %v2767_v37, %v2690_v49 }
 0x1e9   : > { %v2926_v8 = vpop.f32.mrb[10].mxu0 }
 0x1ea   : > { %v7054_v16 = vpop.f32.mrb[11].mxu0 }
 0x1ed   : > { %v2847_v62 = vpop.f32.mrb[12].mxu1 }
 0x1ee   : > { %v2851_v17 = vadd.f32 %v2847_v62, %v2771_v15  ;;  %v7043_v63 = vpop.f32.mrb[13].mxu1 }
 0x1f0   : > { %v2930_v20 = vadd.f32 %v2926_v8, %v2851_v17 }
 0x1f5   : > { %v3005_v22 = vpop.f32.mrb[14].mxu1  ;;  %v3085_v24 = vpop.f32.mrb[12].mxu0 }
 0x1f6   : > { %v3009_v25 = vadd.f32 %v3005_v22, %v2930_v20  ;;  %v7065_v26 = vpop.f32.mrb[15].mxu1  ;;  %v7076_v27 = vpop.f32.mrb[13].mxu0 }
 0x1f8   : > { %v3089_v28 = vadd.f32 %v3085_v24, %v3009_v25 }
 0x1fd   : > { %v3164_v29 = vpop.f32.mrb[16].mxu1  ;;  %v3243_v30 = vpop.f32.mrb[14].mxu0 }
 0x1fe   : > { %v3168_v32 = vadd.f32 %v3164_v29, %v3089_v28  ;;  %v7087_v0 = vpop.f32.mrb[17].mxu1  ;;  %v7098_v33 = vpop.f32.mrb[15].mxu0 }
 0x200   : > { %v3247_v35 = vadd.f32 %v3243_v30, %v3168_v32 }
 0x202   : > { %v3254_v9 = vadd.f32 %v8809_v34, %v3247_v35 }
 0x204   : > { %v3255_v36 = vmax.f32 %v3254_v9, 0.0 }
 0x205   : > { %v3342_v40 = vpop.f32.mrb[18].mxu1  ;;  %v3414_v51 = vpop.f32.mrb[16].mxu0 }
 0x206   : > { %v3256_v54 = vpack.c.bf16 %v3255_v36, %v3255_v36  ;;  %v3415_v43 = vadd.f32 %v3414_v51, %v3342_v40  ;;  %v7109_v45 = vpop.f32.mrb[19].mxu1  ;;  %v7120_v46 = vpop.f32.mrb[17].mxu0 }
 0x208   : > { %v3261_v48 = vsel %vm8817_vm9, %v3256_v54, %v3260_v39  ;;  %v6404_v39 = vld [vmem:[%s8814_s19 + $0x8] sm:$0x7] }
 0x209   : > { %3262 = vst [vmem:[%s8814_s19] sm:$0x7] %v3261_v48 }
 0x20d   : > { %v3491_v52 = vpop.f32.mrb[20].mxu1  ;;  %v3570_v53 = vpop.f32.mrb[18].mxu0 }
 0x20e   : > { %v3495_v55 = vadd.f32 %v3491_v52, %v3415_v43  ;;  %v7131_v56 = vpop.f32.mrb[21].mxu1  ;;  %v7142_v57 = vpop.f32.mrb[19].mxu0 }
 0x210   : > { %v3574_v41 = vadd.f32 %v3570_v53, %v3495_v55 }
 0x215   : > { %v3648_v47 = vpop.f32.mrb[22].mxu1  ;;  %v3726_v58 = vpop.f32.mrb[20].mxu0 }
 0x216   : > { %v3652_v59 = vadd.f32 %v3648_v47, %v3574_v41  ;;  %v7153_v60 = vpop.f32.mrb[23].mxu1  ;;  %v7164_v61 = vpop.f32.mrb[21].mxu0 }
 0x218   : > { %v3730_v1 = vadd.f32 %v3726_v58, %v3652_v59 }
 0x21d   : > { %v3805_v4 = vpop.f32.mrb[24].mxu1  ;;  %v3883_v38 = vpop.f32.mrb[22].mxu0 }
 0x21e   : > { %v3809_v7 = vadd.f32 %v3805_v4, %v3730_v1  ;;  %v7175_v11 = vpop.f32.mrb[25].mxu1  ;;  %v7186_v12 = vpop.f32.mrb[23].mxu0 }
 0x220   : > { %v3887_v13 = vadd.f32 %v3883_v38, %v3809_v7 }
 0x225   : > { %v3961_v44 = vpop.f32.mrb[26].mxu1  ;;  %v4052_v14 = vpop.f32.mrb[24].mxu0 }
 0x226   : > { %v3965_v6 = vadd.f32 %v3961_v44, %v3887_v13  ;;  %v7197_v18 = vpop.f32.mrb[27].mxu1  ;;  %v7208_v10 = vpop.f32.mrb[25].mxu0 }
 0x228   : > { %v3966_v19 = vadd.f32 %v8809_v34, %v3965_v6 }
 0x22a   : > { %v3967_v23 = vmax.f32 %v3966_v19, 0.0 }
 0x22c   : > { %v3968_v31 = vpack.c.bf16 %v3967_v23, %v3967_v23 }
 0x22d   : > { %v4124_v37 = vpop.f32.mrb[28].mxu1  ;;  %v4201_v21 = vpop.f32.mrb[26].mxu0 }
 0x22e   : > { %v3971_v2 = vsel %vm8817_vm9, %v3968_v31, %v6361_v5  ;;  %v4125_v42 = vadd.f32 %v4124_v37, %v4052_v14  ;;  %v7219_v49 = vpop.f32.mrb[29].mxu1  ;;  %v7230_v50 = vpop.f32.mrb[27].mxu0  ;;  %v6447_v5 = vld [vmem:[%s8814_s19 + $0xc] sm:$0x7] }
 0x22f   : > { %6362 = vst [vmem:[%s8814_s19 + $0x4] sm:$0x7] %v3971_v2 }
 0x230   : > { %v4205_v15 = vadd.f32 %v4201_v21, %v4125_v42 }
 0x235   : > { %v4280_v8 = vpop.f32.mrb[30].mxu1  ;;  %v4358_v16 = vpop.f32.mrb[28].mxu0 }
 0x236   : > { %v4284_v62 = vadd.f32 %v4280_v8, %v4205_v15  ;;  %v7241_v17 = vpop.f32.mrb[31].mxu1  ;;  %v7252_v63 = vpop.f32.mrb[29].mxu0 }
 0x238   : > { %v4362_v20 = vadd.f32 %v4358_v16, %v4284_v62 }
 0x23d   : > { %v4436_v22 = vpop.f32.mrb[32].mxu1  ;;  %v4515_v24 = vpop.f32.mrb[30].mxu0 }
 0x23e   : > { %v4440_v25 = vadd.f32 %v4436_v22, %v4362_v20  ;;  %v7263_v26 = vpop.f32.mrb[33].mxu1  ;;  %v7274_v27 = vpop.f32.mrb[31].mxu0 }
 0x240   : > { %v4519_v28 = vadd.f32 %v4515_v24, %v4440_v25 }
 0x245   : > { %v4593_v29 = vpop.f32.mrb[34].mxu1  ;;  %v4671_v30 = vpop.f32.mrb[32].mxu0 }
 0x246   : > { %v4597_v32 = vadd.f32 %v4593_v29, %v4519_v28  ;;  %v7285_v0 = vpop.f32.mrb[35].mxu1  ;;  %v7296_v33 = vpop.f32.mrb[33].mxu0 }
 0x248   : > { %v4675_v35 = vadd.f32 %v4671_v30, %v4597_v32 }
 0x24a   : > { %v4676_v9 = vadd.f32 %v8809_v34, %v4675_v35 }
 0x24c   : > { %v4677_v36 = vmax.f32 %v4676_v9, 0.0 }
 0x24d   : > { %v4762_v40 = vpop.f32.mrb[36].mxu1  ;;  %v4834_v51 = vpop.f32.mrb[34].mxu0 }
 0x24e   : > { %v4678_v54 = vpack.c.bf16 %v4677_v36, %v4677_v36  ;;  %v4835_v43 = vadd.f32 %v4834_v51, %v4762_v40  ;;  %v7307_v45 = vpop.f32.mrb[37].mxu1  ;;  %v7318_v46 = vpop.f32.mrb[35].mxu0 }
 0x250   : > { %v4681_v48 = vsel %vm8817_vm9, %v4678_v54, %v6404_v39  ;;  %v6490_v39 = vld [vmem:[%s8814_s19 + $0x10] sm:$0x7] }
 0x251   : > { %6405 = vst [vmem:[%s8814_s19 + $0x8] sm:$0x7] %v4681_v48 }
 0x255   : > { %v4911_v52 = vpop.f32.mrb[38].mxu1  ;;  %v4990_v53 = vpop.f32.mrb[36].mxu0 }
 0x256   : > { %v4915_v55 = vadd.f32 %v4911_v52, %v4835_v43  ;;  %v7329_v56 = vpop.f32.mrb[39].mxu1  ;;  %v7340_v57 = vpop.f32.mrb[37].mxu0 }
 0x258   : > { %v4994_v41 = vadd.f32 %v4990_v53, %v4915_v55 }
 0x25d   : > { %v5068_v47 = vpop.f32.mrb[40].mxu1  ;;  %v5146_v58 = vpop.f32.mrb[38].mxu0 }
 0x25e   : > { %v5072_v59 = vadd.f32 %v5068_v47, %v4994_v41  ;;  %v7351_v60 = vpop.f32.mrb[41].mxu1  ;;  %v7362_v61 = vpop.f32.mrb[39].mxu0 }
 0x260   : > { %v5150_v1 = vadd.f32 %v5146_v58, %v5072_v59 }
 0x265   : > { %v5225_v4 = vpop.f32.mrb[42].mxu1  ;;  %v5303_v38 = vpop.f32.mrb[40].mxu0 }
 0x266   : > { %v5229_v7 = vadd.f32 %v5225_v4, %v5150_v1  ;;  %v7373_v11 = vpop.f32.mrb[43].mxu1  ;;  %v7384_v12 = vpop.f32.mrb[41].mxu0 }
 0x268   : > { %v5307_v13 = vadd.f32 %v5303_v38, %v5229_v7 }
 0x26d   : > { %v5381_v44 = vpop.f32.mrb[44].mxu1  ;;  %v5472_v14 = vpop.f32.mrb[42].mxu0 }
 0x26e   : > { %v5385_v6 = vadd.f32 %v5381_v44, %v5307_v13  ;;  %v7395_v18 = vpop.f32.mrb[45].mxu1  ;;  %v7406_v10 = vpop.f32.mrb[43].mxu0 }
 0x270   : > { %v5386_v19 = vadd.f32 %v8809_v34, %v5385_v6 }
 0x272   : > { %v5387_v23 = vmax.f32 %v5386_v19, 0.0 }
 0x274   : > { %v5388_v31 = vpack.c.bf16 %v5387_v23, %v5387_v23 }
 0x275   : > { %v5544_v37 = vpop.f32.mrb[46].mxu1  ;;  %v5621_v21 = vpop.f32.mrb[44].mxu0 }
 0x276   : > { %v5391_v2 = vsel %vm8817_vm9, %v5388_v31, %v6447_v5  ;;  %v5545_v42 = vadd.f32 %v5544_v37, %v5472_v14  ;;  %v7417_v49 = vpop.f32.mrb[47].mxu1  ;;  %v7428_v50 = vpop.f32.mrb[45].mxu0 }
 0x277   : > { %6448 = vst [vmem:[%s8814_s19 + $0xc] sm:$0x7] %v5391_v2 }
 0x278   : > { %v5625_v15 = vadd.f32 %v5621_v21, %v5545_v42 }
 0x27d   : > { %v5700_v8 = vpop.f32.mrb[48].mxu1  ;;  %v5778_v16 = vpop.f32.mrb[46].mxu0 }
 0x27e   : > { %v5704_v62 = vadd.f32 %v5700_v8, %v5625_v15  ;;  %v7439_v17 = vpop.f32.mrb[49].mxu1  ;;  %v7450_v63 = vpop.f32.mrb[47].mxu0 }
 0x280   : > { %v5782_v20 = vadd.f32 %v5778_v16, %v5704_v62 }
 0x285   : > { %v5856_v22 = vpop.f32.mrb[50].mxu1  ;;  %v5935_v24 = vpop.f32.mrb[48].mxu0 }
 0x286   : > { %v5860_v25 = vadd.f32 %v5856_v22, %v5782_v20  ;;  %v7461_v26 = vpop.f32.mrb[51].mxu1  ;;  %v7472_v27 = vpop.f32.mrb[49].mxu0 }
 0x288   : > { %v5939_v28 = vadd.f32 %v5935_v24, %v5860_v25 }
 0x28d   : > { %v6013_v29 = vpop.f32.mrb[52].mxu1  ;;  %v6091_v30 = vpop.f32.mrb[50].mxu0 }
 0x28e   : > { %v6017_v32 = vadd.f32 %v6013_v29, %v5939_v28  ;;  %v7483_v0 = vpop.f32.mrb[53].mxu1  ;;  %v7494_v33 = vpop.f32.mrb[51].mxu0 }
 0x290   : > { %v6095_v35 = vadd.f32 %v6091_v30, %v6017_v32 }
 0x292   : > { %v6096_v9 = vadd.f32 %v8809_v34, %v6095_v35 }
 0x294   : > { %v6097_v36 = vmax.f32 %v6096_v9, 0.0 }
 0x296   : > { %v6098_v40 = vpack.c.bf16 %v6097_v36, %v6097_v36 }
 0x298   : > { %v6101_v51 = vsel %vm8817_vm9, %v6098_v40, %v6490_v39 }
 0x299   : > { %6491 = vst [vmem:[%s8814_s19 + $0x10] sm:$0x7] %v6101_v51 }
 0x29a PF: > { %s17_s23 = sadd.s32 1, %s7937_s23  }
 0x29b   : > { %p14_p4 = scmp.ge.s32.totalorder %s17_s23, 4  }
 0x29d   :  { %16 = sbr.rel (!%p14_p4) target bundleno = 2 (0x2), region = 102 }

</bundles_post_ra>
